<compile_context>
chip_gen: v6e
topology: v6e:2x2x1
jax: 0.10.0
libtpu: 0.0.40
codegen_flags: <defaults>
</compile_context>

<pallas_src>
import functools
import math

import jax
import jax.numpy as jnp
from jax.experimental import pallas as pl
from jax.experimental.pallas import tpu as pltpu

# ----------------------------- hyper-parameters ------------------------------
N_SLICES = 8          # sequence length n (number of slices)
H = W = 16            # slice spatial size
D_IN = 8              # pos-emb input dim (theta(6) + pos(2))
D_OUT = 6
D_MODEL = 32
D_INNER = 64
N_HEAD = 4
D_K = D_MODEL // N_HEAD
D_V = D_MODEL // N_HEAD
N_LAYERS = 2
RES_D_IN = 3
RES_SCALE = 1.0
C1, C2 = 16, 32       # simplified ResNet channel widths (real ResNet34: 64..512)
LN_EPS = 1e-6         # jadore-style transformer LayerNorm eps


# ============================ pallas_call helpers =============================
def _full_spec(shape):
    """Whole-array BlockSpec (block == full array, single grid step)."""
    return pl.BlockSpec(shape, lambda *_: (0,) * len(shape))


def _pcall(kernel, inputs, out_shapes):
    """pallas_call with grid=(1,) and full-array blocks for every operand."""
    multi = isinstance(out_shapes, (tuple, list))
    outs = tuple(out_shapes) if multi else (out_shapes,)
    call = pl.pallas_call(
        kernel,
        grid=(1,),
        in_specs=[_full_spec(x.shape) for x in inputs],
        out_specs=(tuple(_full_spec(o.shape) for o in outs)
                   if multi else _full_spec(out_shapes.shape)),
        out_shape=(tuple(outs) if multi else out_shapes),
        compiler_params=pltpu.CompilerParams(dimension_semantics=("arbitrary",)),
    )
    return call(*inputs)


def _pick_tm(m):
    """Largest M-tile that keeps lane-dim blocks 128-aligned (or full)."""
    for tm in (512, 256, 128):
        if m > tm and m % tm == 0:
            return tm
    return m


def _conv_pcall(kernel, operands, cout, m):
    """Conv-GEMM pallas_call: output (cout, m), grid over M marked "parallel".

    operands: list of (array, tiled_over_M) -- all arrays are 2D.
    """
    tm = _pick_tm(m)
    in_specs = []
    for a, tiled in operands:
        if tiled:
            in_specs.append(pl.BlockSpec((a.shape[0], tm), lambda i: (0, i)))
        else:
            in_specs.append(pl.BlockSpec(a.shape, lambda i: (0, 0)))
    call = pl.pallas_call(
        kernel,
        grid=(m // tm,),
        in_specs=in_specs,
        out_specs=pl.BlockSpec((cout, tm), lambda i: (0, i)),
        out_shape=jax.ShapeDtypeStruct((cout, m), jnp.float32),
        compiler_params=pltpu.CompilerParams(dimension_semantics=("parallel",)),
    )
    return call(*[a for a, _ in operands])


# =========================== in-kernel math helpers ===========================
def _f32_dot(a, b):
    return jnp.dot(a, b, preferred_element_type=jnp.float32)


def _ln(x, g, b, eps):
    mu = jnp.mean(x, axis=-1, keepdims=True)
    xc = x - mu
    var = jnp.mean(xc * xc, axis=-1, keepdims=True)
    return xc * jax.lax.rsqrt(var + eps) * g + b


# ======================= fused conv (im2col GEMM) kernels =====================
def _conv_gemm_kernel(w_ref, cols_ref, s_ref, o_ref, *, relu):
    # out (Cout, TM) = W (Cout, K) @ colsT (K, TM) + shift ; lane-dense store.
    acc = _f32_dot(w_ref[...], cols_ref[...]) + s_ref[...]
    if relu:
        acc = jnp.maximum(acc, 0.0)
    o_ref[...] = acc.astype(o_ref.dtype)


def _conv_res_kernel(w_ref, cols_ref, s_ref, id_ref, o_ref):
    # BasicBlock tail (identity shortcut): relu(conv2 + shift + identity)
    acc = _f32_dot(w_ref[...], cols_ref[...]) + s_ref[...] + id_ref[...]
    o_ref[...] = jnp.maximum(acc, 0.0).astype(o_ref.dtype)


def _conv_dual_res_kernel(w2_ref, cols2_ref, s2_ref,
                          wd_ref, colsd_ref, sd_ref, o_ref):
    # BasicBlock tail (downsample shortcut): relu(conv2 + shift2 + convd + shiftd)
    acc = _f32_dot(w2_ref[...], cols2_ref[...]) + s2_ref[...]
    acc = acc + _f32_dot(wd_ref[...], colsd_ref[...]) + sd_ref[...]
    o_ref[...] = jnp.maximum(acc, 0.0).astype(o_ref.dtype)


# ================= fused transformer (GAP+fc+LN + L layers + head) ============
def _transformer_kernel(x3_ref, fcw_ref, fcb_ref, pe_ref, ln0g_ref, ln0b_ref,
                        wqkv_ref, bqkv_ref, wo3_ref, bo_ref,
                        ln1g_ref, ln1b_ref, w1_ref, b1_ref, w2_ref, b2_ref,
                        ln2g_ref, ln2b_ref, fow_ref, fob_ref, theta_ref,
                        to_ref, attn_ref,
                        *, n_layers, n_head, d_k, d_model, eps, res_scale):
    # ---- img_encoder tail: GAP + fc + positional-emb add + input LayerNorm ----
    feat_cn = jnp.mean(x3_ref[...], axis=-1)                     # (C, n) channel-major GAP
    y0 = jax.lax.dot_general(feat_cn, fcw_ref[...],
                             (((0,), (0,)), ((), ())),           # contract channel dim
                             preferred_element_type=jnp.float32)  # (n, d_model)
    x = _ln(y0 + fcb_ref[...] + pe_ref[...], ln0g_ref[...], ln0b_ref[...], eps)

    scale = 1.0 / math.sqrt(d_k)
    for l in range(n_layers):                                    # unrolled (n_layers small)
        # ---- one fused QKV GEMM per layer ----
        qkv = _f32_dot(x, wqkv_ref[l]) + bqkv_ref[l]             # (n, 3*d_model)
        q_h = jnp.stack([qkv[:, h * d_k:(h + 1) * d_k]
                         for h in range(n_head)], axis=0)        # (h, n, d_k)
        k_h = jnp.stack([qkv[:, d_model + h * d_k:d_model + (h + 1) * d_k]
                         for h in range(n_head)], axis=0)
        v_h = jnp.stack([qkv[:, 2 * d_model + h * d_k:2 * d_model + (h + 1) * d_k]
                         for h in range(n_head)], axis=0)
        # ---- head-batched attention: one score GEMM, one softmax pass ----
        s = jax.lax.dot_general(q_h, k_h, (((2,), (2,)), ((0,), (0,))),
                                preferred_element_type=jnp.float32) * scale   # (h, n, n)
        m = jnp.max(s, axis=-1, keepdims=True)
        p = jnp.exp(s - m)
        probs = p / jnp.sum(p, axis=-1, keepdims=True)           # exact softmax (rows sum to 1)
        if l == n_layers - 1:
            attn_ref[...] = probs.astype(attn_ref.dtype)         # only last layer emits attn
        ctx = jax.lax.dot_general(probs, v_h, (((2,), (1,)), ((0,), (0,))),
                                  preferred_element_type=jnp.float32)         # (h, n, d_v)
        proj = jax.lax.dot_general(ctx, wo3_ref[l], (((2,), (1,)), ((0,), (0,))),
                                   preferred_element_type=jnp.float32)        # (h, n, d_model)
        mha = jnp.sum(proj, axis=0) + bo_ref[l]                  # (n, d_model)
        # ---- add & norm, FFN, add & norm (dropout: eval -> identity) ----
        x1 = _ln(mha + x, ln1g_ref[l], ln1b_ref[l], eps)
        hdn = jnp.maximum(_f32_dot(x1, w1_ref[l]) + b1_ref[l], 0.0)
        ff = _f32_dot(hdn, w2_ref[l]) + b2_ref[l]
        x = _ln(ff + x1, ln2g_ref[l], ln2b_ref[l], eps)

    # ---- output Linear + theta residual ----
    yo = _f32_dot(x, fow_ref[...]) + fob_ref[...]                # (n, d_out)
    to_ref[...] = (theta_ref[...] + res_scale * yo).astype(to_ref.dtype)


# ================================ JAX glue ====================================
def _im2col_cm(x_cnhw, kh, kw, stride, pad):
    """x: (C, N, H, W) channel-major -> colsT (kh*kw*C, N*Ho*Wo), Ho, Wo."""
    C, N, Hin, Win = x_cnhw.shape
    xp = jnp.pad(x_cnhw, ((0, 0), (0, 0), (pad, pad), (pad, pad)))
    Ho = (Hin + 2 * pad - kh) // stride + 1
    Wo = (Win + 2 * pad - kw) // stride + 1
    patches = []
    for i in range(kh):
        for j in range(kw):
            patches.append(xp[:, :, i:i + stride * Ho:stride, j:j + stride * Wo:stride])
    cols = jnp.stack(patches, axis=0)                    # (kh*kw, C, N, Ho, Wo)
    return cols.reshape(kh * kw * C, N * Ho * Wo), Ho, Wo


def _prep_conv_cm(x_cnhw, cp, stride, pad):
    """GEMM operands with BN folded: W (Cout, K) f32, colsT (K, M) f32, shift (Cout,1).

    No K padding -- the sublane (K) axis of a full-array block needs no 128 alignment.
    """
    w_oihw = cp["w"]
    Cout, Cin, kh, kw = w_oihw.shape
    colsT, Ho, Wo = _im2col_cm(x_cnhw, kh, kw, stride, pad)
    wK = jnp.transpose(w_oihw, (0, 2, 3, 1)).reshape(Cout, kh * kw * Cin)  # K order = (i,j,cin)
    wK = (wK * cp["scale"][:, None]).astype(jnp.float32)   # fold eval-mode BatchNorm scale
    shift = cp["shift"].reshape(Cout, 1).astype(jnp.float32)
    return wK, colsT.astype(jnp.float32), shift, Ho, Wo


def conv2d_cm(x_cnhw, cp, stride, pad, relu=True):
    """Conv (OIHW weights, BN folded) as a lane-dense channel-major im2col GEMM."""
    n = x_cnhw.shape[1]
    wK, colsT, shift, Ho, Wo = _prep_conv_cm(x_cnhw, cp, stride, pad)
    cout, M = wK.shape[0], colsT.shape[1]
    y = _conv_pcall(functools.partial(_conv_gemm_kernel, relu=relu),
                    [(wK, False), (colsT, True), (shift, False)], cout, M)
    return y.reshape(cout, n, Ho, Wo)                    # stays channel-major


def maxpool2d_cm(x, k=3, stride=2, pad=1):
    C, N, Hin, Win = x.shape
    xp = jnp.pad(x, ((0, 0), (0, 0), (pad, pad), (pad, pad)),
                 constant_values=-jnp.inf)
    Ho = (Hin + 2 * pad - k) // stride + 1
    Wo = (Win + 2 * pad - k) // stride + 1
    out = None
    for i in range(k):
        for j in range(k):
            p = xp[:, :, i:i + stride * Ho:stride, j:j + stride * Wo:stride]
            out = p if out is None else jnp.maximum(out, p)
    return out


def positional_encoding(x, d_model):
    """Sinusoidal encoding of (n, d_in) -> (n, d_model)."""
    # TODO(synk): verify sin/cos interleave order element-for-element vs nesvor's
    # PositionalEncoding (padding/ordering differences are a silent mismatch).
    n, d_in = x.shape
    n_freq = d_model // (2 * d_in)
    freq = jnp.exp(jnp.arange(n_freq, dtype=jnp.float32) *
                   (-math.log(1e4) / max(n_freq, 1)))
    ang = x[:, :, None] * freq[None, None, :]
    pe = jnp.concatenate([jnp.sin(ang), jnp.cos(ang)], axis=-1).reshape(n, -1)
    if pe.shape[-1] < d_model:
        pe = jnp.pad(pe, ((0, 0), (0, d_model - pe.shape[-1])))
    return pe


def pos_augment_cm(slices_nchw):
    """SVRtransformer.pos_augment (volume=None, res_d_in==3), built channel-major."""
    n, _, h, w = slices_nchw.shape
    yv = jnp.linspace(-(h - 1) / 256.0, (h - 1) / 256.0, h, dtype=jnp.float32)
    xv = jnp.linspace(-(w - 1) / 256.0, (w - 1) / 256.0, w, dtype=jnp.float32)
    yy, xx = jnp.meshgrid(yv, xv, indexing="ij")
    img = slices_nchw[:, 0][None]                               # (1, n, h, w)
    yy = jnp.broadcast_to(yy[None, None], (1, n, h, w))
    xx = jnp.broadcast_to(xx[None, None], (1, n, h, w))
    return jnp.concatenate([img, yy, xx], axis=0)               # (3, n, h, w)


# =============================== model blocks =================================
def basic_block_cm(x_cnhw, p, stride):
    """conv-bn-relu -> conv-bn (+shortcut) -> relu, tail fused in one kernel."""
    n = x_cnhw.shape[1]
    out1 = conv2d_cm(x_cnhw, p["c1"], stride=stride, pad=1, relu=True)
    wK2, colsT2, s2, Ho, Wo = _prep_conv_cm(out1, p["c2"], stride=1, pad=1)
    cout, M = wK2.shape[0], colsT2.shape[1]
    if "cd" in p:   # downsample shortcut fused as a second GEMM
        wKd, colsTd, sd, _, _ = _prep_conv_cm(x_cnhw, p["cd"], stride=stride, pad=0)
        y = _conv_pcall(_conv_dual_res_kernel,
                        [(wK2, False), (colsT2, True), (s2, False),
                         (wKd, False), (colsTd, True), (sd, False)], cout, M)
    else:           # identity shortcut: channel-major reshape, no transpose
        idm = x_cnhw.reshape(cout, M).astype(jnp.float32)
        y = _conv_pcall(_conv_res_kernel,
                        [(wK2, False), (colsT2, True), (s2, False), (idm, True)],
                        cout, M)
    return y.reshape(cout, n, Ho, Wo)


def resnet_encoder_cm(rp, x_cnhw):
    # TODO(synk): full ResNet-34 (3/4/6/3 basic blocks, 64..512 channels) reduced to
    # conv stem + 2 basic blocks at small test channels; GAP + fc are fused into the
    # transformer kernel so only the channel-major feature map is returned here.
    x = conv2d_cm(x_cnhw, rp["conv1"], stride=2, pad=3, relu=True)
    x = maxpool2d_cm(x, k=3, stride=2, pad=1)
    x = basic_block_cm(x, rp["block1"], stride=1)
    x = basic_block_cm(x, rp["block2"], stride=2)
    return x                                                    # (C2, n, h, w)


def transformer_head(feat_cm, params, pe, theta, *, n_layers=N_LAYERS,
                     n_head=N_HEAD, eps=LN_EPS, res_scale=RES_SCALE):
    """Single fused pallas_call: GAP+fc+pe+LN0 + all encoder layers + fc + residual."""
    C, n, h, w = feat_cm.shape
    x3 = feat_cm.reshape(C, n, h * w)
    rp, enc = params["resnet"], params["enc"]
    d_model = rp["fc_w"].shape[1]
    d_out = params["fc_w"].shape[1]
    inputs = [x3,
              rp["fc_w"], rp["fc_b"].reshape(1, d_model),
              pe,
              params["ln0_g"].reshape(1, d_model), params["ln0_b"].reshape(1, d_model),
              enc["wqkv"], enc["bqkv"], enc["wo3"], enc["bo"],
              enc["ln1_g"], enc["ln1_b"], enc["w1"], enc["b1"],
              enc["w2"], enc["b2"], enc["ln2_g"], enc["ln2_b"],
              params["fc_w"], params["fc_b"].reshape(1, d_out), theta]
    kernel = functools.partial(
        _transformer_kernel, n_layers=n_layers, n_head=n_head,
        d_k=d_model // n_head, d_model=d_model, eps=eps, res_scale=res_scale)
    theta_out, attn = _pcall(
        kernel, inputs,
        (jax.ShapeDtypeStruct((n, d_out), jnp.float32),
         jax.ShapeDtypeStruct((n_head, n, n), jnp.float32)))
    return theta_out, attn


def svr_transformer_forward(params, theta, slices, pos, volume=None):
    # TODO(synk): point2mat / mat_update_resolution / slice_acquisition (custom CUDA
    # slice-to-volume resampling) have no Pallas port; volume=None path only
    # (y = None), matching the module's None branch exactly.
    assert volume is None
    pos_full = jnp.concatenate([theta, pos], axis=-1)           # (n, d_in)
    pe = positional_encoding(pos_full, D_MODEL)                 # (n, d_model)
    x_cm = pos_augment_cm(slices)                               # (3, n, h, w)
    feat = resnet_encoder_cm(params["resnet"], x_cm)            # (C2, n, h', w')
    return transformer_head(feat, params, pe, theta)


# ============================== parameter init ================================
def init_params(key):
    keys = iter(jax.random.split(key, 64))

    def nrm(shape, s=0.05):
        return s * jax.random.normal(next(keys), shape, jnp.float32)

    def conv_p(cin, cout, k):
        return {"w": nrm((cout, cin, k, k)),
                "scale": 1.0 + nrm((cout,), 0.01),   # folded BatchNorm (eval)
                "shift": nrm((cout,), 0.01)}

    resnet = {
        "conv1": conv_p(RES_D_IN, C1, 7),
        "block1": {"c1": conv_p(C1, C1, 3), "c2": conv_p(C1, C1, 3)},
        "block2": {"c1": conv_p(C1, C2, 3), "c2": conv_p(C2, C2, 3),
                   "cd": conv_p(C1, C2, 1)},
        "fc_w": nrm((C2, D_MODEL)),
        "fc_b": jnp.zeros((D_MODEL,), jnp.float32),
    }

    # Encoder weights: QKV pre-concatenated, output proj pre-reshaped per head,
    # everything stacked across layers -> zero per-call weight plumbing.
    def stack(fn):
        return jnp.stack([fn() for _ in range(N_LAYERS)], axis=0)

    enc = {
        "wqkv": stack(lambda: nrm((D_MODEL, 3 * D_MODEL))),          # (L, d, 3d)
        "bqkv": jnp.zeros((N_LAYERS, 1, 3 * D_MODEL), jnp.float32),
        "wo3": stack(lambda: nrm((N_HEAD, D_V, D_MODEL))),           # (L, h, d_v, d)
        "bo": jnp.zeros((N_LAYERS, 1, D_MODEL), jnp.float32),
        "ln1_g": jnp.ones((N_LAYERS, 1, D_MODEL), jnp.float32),
        "ln1_b": jnp.zeros((N_LAYERS, 1, D_MODEL), jnp.float32),
        "w1": stack(lambda: nrm((D_MODEL, D_INNER))),
        "b1": jnp.zeros((N_LAYERS, 1, D_INNER), jnp.float32),
        "w2": stack(lambda: nrm((D_INNER, D_MODEL))),
        "b2": jnp.zeros((N_LAYERS, 1, D_MODEL), jnp.float32),
        "ln2_g": jnp.ones((N_LAYERS, 1, D_MODEL), jnp.float32),
        "ln2_b": jnp.zeros((N_LAYERS, 1, D_MODEL), jnp.float32),
    }

    return {
        "resnet": resnet,
        "ln0_g": jnp.ones((D_MODEL,), jnp.float32),
        "ln0_b": jnp.zeros((D_MODEL,), jnp.float32),
        "enc": enc,
        "fc_w": nrm((D_MODEL, D_OUT)),
        "fc_b": jnp.zeros((D_OUT,), jnp.float32),
    }


# ==================================== main ====================================
if __name__ == "__main__":
    root = jax.random.PRNGKey(0)
    k_par, k_theta, k_slices, k_pos = jax.random.split(root, 4)

    params = init_params(k_par)
    theta = 0.1 * jax.random.normal(k_theta, (N_SLICES, 6), jnp.float32)
    slices = jax.random.normal(k_slices, (N_SLICES, 1, H, W), jnp.float32)
    pos = jax.random.normal(k_pos, (N_SLICES, 2), jnp.float32)

    fwd = jax.jit(lambda p, t, s, q: svr_transformer_forward(p, t, s, q, volume=None))
    theta_out, attn = fwd(params, theta, slices, pos)
    theta_out = jax.block_until_ready(theta_out)
    attn = jax.block_until_ready(attn)

    assert theta_out.shape == (N_SLICES, 6)
    assert attn.shape == (N_HEAD, N_SLICES, N_SLICES)
    assert bool(jnp.all(jnp.isfinite(theta_out)))
    assert bool(jnp.all(jnp.isfinite(attn)))
    print("KERNEL_OK")
</pallas_src>

<mosaic_0001>
module attributes {stable_mosaic.version = 11 : i64} {
  func.func @_conv_gemm_kernel(%arg0: i32, %arg1: memref<16x147xf32, #tpu.memory_space<vmem>>, %arg2: memref<147x256xf32, #tpu.memory_space<vmem>>, %arg3: memref<16x1xf32, #tpu.memory_space<vmem>>, %arg4: memref<16x256xf32, #tpu.memory_space<vmem>>) attributes {dimension_semantics = [#tpu.dimension_semantics<parallel>], iteration_bounds = array<i64: 2>, scalar_prefetch = 0 : i64, scratch_operands = 0 : i64, tpu.core_type = #tpu.core_type<tc>, window_params = [{pipeline_mode = #tpu.pipeline_mode<synchronous>, transform_indices = @transform_0, window_bounds = array<i64: 16, 147>}, {transform_indices = @transform_1, window_bounds = array<i64: 147, 256>}, {pipeline_mode = #tpu.pipeline_mode<synchronous>, transform_indices = @transform_2, window_bounds = array<i64: 16, 1>}, {transform_indices = @transform_3, window_bounds = array<i64: 16, 256>}]} {
    %c0 = arith.constant 0 : index
    %c0_0 = arith.constant 0 : index
    %0 = vector.load %arg1[%c0, %c0_0] : memref<16x147xf32, #tpu.memory_space<vmem>>, vector<16x147xf32>
    %c0_1 = arith.constant 0 : index
    %c0_2 = arith.constant 0 : index
    %1 = vector.load %arg2[%c0_1, %c0_2] : memref<147x256xf32, #tpu.memory_space<vmem>>, vector<147x256xf32>
    %cst = arith.constant dense<0.000000e+00> : vector<16x256xf32>
    %2 = tpu.matmul %0, %1, %cst {dimension_numbers = #tpu.dot_dimension_numbers<[1], [0], [0], [1], [0, 0, 1, 1], [], []>} : vector<16x147xf32>, vector<147x256xf32>, vector<16x256xf32> -> vector<16x256xf32>
    %c0_3 = arith.constant 0 : index
    %c0_4 = arith.constant 0 : index
    %3 = vector.load %arg3[%c0_3, %c0_4] : memref<16x1xf32, #tpu.memory_space<vmem>>, vector<16x1xf32>
    %4 = vector.broadcast %3 : vector<16x1xf32> to vector<16x256xf32>
    %5 = arith.addf %2, %4 : vector<16x256xf32>
    %cst_5 = arith.constant 0.000000e+00 : f32
    %6 = vector.broadcast %cst_5 : f32 to vector<16x256xf32>
    %7 = arith.maximumf %5, %6 : vector<16x256xf32>
    %c0_6 = arith.constant 0 : index
    %c0_7 = arith.constant 0 : index
    %8 = vector.load %arg4[%c0_6, %c0_7] : memref<16x256xf32, #tpu.memory_space<vmem>>, vector<16x256xf32>
    tpu.vector_store %arg4[%c0_6, %c0_7], %7 {strides = array<i32>} : memref<16x256xf32, #tpu.memory_space<vmem>>, vector<16x256xf32>,
    return
  }
  func.func @transform_0(%arg0: i32) -> (i32, i32) {
    %c0_i32 = arith.constant 0 : i32
    %c0_i32_0 = arith.constant 0 : i32
    %c0_i32_1 = arith.constant 0 : i32
    return %c0_i32, %c0_i32_0 : i32, i32
  }
  func.func @transform_1(%arg0: i32) -> (i32, i32) {
    %c0_i32 = arith.constant 0 : i32
    %c0_i32_0 = arith.constant 0 : i32
    return %c0_i32, %arg0 : i32, i32
  }
  func.func @transform_2(%arg0: i32) -> (i32, i32) {
    %c0_i32 = arith.constant 0 : i32
    %c0_i32_0 = arith.constant 0 : i32
    %c0_i32_1 = arith.constant 0 : i32
    return %c0_i32, %c0_i32_0 : i32, i32
  }
  func.func @transform_3(%arg0: i32) -> (i32, i32) {
    %c0_i32 = arith.constant 0 : i32
    %c0_i32_0 = arith.constant 0 : i32
    return %c0_i32, %arg0 : i32, i32
  }
}

module attributes {stable_mosaic.version = 11 : i64} {
  func.func @_conv_gemm_kernel(%arg0: i32, %arg1: memref<16x144xf32, #tpu.memory_space<vmem>>, %arg2: memref<144x128xf32, #tpu.memory_space<vmem>>, %arg3: memref<16x1xf32, #tpu.memory_space<vmem>>, %arg4: memref<16x128xf32, #tpu.memory_space<vmem>>) attributes {dimension_semantics = [#tpu.dimension_semantics<parallel>], iteration_bounds = array<i64: 1>, scalar_prefetch = 0 : i64, scratch_operands = 0 : i64, tpu.core_type = #tpu.core_type<tc>, window_params = [{pipeline_mode = #tpu.pipeline_mode<synchronous>, transform_indices = @transform_0, window_bounds = array<i64: 16, 144>}, {transform_indices = @transform_1, window_bounds = array<i64: 144, 128>}, {pipeline_mode = #tpu.pipeline_mode<synchronous>, transform_indices = @transform_2, window_bounds = array<i64: 16, 1>}, {transform_indices = @transform_3, window_bounds = array<i64: 16, 128>}]} {
    %c0 = arith.constant 0 : index
    %c0_0 = arith.constant 0 : index
    %0 = vector.load %arg1[%c0, %c0_0] : memref<16x144xf32, #tpu.memory_space<vmem>>, vector<16x144xf32>
    %c0_1 = arith.constant 0 : index
    %c0_2 = arith.constant 0 : index
    %1 = vector.load %arg2[%c0_1, %c0_2] : memref<144x128xf32, #tpu.memory_space<vmem>>, vector<144x128xf32>
    %cst = arith.constant dense<0.000000e+00> : vector<16x128xf32>
    %2 = tpu.matmul %0, %1, %cst {dimension_numbers = #tpu.dot_dimension_numbers<[1], [0], [0], [1], [0, 0, 1, 1], [], []>} : vector<16x144xf32>, vector<144x128xf32>, vector<16x128xf32> -> vector<16x128xf32>
    %c0_3 = arith.constant 0 : index
    %c0_4 = arith.constant 0 : index
    %3 = vector.load %arg3[%c0_3, %c0_4] : memref<16x1xf32, #tpu.memory_space<vmem>>, vector<16x1xf32>
    %4 = vector.broadcast %3 : vector<16x1xf32> to vector<16x128xf32>
    %5 = arith.addf %2, %4 : vector<16x128xf32>
    %cst_5 = arith.constant 0.000000e+00 : f32
    %6 = vector.broadcast %cst_5 : f32 to vector<16x128xf32>
    %7 = arith.maximumf %5, %6 : vector<16x128xf32>
    %c0_6 = arith.constant 0 : index
    %c0_7 = arith.constant 0 : index
    %8 = vector.load %arg4[%c0_6, %c0_7] : memref<16x128xf32, #tpu.memory_space<vmem>>, vector<16x128xf32>
    tpu.vector_store %arg4[%c0_6, %c0_7], %7 {strides = array<i32>} : memref<16x128xf32, #tpu.memory_space<vmem>>, vector<16x128xf32>,
    return
  }
  func.func @transform_0(%arg0: i32) -> (i32, i32) {
    %c0_i32 = arith.constant 0 : i32
    %c0_i32_0 = arith.constant 0 : i32
    %c0_i32_1 = arith.constant 0 : i32
    return %c0_i32, %c0_i32_0 : i32, i32
  }
  func.func @transform_1(%arg0: i32) -> (i32, i32) {
    %c0_i32 = arith.constant 0 : i32
    %c0_i32_0 = arith.constant 0 : i32
    return %c0_i32, %arg0 : i32, i32
  }
  func.func @transform_2(%arg0: i32) -> (i32, i32) {
    %c0_i32 = arith.constant 0 : i32
    %c0_i32_0 = arith.constant 0 : i32
    %c0_i32_1 = arith.constant 0 : i32
    return %c0_i32, %c0_i32_0 : i32, i32
  }
  func.func @transform_3(%arg0: i32) -> (i32, i32) {
    %c0_i32 = arith.constant 0 : i32
    %c0_i32_0 = arith.constant 0 : i32
    return %c0_i32, %arg0 : i32, i32
  }
}

module attributes {stable_mosaic.version = 11 : i64} {
  func.func @_conv_res_kernel(%arg0: i32, %arg1: memref<16x144xf32, #tpu.memory_space<vmem>>, %arg2: memref<144x128xf32, #tpu.memory_space<vmem>>, %arg3: memref<16x1xf32, #tpu.memory_space<vmem>>, %arg4: memref<16x128xf32, #tpu.memory_space<vmem>>, %arg5: memref<16x128xf32, #tpu.memory_space<vmem>>) attributes {dimension_semantics = [#tpu.dimension_semantics<parallel>], iteration_bounds = array<i64: 1>, scalar_prefetch = 0 : i64, scratch_operands = 0 : i64, tpu.core_type = #tpu.core_type<tc>, window_params = [{pipeline_mode = #tpu.pipeline_mode<synchronous>, transform_indices = @transform_0, window_bounds = array<i64: 16, 144>}, {transform_indices = @transform_1, window_bounds = array<i64: 144, 128>}, {pipeline_mode = #tpu.pipeline_mode<synchronous>, transform_indices = @transform_2, window_bounds = array<i64: 16, 1>}, {transform_indices = @transform_3, window_bounds = array<i64: 16, 128>}, {transform_indices = @transform_4, window_bounds = array<i64: 16, 128>}]} {
    %c0 = arith.constant 0 : index
    %c0_0 = arith.constant 0 : index
    %0 = vector.load %arg1[%c0, %c0_0] : memref<16x144xf32, #tpu.memory_space<vmem>>, vector<16x144xf32>
    %c0_1 = arith.constant 0 : index
    %c0_2 = arith.constant 0 : index
    %1 = vector.load %arg2[%c0_1, %c0_2] : memref<144x128xf32, #tpu.memory_space<vmem>>, vector<144x128xf32>
    %cst = arith.constant dense<0.000000e+00> : vector<16x128xf32>
    %2 = tpu.matmul %0, %1, %cst {dimension_numbers = #tpu.dot_dimension_numbers<[1], [0], [0], [1], [0, 0, 1, 1], [], []>} : vector<16x144xf32>, vector<144x128xf32>, vector<16x128xf32> -> vector<16x128xf32>
    %c0_3 = arith.constant 0 : index
    %c0_4 = arith.constant 0 : index
    %3 = vector.load %arg3[%c0_3, %c0_4] : memref<16x1xf32, #tpu.memory_space<vmem>>, vector<16x1xf32>
    %4 = vector.broadcast %3 : vector<16x1xf32> to vector<16x128xf32>
    %5 = arith.addf %2, %4 : vector<16x128xf32>
    %c0_5 = arith.constant 0 : index
    %c0_6 = arith.constant 0 : index
    %6 = vector.load %arg4[%c0_5, %c0_6] : memref<16x128xf32, #tpu.memory_space<vmem>>, vector<16x128xf32>
    %7 = arith.addf %5, %6 : vector<16x128xf32>
    %cst_7 = arith.constant 0.000000e+00 : f32
    %8 = vector.broadcast %cst_7 : f32 to vector<16x128xf32>
    %9 = arith.maximumf %7, %8 : vector<16x128xf32>
    %c0_8 = arith.constant 0 : index
    %c0_9 = arith.constant 0 : index
    %10 = vector.load %arg5[%c0_8, %c0_9] : memref<16x128xf32, #tpu.memory_space<vmem>>, vector<16x128xf32>
    tpu.vector_store %arg5[%c0_8, %c0_9], %9 {strides = array<i32>} : memref<16x128xf32, #tpu.memory_space<vmem>>, vector<16x128xf32>,
    return
  }
  func.func @transform_0(%arg0: i32) -> (i32, i32) {
    %c0_i32 = arith.constant 0 : i32
    %c0_i32_0 = arith.constant 0 : i32
    %c0_i32_1 = arith.constant 0 : i32
    return %c0_i32, %c0_i32_0 : i32, i32
  }
  func.func @transform_1(%arg0: i32) -> (i32, i32) {
    %c0_i32 = arith.constant 0 : i32
    %c0_i32_0 = arith.constant 0 : i32
    return %c0_i32, %arg0 : i32, i32
  }
  func.func @transform_2(%arg0: i32) -> (i32, i32) {
    %c0_i32 = arith.constant 0 : i32
    %c0_i32_0 = arith.constant 0 : i32
    %c0_i32_1 = arith.constant 0 : i32
    return %c0_i32, %c0_i32_0 : i32, i32
  }
  func.func @transform_3(%arg0: i32) -> (i32, i32) {
    %c0_i32 = arith.constant 0 : i32
    %c0_i32_0 = arith.constant 0 : i32
    return %c0_i32, %arg0 : i32, i32
  }
  func.func @transform_4(%arg0: i32) -> (i32, i32) {
    %c0_i32 = arith.constant 0 : i32
    %c0_i32_0 = arith.constant 0 : i32
    return %c0_i32, %arg0 : i32, i32
  }
}

module attributes {stable_mosaic.version = 11 : i64} {
  func.func @_conv_gemm_kernel(%arg0: i32, %arg1: memref<32x144xf32, #tpu.memory_space<vmem>>, %arg2: memref<144x32xf32, #tpu.memory_space<vmem>>, %arg3: memref<32x1xf32, #tpu.memory_space<vmem>>, %arg4: memref<32x32xf32, #tpu.memory_space<vmem>>) attributes {dimension_semantics = [#tpu.dimension_semantics<parallel>], iteration_bounds = array<i64: 1>, scalar_prefetch = 0 : i64, scratch_operands = 0 : i64, tpu.core_type = #tpu.core_type<tc>, window_params = [{pipeline_mode = #tpu.pipeline_mode<synchronous>, transform_indices = @transform_0, window_bounds = array<i64: 32, 144>}, {transform_indices = @transform_1, window_bounds = array<i64: 144, 32>}, {pipeline_mode = #tpu.pipeline_mode<synchronous>, transform_indices = @transform_2, window_bounds = array<i64: 32, 1>}, {transform_indices = @transform_3, window_bounds = array<i64: 32, 32>}]} {
    %c0 = arith.constant 0 : index
    %c0_0 = arith.constant 0 : index
    %0 = vector.load %arg1[%c0, %c0_0] : memref<32x144xf32, #tpu.memory_space<vmem>>, vector<32x144xf32>
    %c0_1 = arith.constant 0 : index
    %c0_2 = arith.constant 0 : index
    %1 = vector.load %arg2[%c0_1, %c0_2] : memref<144x32xf32, #tpu.memory_space<vmem>>, vector<144x32xf32>
    %cst = arith.constant dense<0.000000e+00> : vector<32x32xf32>
    %2 = tpu.matmul %0, %1, %cst {dimension_numbers = #tpu.dot_dimension_numbers<[1], [0], [0], [1], [0, 0, 1, 1], [], []>} : vector<32x144xf32>, vector<144x32xf32>, vector<32x32xf32> -> vector<32x32xf32>
    %c0_3 = arith.constant 0 : index
    %c0_4 = arith.constant 0 : index
    %3 = vector.load %arg3[%c0_3, %c0_4] : memref<32x1xf32, #tpu.memory_space<vmem>>, vector<32x1xf32>
    %4 = vector.broadcast %3 : vector<32x1xf32> to vector<32x32xf32>
    %5 = arith.addf %2, %4 : vector<32x32xf32>
    %cst_5 = arith.constant 0.000000e+00 : f32
    %6 = vector.broadcast %cst_5 : f32 to vector<32x32xf32>
    %7 = arith.maximumf %5, %6 : vector<32x32xf32>
    %c0_6 = arith.constant 0 : index
    %c0_7 = arith.constant 0 : index
    %8 = vector.load %arg4[%c0_6, %c0_7] : memref<32x32xf32, #tpu.memory_space<vmem>>, vector<32x32xf32>
    tpu.vector_store %arg4[%c0_6, %c0_7], %7 {strides = array<i32>} : memref<32x32xf32, #tpu.memory_space<vmem>>, vector<32x32xf32>,
    return
  }
  func.func @transform_0(%arg0: i32) -> (i32, i32) {
    %c0_i32 = arith.constant 0 : i32
    %c0_i32_0 = arith.constant 0 : i32
    %c0_i32_1 = arith.constant 0 : i32
    return %c0_i32, %c0_i32_0 : i32, i32
  }
  func.func @transform_1(%arg0: i32) -> (i32, i32) {
    %c0_i32 = arith.constant 0 : i32
    %c0_i32_0 = arith.constant 0 : i32
    return %c0_i32, %arg0 : i32, i32
  }
  func.func @transform_2(%arg0: i32) -> (i32, i32) {
    %c0_i32 = arith.constant 0 : i32
    %c0_i32_0 = arith.constant 0 : i32
    %c0_i32_1 = arith.constant 0 : i32
    return %c0_i32, %c0_i32_0 : i32, i32
  }
  func.func @transform_3(%arg0: i32) -> (i32, i32) {
    %c0_i32 = arith.constant 0 : i32
    %c0_i32_0 = arith.constant 0 : i32
    return %c0_i32, %arg0 : i32, i32
  }
}

module attributes {stable_mosaic.version = 11 : i64} {
  func.func @_conv_dual_res_kernel(%arg0: i32, %arg1: memref<32x288xf32, #tpu.memory_space<vmem>>, %arg2: memref<288x32xf32, #tpu.memory_space<vmem>>, %arg3: memref<32x1xf32, #tpu.memory_space<vmem>>, %arg4: memref<32x16xf32, #tpu.memory_space<vmem>>, %arg5: memref<16x32xf32, #tpu.memory_space<vmem>>, %arg6: memref<32x1xf32, #tpu.memory_space<vmem>>, %arg7: memref<32x32xf32, #tpu.memory_space<vmem>>) attributes {dimension_semantics = [#tpu.dimension_semantics<parallel>], iteration_bounds = array<i64: 1>, scalar_prefetch = 0 : i64, scratch_operands = 0 : i64, tpu.core_type = #tpu.core_type<tc>, window_params = [{pipeline_mode = #tpu.pipeline_mode<synchronous>, transform_indices = @transform_0, window_bounds = array<i64: 32, 288>}, {transform_indices = @transform_1, window_bounds = array<i64: 288, 32>}, {pipeline_mode = #tpu.pipeline_mode<synchronous>, transform_indices = @transform_2, window_bounds = array<i64: 32, 1>}, {pipeline_mode = #tpu.pipeline_mode<synchronous>, transform_indices = @transform_3, window_bounds = array<i64: 32, 16>}, {transform_indices = @transform_4, window_bounds = array<i64: 16, 32>}, {pipeline_mode = #tpu.pipeline_mode<synchronous>, transform_indices = @transform_5, window_bounds = array<i64: 32, 1>}, {transform_indices = @transform_6, window_bounds = array<i64: 32, 32>}]} {
    %c0 = arith.constant 0 : index
    %c0_0 = arith.constant 0 : index
    %0 = vector.load %arg1[%c0, %c0_0] : memref<32x288xf32, #tpu.memory_space<vmem>>, vector<32x288xf32>
    %c0_1 = arith.constant 0 : index
    %c0_2 = arith.constant 0 : index
    %1 = vector.load %arg2[%c0_1, %c0_2] : memref<288x32xf32, #tpu.memory_space<vmem>>, vector<288x32xf32>
    %cst = arith.constant dense<0.000000e+00> : vector<32x32xf32>
    %2 = tpu.matmul %0, %1, %cst {dimension_numbers = #tpu.dot_dimension_numbers<[1], [0], [0], [1], [0, 0, 1, 1], [], []>} : vector<32x288xf32>, vector<288x32xf32>, vector<32x32xf32> -> vector<32x32xf32>
    %c0_3 = arith.constant 0 : index
    %c0_4 = arith.constant 0 : index
    %3 = vector.load %arg3[%c0_3, %c0_4] : memref<32x1xf32, #tpu.memory_space<vmem>>, vector<32x1xf32>
    %4 = vector.broadcast %3 : vector<32x1xf32> to vector<32x32xf32>
    %5 = arith.addf %2, %4 : vector<32x32xf32>
    %c0_5 = arith.constant 0 : index
    %c0_6 = arith.constant 0 : index
    %6 = vector.load %arg4[%c0_5, %c0_6] : memref<32x16xf32, #tpu.memory_space<vmem>>, vector<32x16xf32>
    %c0_7 = arith.constant 0 : index
    %c0_8 = arith.constant 0 : index
    %7 = vector.load %arg5[%c0_7, %c0_8] : memref<16x32xf32, #tpu.memory_space<vmem>>, vector<16x32xf32>
    %cst_9 = arith.constant dense<0.000000e+00> : vector<32x32xf32>
    %8 = tpu.matmul %6, %7, %cst_9 {dimension_numbers = #tpu.dot_dimension_numbers<[1], [0], [0], [1], [0, 0, 1, 1], [], []>} : vector<32x16xf32>, vector<16x32xf32>, vector<32x32xf32> -> vector<32x32xf32>
    %9 = arith.addf %5, %8 : vector<32x32xf32>
    %c0_10 = arith.constant 0 : index
    %c0_11 = arith.constant 0 : index
    %10 = vector.load %arg6[%c0_10, %c0_11] : memref<32x1xf32, #tpu.memory_space<vmem>>, vector<32x1xf32>
    %11 = vector.broadcast %10 : vector<32x1xf32> to vector<32x32xf32>
    %12 = arith.addf %9, %11 : vector<32x32xf32>
    %cst_12 = arith.constant 0.000000e+00 : f32
    %13 = vector.broadcast %cst_12 : f32 to vector<32x32xf32>
    %14 = arith.maximumf %12, %13 : vector<32x32xf32>
    %c0_13 = arith.constant 0 : index
    %c0_14 = arith.constant 0 : index
    %15 = vector.load %arg7[%c0_13, %c0_14] : memref<32x32xf32, #tpu.memory_space<vmem>>, vector<32x32xf32>
    tpu.vector_store %arg7[%c0_13, %c0_14], %14 {strides = array<i32>} : memref<32x32xf32, #tpu.memory_space<vmem>>, vector<32x32xf32>,
    return
  }
  func.func @transform_0(%arg0: i32) -> (i32, i32) {
    %c0_i32 = arith.constant 0 : i32
    %c0_i32_0 = arith.constant 0 : i32
    %c0_i32_1 = arith.constant 0 : i32
    return %c0_i32, %c0_i32_0 : i32, i32
  }
  func.func @transform_1(%arg0: i32) -> (i32, i32) {
    %c0_i32 = arith.constant 0 : i32
    %c0_i32_0 = arith.constant 0 : i32
    return %c0_i32, %arg0 : i32, i32
  }
  func.func @transform_2(%arg0: i32) -> (i32, i32) {
    %c0_i32 = arith.constant 0 : i32
    %c0_i32_0 = arith.constant 0 : i32
    %c0_i32_1 = arith.constant 0 : i32
    return %c0_i32, %c0_i32_0 : i32, i32
  }
  func.func @transform_3(%arg0: i32) -> (i32, i32) {
    %c0_i32 = arith.constant 0 : i32
    %c0_i32_0 = arith.constant 0 : i32
    %c0_i32_1 = arith.constant 0 : i32
    return %c0_i32, %c0_i32_0 : i32, i32
  }
  func.func @transform_4(%arg0: i32) -> (i32, i32) {
    %c0_i32 = arith.constant 0 : i32
    %c0_i32_0 = arith.constant 0 : i32
    return %c0_i32, %arg0 : i32, i32
  }
  func.func @transform_5(%arg0: i32) -> (i32, i32) {
    %c0_i32 = arith.constant 0 : i32
    %c0_i32_0 = arith.constant 0 : i32
    %c0_i32_1 = arith.constant 0 : i32
    return %c0_i32, %c0_i32_0 : i32, i32
  }
  func.func @transform_6(%arg0: i32) -> (i32, i32) {
    %c0_i32 = arith.constant 0 : i32
    %c0_i32_0 = arith.constant 0 : i32
    return %c0_i32, %arg0 : i32, i32
  }
}

module attributes {stable_mosaic.version = 11 : i64} {
  func.func @_transformer_kernel(%arg0: i32, %arg1: memref<32x8x4xf32, #tpu.memory_space<vmem>>, %arg2: memref<32x32xf32, #tpu.memory_space<vmem>>, %arg3: memref<1x32xf32, #tpu.memory_space<vmem>>, %arg4: memref<8x32xf32, #tpu.memory_space<vmem>>, %arg5: memref<1x32xf32, #tpu.memory_space<vmem>>, %arg6: memref<1x32xf32, #tpu.memory_space<vmem>>, %arg7: memref<2x32x96xf32, #tpu.memory_space<vmem>>, %arg8: memref<2x1x96xf32, #tpu.memory_space<vmem>>, %arg9: memref<2x4x8x32xf32, #tpu.memory_space<vmem>>, %arg10: memref<2x1x32xf32, #tpu.memory_space<vmem>>, %arg11: memref<2x1x32xf32, #tpu.memory_space<vmem>>, %arg12: memref<2x1x32xf32, #tpu.memory_space<vmem>>, %arg13: memref<2x32x64xf32, #tpu.memory_space<vmem>>, %arg14: memref<2x1x64xf32, #tpu.memory_space<vmem>>, %arg15: memref<2x64x32xf32, #tpu.memory_space<vmem>>, %arg16: memref<2x1x32xf32, #tpu.memory_space<vmem>>, %arg17: memref<2x1x32xf32, #tpu.memory_space<vmem>>, %arg18: memref<2x1x32xf32, #tpu.memory_space<vmem>>, %arg19: memref<32x6xf32, #tpu.memory_space<vmem>>, %arg20: memref<1x6xf32, #tpu.memory_space<vmem>>, %arg21: memref<8x6xf32, #tpu.memory_space<vmem>>, %arg22: memref<8x6xf32, #tpu.memory_space<vmem>>, %arg23: memref<4x8x8xf32, #tpu.memory_space<vmem>>) attributes {dimension_semantics = [#tpu.dimension_semantics<arbitrary>], iteration_bounds = array<i64: 1>, scalar_prefetch = 0 : i64, scratch_operands = 0 : i64, tpu.core_type = #tpu.core_type<tc>, window_params = [{pipeline_mode = #tpu.pipeline_mode<synchronous>, transform_indices = @transform_0, window_bounds = array<i64: 32, 8, 4>}, {pipeline_mode = #tpu.pipeline_mode<synchronous>, transform_indices = @transform_1, window_bounds = array<i64: 32, 32>}, {pipeline_mode = #tpu.pipeline_mode<synchronous>, transform_indices = @transform_2, window_bounds = array<i64: 1, 32>}, {pipeline_mode = #tpu.pipeline_mode<synchronous>, transform_indices = @transform_3, window_bounds = array<i64: 8, 32>}, {pipeline_mode = #tpu.pipeline_mode<synchronous>, transform_indices = @transform_4, window_bounds = array<i64: 1, 32>}, {pipeline_mode = #tpu.pipeline_mode<synchronous>, transform_indices = @transform_5, window_bounds = array<i64: 1, 32>}, {pipeline_mode = #tpu.pipeline_mode<synchronous>, transform_indices = @transform_6, window_bounds = array<i64: 2, 32, 96>}, {pipeline_mode = #tpu.pipeline_mode<synchronous>, transform_indices = @transform_7, window_bounds = array<i64: 2, 1, 96>}, {pipeline_mode = #tpu.pipeline_mode<synchronous>, transform_indices = @transform_8, window_bounds = array<i64: 2, 4, 8, 32>}, {pipeline_mode = #tpu.pipeline_mode<synchronous>, transform_indices = @transform_9, window_bounds = array<i64: 2, 1, 32>}, {pipeline_mode = #tpu.pipeline_mode<synchronous>, transform_indices = @transform_10, window_bounds = array<i64: 2, 1, 32>}, {pipeline_mode = #tpu.pipeline_mode<synchronous>, transform_indices = @transform_11, window_bounds = array<i64: 2, 1, 32>}, {pipeline_mode = #tpu.pipeline_mode<synchronous>, transform_indices = @transform_12, window_bounds = array<i64: 2, 32, 64>}, {pipeline_mode = #tpu.pipeline_mode<synchronous>, transform_indices = @transform_13, window_bounds = array<i64: 2, 1, 64>}, {pipeline_mode = #tpu.pipeline_mode<synchronous>, transform_indices = @transform_14, window_bounds = array<i64: 2, 64, 32>}, {pipeline_mode = #tpu.pipeline_mode<synchronous>, transform_indices = @transform_15, window_bounds = array<i64: 2, 1, 32>}, {pipeline_mode = #tpu.pipeline_mode<synchronous>, transform_indices = @transform_16, window_bounds = array<i64: 2, 1, 32>}, {pipeline_mode = #tpu.pipeline_mode<synchronous>, transform_indices = @transform_17, window_bounds = array<i64: 2, 1, 32>}, {pipeline_mode = #tpu.pipeline_mode<synchronous>, transform_indices = @transform_18, window_bounds = array<i64: 32, 6>}, {pipeline_mode = #tpu.pipeline_mode<synchronous>, transform_indices = @transform_19, window_bounds = array<i64: 1, 6>}, {pipeline_mode = #tpu.pipeline_mode<synchronous>, transform_indices = @transform_20, window_bounds = array<i64: 8, 6>}, {pipeline_mode = #tpu.pipeline_mode<synchronous>, transform_indices = @transform_21, window_bounds = array<i64: 8, 6>}, {pipeline_mode = #tpu.pipeline_mode<synchronous>, transform_indices = @transform_22, window_bounds = array<i64: 4, 8, 8>}]} {
    %c0 = arith.constant 0 : index
    %c0_0 = arith.constant 0 : index
    %c0_1 = arith.constant 0 : index
    %0 = vector.load %arg1[%c0, %c0_0, %c0_1] : memref<32x8x4xf32, #tpu.memory_space<vmem>>, vector<32x8x4xf32>
    %cst = arith.constant dense<0.000000e+00> : vector<32x8xf32>
    %1 = vector.multi_reduction <add>, %0, %cst [2] : vector<32x8x4xf32> to vector<32x8xf32>
    %cst_2 = arith.constant 4.000000e+00 : f32
    %2 = vector.broadcast %cst_2 : f32 to vector<32x8xf32>
    %3 = arith.divf %1, %2 : vector<32x8xf32>
    %c0_3 = arith.constant 0 : index
    %c0_4 = arith.constant 0 : index
    %4 = vector.load %arg2[%c0_3, %c0_4] : memref<32x32xf32, #tpu.memory_space<vmem>>, vector<32x32xf32>
    %cst_5 = arith.constant dense<0.000000e+00> : vector<8x32xf32>
    %5 = tpu.matmul %3, %4, %cst_5 {dimension_numbers = #tpu.dot_dimension_numbers<[0], [0], [1], [1], [0, 1, 1, 1], [], []>} : vector<32x8xf32>, vector<32x32xf32>, vector<8x32xf32> -> vector<8x32xf32>
    %c0_6 = arith.constant 0 : index
    %c0_7 = arith.constant 0 : index
    %6 = vector.load %arg3[%c0_6, %c0_7] : memref<1x32xf32, #tpu.memory_space<vmem>>, vector<1x32xf32>
    %7 = vector.broadcast %6 : vector<1x32xf32> to vector<8x32xf32>
    %8 = arith.addf %5, %7 : vector<8x32xf32>
    %c0_8 = arith.constant 0 : index
    %c0_9 = arith.constant 0 : index
    %9 = vector.load %arg4[%c0_8, %c0_9] : memref<8x32xf32, #tpu.memory_space<vmem>>, vector<8x32xf32>
    %10 = arith.addf %8, %9 : vector<8x32xf32>
    %c0_10 = arith.constant 0 : index
    %c0_11 = arith.constant 0 : index
    %11 = vector.load %arg5[%c0_10, %c0_11] : memref<1x32xf32, #tpu.memory_space<vmem>>, vector<1x32xf32>
    %c0_12 = arith.constant 0 : index
    %c0_13 = arith.constant 0 : index
    %12 = vector.load %arg6[%c0_12, %c0_13] : memref<1x32xf32, #tpu.memory_space<vmem>>, vector<1x32xf32>
    %cst_14 = arith.constant dense<0.000000e+00> : vector<8xf32>
    %13 = vector.multi_reduction <add>, %10, %cst_14 [1] : vector<8x32xf32> to vector<8xf32>
    %14 = vector.shape_cast %13 : vector<8xf32> to vector<8x1xf32>
    %cst_15 = arith.constant 3.200000e+01 : f32
    %15 = vector.broadcast %cst_15 : f32 to vector<8x1xf32>
    %16 = arith.divf %14, %15 : vector<8x1xf32>
    %17 = vector.broadcast %16 : vector<8x1xf32> to vector<8x32xf32>
    %18 = arith.subf %10, %17 : vector<8x32xf32>
    %19 = arith.mulf %18, %18 : vector<8x32xf32>
    %cst_16 = arith.constant dense<0.000000e+00> : vector<8xf32>
    %20 = vector.multi_reduction <add>, %19, %cst_16 [1] : vector<8x32xf32> to vector<8xf32>
    %21 = vector.shape_cast %20 : vector<8xf32> to vector<8x1xf32>
    %cst_17 = arith.constant 3.200000e+01 : f32
    %22 = vector.broadcast %cst_17 : f32 to vector<8x1xf32>
    %23 = arith.divf %21, %22 : vector<8x1xf32>
    %cst_18 = arith.constant 9.99999997E-7 : f32
    %24 = vector.broadcast %cst_18 : f32 to vector<8x1xf32>
    %25 = arith.addf %23, %24 : vector<8x1xf32>
    %26 = math.rsqrt %25 : vector<8x1xf32>
    %27 = vector.broadcast %26 : vector<8x1xf32> to vector<8x32xf32>
    %28 = arith.mulf %18, %27 : vector<8x32xf32>
    %29 = vector.broadcast %11 : vector<1x32xf32> to vector<8x32xf32>
    %30 = arith.mulf %28, %29 : vector<8x32xf32>
    %31 = vector.broadcast %12 : vector<1x32xf32> to vector<8x32xf32>
    %32 = arith.addf %30, %31 : vector<8x32xf32>
    %c0_19 = arith.constant 0 : index
    %c0_20 = arith.constant 0 : index
    %c0_21 = arith.constant 0 : index
    %33 = vector.load %arg7[%c0_19, %c0_20, %c0_21] : memref<2x32x96xf32, #tpu.memory_space<vmem>>, vector<1x32x96xf32>
    %34 = vector.shape_cast %33 : vector<1x32x96xf32> to vector<32x96xf32>
    %cst_22 = arith.constant dense<0.000000e+00> : vector<8x96xf32>
    %35 = tpu.matmul %32, %34, %cst_22 {dimension_numbers = #tpu.dot_dimension_numbers<[1], [0], [0], [1], [0, 0, 1, 1], [], []>} : vector<8x32xf32>, vector<32x96xf32>, vector<8x96xf32> -> vector<8x96xf32>
    %c0_23 = arith.constant 0 : index
    %c0_24 = arith.constant 0 : index
    %c0_25 = arith.constant 0 : index
    %36 = vector.load %arg8[%c0_23, %c0_24, %c0_25] : memref<2x1x96xf32, #tpu.memory_space<vmem>>, vector<1x1x96xf32>
    %37 = vector.shape_cast %36 : vector<1x1x96xf32> to vector<1x96xf32>
    %38 = vector.broadcast %37 : vector<1x96xf32> to vector<8x96xf32>
    %39 = arith.addf %35, %38 : vector<8x96xf32>
    %40 = vector.extract_strided_slice %39 {offsets = [0, 0], sizes = [8, 8], strides = [1, 1]} : vector<8x96xf32> to vector<8x8xf32>
    %41 = vector.extract_strided_slice %39 {offsets = [0, 8], sizes = [8, 8], strides = [1, 1]} : vector<8x96xf32> to vector<8x8xf32>
    %42 = vector.extract_strided_slice %39 {offsets = [0, 16], sizes = [8, 8], strides = [1, 1]} : vector<8x96xf32> to vector<8x8xf32>
    %43 = vector.extract_strided_slice %39 {offsets = [0, 24], sizes = [8, 8], strides = [1, 1]} : vector<8x96xf32> to vector<8x8xf32>
    %44 = vector.shape_cast %40 : vector<8x8xf32> to vector<1x8x8xf32>
    %45 = vector.shape_cast %41 : vector<8x8xf32> to vector<1x8x8xf32>
    %46 = vector.shape_cast %42 : vector<8x8xf32> to vector<1x8x8xf32>
    %47 = vector.shape_cast %43 : vector<8x8xf32> to vector<1x8x8xf32>
    %48 = tpu.concatenate %44, %45, %46, %47 in 0 : vector<1x8x8xf32>, vector<1x8x8xf32>, vector<1x8x8xf32>, vector<1x8x8xf32> -> vector<4x8x8xf32>
    %49 = vector.extract_strided_slice %39 {offsets = [0, 32], sizes = [8, 8], strides = [1, 1]} : vector<8x96xf32> to vector<8x8xf32>
    %50 = vector.extract_strided_slice %39 {offsets = [0, 40], sizes = [8, 8], strides = [1, 1]} : vector<8x96xf32> to vector<8x8xf32>
    %51 = vector.extract_strided_slice %39 {offsets = [0, 48], sizes = [8, 8], strides = [1, 1]} : vector<8x96xf32> to vector<8x8xf32>
    %52 = vector.extract_strided_slice %39 {offsets = [0, 56], sizes = [8, 8], strides = [1, 1]} : vector<8x96xf32> to vector<8x8xf32>
    %53 = vector.shape_cast %49 : vector<8x8xf32> to vector<1x8x8xf32>
    %54 = vector.shape_cast %50 : vector<8x8xf32> to vector<1x8x8xf32>
    %55 = vector.shape_cast %51 : vector<8x8xf32> to vector<1x8x8xf32>
    %56 = vector.shape_cast %52 : vector<8x8xf32> to vector<1x8x8xf32>
    %57 = tpu.concatenate %53, %54, %55, %56 in 0 : vector<1x8x8xf32>, vector<1x8x8xf32>, vector<1x8x8xf32>, vector<1x8x8xf32> -> vector<4x8x8xf32>
    %58 = vector.extract_strided_slice %39 {offsets = [0, 64], sizes = [8, 8], strides = [1, 1]} : vector<8x96xf32> to vector<8x8xf32>
    %59 = vector.extract_strided_slice %39 {offsets = [0, 72], sizes = [8, 8], strides = [1, 1]} : vector<8x96xf32> to vector<8x8xf32>
    %60 = vector.extract_strided_slice %39 {offsets = [0, 80], sizes = [8, 8], strides = [1, 1]} : vector<8x96xf32> to vector<8x8xf32>
    %61 = vector.extract_strided_slice %39 {offsets = [0, 88], sizes = [8, 8], strides = [1, 1]} : vector<8x96xf32> to vector<8x8xf32>
    %62 = vector.shape_cast %58 : vector<8x8xf32> to vector<1x8x8xf32>
    %63 = vector.shape_cast %59 : vector<8x8xf32> to vector<1x8x8xf32>
    %64 = vector.shape_cast %60 : vector<8x8xf32> to vector<1x8x8xf32>
    %65 = vector.shape_cast %61 : vector<8x8xf32> to vector<1x8x8xf32>
    %66 = tpu.concatenate %62, %63, %64, %65 in 0 : vector<1x8x8xf32>, vector<1x8x8xf32>, vector<1x8x8xf32>, vector<1x8x8xf32> -> vector<4x8x8xf32>
    %cst_26 = arith.constant dense<0.000000e+00> : vector<4x8x8xf32>
    %67 = tpu.matmul %48, %57, %cst_26 {dimension_numbers = #tpu.dot_dimension_numbers<[2], [2], [1], [1], [0, 0, 0, 1, 1, 1], [0], [0]>} : vector<4x8x8xf32>, vector<4x8x8xf32>, vector<4x8x8xf32> -> vector<4x8x8xf32>
    %cst_27 = arith.constant 0.353553385 : f32
    %68 = vector.broadcast %cst_27 : f32 to vector<4x8x8xf32>
    %69 = arith.mulf %67, %68 : vector<4x8x8xf32>
    %cst_28 = arith.constant dense<0xFF800000> : vector<4x8xf32>
    %70 = vector.multi_reduction <maximumf>, %69, %cst_28 [2] : vector<4x8x8xf32> to vector<4x8xf32>
    %71 = vector.shape_cast %70 : vector<4x8xf32> to vector<4x8x1xf32>
    %72 = vector.broadcast %71 : vector<4x8x1xf32> to vector<4x8x8xf32>
    %73 = arith.subf %69, %72 : vector<4x8x8xf32>
    %74 = math.exp %73 : vector<4x8x8xf32>
    %cst_29 = arith.constant dense<0.000000e+00> : vector<4x8xf32>
    %75 = vector.multi_reduction <add>, %74, %cst_29 [2] : vector<4x8x8xf32> to vector<4x8xf32>
    %76 = vector.shape_cast %75 : vector<4x8xf32> to vector<4x8x1xf32>
    %77 = vector.broadcast %76 : vector<4x8x1xf32> to vector<4x8x8xf32>
    %78 = arith.divf %74, %77 : vector<4x8x8xf32>
    %cst_30 = arith.constant dense<0.000000e+00> : vector<4x8x8xf32>
    %79 = tpu.matmul %78, %66, %cst_30 {dimension_numbers = #tpu.dot_dimension_numbers<[2], [1], [1], [2], [0, 0, 0, 1, 1, 2], [0], [0]>} : vector<4x8x8xf32>, vector<4x8x8xf32>, vector<4x8x8xf32> -> vector<4x8x8xf32>
    %c0_31 = arith.constant 0 : index
    %c0_32 = arith.constant 0 : index
    %c0_33 = arith.constant 0 : index
    %c0_34 = arith.constant 0 : index
    %80 = vector.load %arg9[%c0_31, %c0_32, %c0_33, %c0_34] : memref<2x4x8x32xf32, #tpu.memory_space<vmem>>, vector<1x4x8x32xf32>
    %81 = vector.shape_cast %80 : vector<1x4x8x32xf32> to vector<4x8x32xf32>
    %cst_35 = arith.constant dense<0.000000e+00> : vector<4x8x32xf32>
    %82 = tpu.matmul %79, %81, %cst_35 {dimension_numbers = #tpu.dot_dimension_numbers<[2], [1], [1], [2], [0, 0, 0, 1, 1, 2], [0], [0]>} : vector<4x8x8xf32>, vector<4x8x32xf32>, vector<4x8x32xf32> -> vector<4x8x32xf32>
    %cst_36 = arith.constant dense<0.000000e+00> : vector<8x32xf32>
    %83 = vector.multi_reduction <add>, %82, %cst_36 [0] : vector<4x8x32xf32> to vector<8x32xf32>
    %c0_37 = arith.constant 0 : index
    %c0_38 = arith.constant 0 : index
    %c0_39 = arith.constant 0 : index
    %84 = vector.load %arg10[%c0_37, %c0_38, %c0_39] : memref<2x1x32xf32, #tpu.memory_space<vmem>>, vector<1x1x32xf32>
    %85 = vector.shape_cast %84 : vector<1x1x32xf32> to vector<1x32xf32>
    %86 = vector.broadcast %85 : vector<1x32xf32> to vector<8x32xf32>
    %87 = arith.addf %83, %86 : vector<8x32xf32>
    %88 = arith.addf %87, %32 : vector<8x32xf32>
    %c0_40 = arith.constant 0 : index
    %c0_41 = arith.constant 0 : index
    %c0_42 = arith.constant 0 : index
    %89 = vector.load %arg11[%c0_40, %c0_41, %c0_42] : memref<2x1x32xf32, #tpu.memory_space<vmem>>, vector<1x1x32xf32>
    %90 = vector.shape_cast %89 : vector<1x1x32xf32> to vector<1x32xf32>
    %c0_43 = arith.constant 0 : index
    %c0_44 = arith.constant 0 : index
    %c0_45 = arith.constant 0 : index
    %91 = vector.load %arg12[%c0_43, %c0_44, %c0_45] : memref<2x1x32xf32, #tpu.memory_space<vmem>>, vector<1x1x32xf32>
    %92 = vector.shape_cast %91 : vector<1x1x32xf32> to vector<1x32xf32>
    %cst_46 = arith.constant dense<0.000000e+00> : vector<8xf32>
    %93 = vector.multi_reduction <add>, %88, %cst_46 [1] : vector<8x32xf32> to vector<8xf32>
    %94 = vector.shape_cast %93 : vector<8xf32> to vector<8x1xf32>
    %cst_47 = arith.constant 3.200000e+01 : f32
    %95 = vector.broadcast %cst_47 : f32 to vector<8x1xf32>
    %96 = arith.divf %94, %95 : vector<8x1xf32>
    %97 = vector.broadcast %96 : vector<8x1xf32> to vector<8x32xf32>
    %98 = arith.subf %88, %97 : vector<8x32xf32>
    %99 = arith.mulf %98, %98 : vector<8x32xf32>
    %cst_48 = arith.constant dense<0.000000e+00> : vector<8xf32>
    %100 = vector.multi_reduction <add>, %99, %cst_48 [1] : vector<8x32xf32> to vector<8xf32>
    %101 = vector.shape_cast %100 : vector<8xf32> to vector<8x1xf32>
    %cst_49 = arith.constant 3.200000e+01 : f32
    %102 = vector.broadcast %cst_49 : f32 to vector<8x1xf32>
    %103 = arith.divf %101, %102 : vector<8x1xf32>
    %cst_50 = arith.constant 9.99999997E-7 : f32
    %104 = vector.broadcast %cst_50 : f32 to vector<8x1xf32>
    %105 = arith.addf %103, %104 : vector<8x1xf32>
    %106 = math.rsqrt %105 : vector<8x1xf32>
    %107 = vector.broadcast %106 : vector<8x1xf32> to vector<8x32xf32>
    %108 = arith.mulf %98, %107 : vector<8x32xf32>
    %109 = vector.broadcast %90 : vector<1x32xf32> to vector<8x32xf32>
    %110 = arith.mulf %108, %109 : vector<8x32xf32>
    %111 = vector.broadcast %92 : vector<1x32xf32> to vector<8x32xf32>
    %112 = arith.addf %110, %111 : vector<8x32xf32>
    %c0_51 = arith.constant 0 : index
    %c0_52 = arith.constant 0 : index
    %c0_53 = arith.constant 0 : index
    %113 = vector.load %arg13[%c0_51, %c0_52, %c0_53] : memref<2x32x64xf32, #tpu.memory_space<vmem>>, vector<1x32x64xf32>
    %114 = vector.shape_cast %113 : vector<1x32x64xf32> to vector<32x64xf32>
    %cst_54 = arith.constant dense<0.000000e+00> : vector<8x64xf32>
    %115 = tpu.matmul %112, %114, %cst_54 {dimension_numbers = #tpu.dot_dimension_numbers<[1], [0], [0], [1], [0, 0, 1, 1], [], []>} : vector<8x32xf32>, vector<32x64xf32>, vector<8x64xf32> -> vector<8x64xf32>
    %c0_55 = arith.constant 0 : index
    %c0_56 = arith.constant 0 : index
    %c0_57 = arith.constant 0 : index
    %116 = vector.load %arg14[%c0_55, %c0_56, %c0_57] : memref<2x1x64xf32, #tpu.memory_space<vmem>>, vector<1x1x64xf32>
    %117 = vector.shape_cast %116 : vector<1x1x64xf32> to vector<1x64xf32>
    %118 = vector.broadcast %117 : vector<1x64xf32> to vector<8x64xf32>
    %119 = arith.addf %115, %118 : vector<8x64xf32>
    %cst_58 = arith.constant 0.000000e+00 : f32
    %120 = vector.broadcast %cst_58 : f32 to vector<8x64xf32>
    %121 = arith.maximumf %119, %120 : vector<8x64xf32>
    %c0_59 = arith.constant 0 : index
    %c0_60 = arith.constant 0 : index
    %c0_61 = arith.constant 0 : index
    %122 = vector.load %arg15[%c0_59, %c0_60, %c0_61] : memref<2x64x32xf32, #tpu.memory_space<vmem>>, vector<1x64x32xf32>
    %123 = vector.shape_cast %122 : vector<1x64x32xf32> to vector<64x32xf32>
    %cst_62 = arith.constant dense<0.000000e+00> : vector<8x32xf32>
    %124 = tpu.matmul %121, %123, %cst_62 {dimension_numbers = #tpu.dot_dimension_numbers<[1], [0], [0], [1], [0, 0, 1, 1], [], []>} : vector<8x64xf32>, vector<64x32xf32>, vector<8x32xf32> -> vector<8x32xf32>
    %c0_63 = arith.constant 0 : index
    %c0_64 = arith.constant 0 : index
    %c0_65 = arith.constant 0 : index
    %125 = vector.load %arg16[%c0_63, %c0_64, %c0_65] : memref<2x1x32xf32, #tpu.memory_space<vmem>>, vector<1x1x32xf32>
    %126 = vector.shape_cast %125 : vector<1x1x32xf32> to vector<1x32xf32>
    %127 = vector.broadcast %126 : vector<1x32xf32> to vector<8x32xf32>
    %128 = arith.addf %124, %127 : vector<8x32xf32>
    %129 = arith.addf %128, %112 : vector<8x32xf32>
    %c0_66 = arith.constant 0 : index
    %c0_67 = arith.constant 0 : index
    %c0_68 = arith.constant 0 : index
    %130 = vector.load %arg17[%c0_66, %c0_67, %c0_68] : memref<2x1x32xf32, #tpu.memory_space<vmem>>, vector<1x1x32xf32>
    %131 = vector.shape_cast %130 : vector<1x1x32xf32> to vector<1x32xf32>
    %c0_69 = arith.constant 0 : index
    %c0_70 = arith.constant 0 : index
    %c0_71 = arith.constant 0 : index
    %132 = vector.load %arg18[%c0_69, %c0_70, %c0_71] : memref<2x1x32xf32, #tpu.memory_space<vmem>>, vector<1x1x32xf32>
    %133 = vector.shape_cast %132 : vector<1x1x32xf32> to vector<1x32xf32>
    %cst_72 = arith.constant dense<0.000000e+00> : vector<8xf32>
    %134 = vector.multi_reduction <add>, %129, %cst_72 [1] : vector<8x32xf32> to vector<8xf32>
    %135 = vector.shape_cast %134 : vector<8xf32> to vector<8x1xf32>
    %cst_73 = arith.constant 3.200000e+01 : f32
    %136 = vector.broadcast %cst_73 : f32 to vector<8x1xf32>
    %137 = arith.divf %135, %136 : vector<8x1xf32>
    %138 = vector.broadcast %137 : vector<8x1xf32> to vector<8x32xf32>
    %139 = arith.subf %129, %138 : vector<8x32xf32>
    %140 = arith.mulf %139, %139 : vector<8x32xf32>
    %cst_74 = arith.constant dense<0.000000e+00> : vector<8xf32>
    %141 = vector.multi_reduction <add>, %140, %cst_74 [1] : vector<8x32xf32> to vector<8xf32>
    %142 = vector.shape_cast %141 : vector<8xf32> to vector<8x1xf32>
    %cst_75 = arith.constant 3.200000e+01 : f32
    %143 = vector.broadcast %cst_75 : f32 to vector<8x1xf32>
    %144 = arith.divf %142, %143 : vector<8x1xf32>
    %cst_76 = arith.constant 9.99999997E-7 : f32
    %145 = vector.broadcast %cst_76 : f32 to vector<8x1xf32>
    %146 = arith.addf %144, %145 : vector<8x1xf32>
    %147 = math.rsqrt %146 : vector<8x1xf32>
    %148 = vector.broadcast %147 : vector<8x1xf32> to vector<8x32xf32>
    %149 = arith.mulf %139, %148 : vector<8x32xf32>
    %150 = vector.broadcast %131 : vector<1x32xf32> to vector<8x32xf32>
    %151 = arith.mulf %149, %150 : vector<8x32xf32>
    %152 = vector.broadcast %133 : vector<1x32xf32> to vector<8x32xf32>
    %153 = arith.addf %151, %152 : vector<8x32xf32>
    %c1 = arith.constant 1 : index
    %c0_77 = arith.constant 0 : index
    %c0_78 = arith.constant 0 : index
    %154 = vector.load %arg7[%c1, %c0_77, %c0_78] : memref<2x32x96xf32, #tpu.memory_space<vmem>>, vector<1x32x96xf32>
    %155 = vector.shape_cast %154 : vector<1x32x96xf32> to vector<32x96xf32>
    %cst_79 = arith.constant dense<0.000000e+00> : vector<8x96xf32>
    %156 = tpu.matmul %153, %155, %cst_79 {dimension_numbers = #tpu.dot_dimension_numbers<[1], [0], [0], [1], [0, 0, 1, 1], [], []>} : vector<8x32xf32>, vector<32x96xf32>, vector<8x96xf32> -> vector<8x96xf32>
    %c1_80 = arith.constant 1 : index
    %c0_81 = arith.constant 0 : index
    %c0_82 = arith.constant 0 : index
    %157 = vector.load %arg8[%c1_80, %c0_81, %c0_82] : memref<2x1x96xf32, #tpu.memory_space<vmem>>, vector<1x1x96xf32>
    %158 = vector.shape_cast %157 : vector<1x1x96xf32> to vector<1x96xf32>
    %159 = vector.broadcast %158 : vector<1x96xf32> to vector<8x96xf32>
    %160 = arith.addf %156, %159 : vector<8x96xf32>
    %161 = vector.extract_strided_slice %160 {offsets = [0, 0], sizes = [8, 8], strides = [1, 1]} : vector<8x96xf32> to vector<8x8xf32>
    %162 = vector.extract_strided_slice %160 {offsets = [0, 8], sizes = [8, 8], strides = [1, 1]} : vector<8x96xf32> to vector<8x8xf32>
    %163 = vector.extract_strided_slice %160 {offsets = [0, 16], sizes = [8, 8], strides = [1, 1]} : vector<8x96xf32> to vector<8x8xf32>
    %164 = vector.extract_strided_slice %160 {offsets = [0, 24], sizes = [8, 8], strides = [1, 1]} : vector<8x96xf32> to vector<8x8xf32>
    %165 = vector.shape_cast %161 : vector<8x8xf32> to vector<1x8x8xf32>
    %166 = vector.shape_cast %162 : vector<8x8xf32> to vector<1x8x8xf32>
    %167 = vector.shape_cast %163 : vector<8x8xf32> to vector<1x8x8xf32>
    %168 = vector.shape_cast %164 : vector<8x8xf32> to vector<1x8x8xf32>
    %169 = tpu.concatenate %165, %166, %167, %168 in 0 : vector<1x8x8xf32>, vector<1x8x8xf32>, vector<1x8x8xf32>, vector<1x8x8xf32> -> vector<4x8x8xf32>
    %170 = vector.extract_strided_slice %160 {offsets = [0, 32], sizes = [8, 8], strides = [1, 1]} : vector<8x96xf32> to vector<8x8xf32>
    %171 = vector.extract_strided_slice %160 {offsets = [0, 40], sizes = [8, 8], strides = [1, 1]} : vector<8x96xf32> to vector<8x8xf32>
    %172 = vector.extract_strided_slice %160 {offsets = [0, 48], sizes = [8, 8], strides = [1, 1]} : vector<8x96xf32> to vector<8x8xf32>
    %173 = vector.extract_strided_slice %160 {offsets = [0, 56], sizes = [8, 8], strides = [1, 1]} : vector<8x96xf32> to vector<8x8xf32>
    %174 = vector.shape_cast %170 : vector<8x8xf32> to vector<1x8x8xf32>
    %175 = vector.shape_cast %171 : vector<8x8xf32> to vector<1x8x8xf32>
    %176 = vector.shape_cast %172 : vector<8x8xf32> to vector<1x8x8xf32>
    %177 = vector.shape_cast %173 : vector<8x8xf32> to vector<1x8x8xf32>
    %178 = tpu.concatenate %174, %175, %176, %177 in 0 : vector<1x8x8xf32>, vector<1x8x8xf32>, vector<1x8x8xf32>, vector<1x8x8xf32> -> vector<4x8x8xf32>
    %179 = vector.extract_strided_slice %160 {offsets = [0, 64], sizes = [8, 8], strides = [1, 1]} : vector<8x96xf32> to vector<8x8xf32>
    %180 = vector.extract_strided_slice %160 {offsets = [0, 72], sizes = [8, 8], strides = [1, 1]} : vector<8x96xf32> to vector<8x8xf32>
    %181 = vector.extract_strided_slice %160 {offsets = [0, 80], sizes = [8, 8], strides = [1, 1]} : vector<8x96xf32> to vector<8x8xf32>
    %182 = vector.extract_strided_slice %160 {offsets = [0, 88], sizes = [8, 8], strides = [1, 1]} : vector<8x96xf32> to vector<8x8xf32>
    %183 = vector.shape_cast %179 : vector<8x8xf32> to vector<1x8x8xf32>
    %184 = vector.shape_cast %180 : vector<8x8xf32> to vector<1x8x8xf32>
    %185 = vector.shape_cast %181 : vector<8x8xf32> to vector<1x8x8xf32>
    %186 = vector.shape_cast %182 : vector<8x8xf32> to vector<1x8x8xf32>
    %187 = tpu.concatenate %183, %184, %185, %186 in 0 : vector<1x8x8xf32>, vector<1x8x8xf32>, vector<1x8x8xf32>, vector<1x8x8xf32> -> vector<4x8x8xf32>
    %cst_83 = arith.constant dense<0.000000e+00> : vector<4x8x8xf32>
    %188 = tpu.matmul %169, %178, %cst_83 {dimension_numbers = #tpu.dot_dimension_numbers<[2], [2], [1], [1], [0, 0, 0, 1, 1, 1], [0], [0]>} : vector<4x8x8xf32>, vector<4x8x8xf32>, vector<4x8x8xf32> -> vector<4x8x8xf32>
    %cst_84 = arith.constant 0.353553385 : f32
    %189 = vector.broadcast %cst_84 : f32 to vector<4x8x8xf32>
    %190 = arith.mulf %188, %189 : vector<4x8x8xf32>
    %cst_85 = arith.constant dense<0xFF800000> : vector<4x8xf32>
    %191 = vector.multi_reduction <maximumf>, %190, %cst_85 [2] : vector<4x8x8xf32> to vector<4x8xf32>
    %192 = vector.shape_cast %191 : vector<4x8xf32> to vector<4x8x1xf32>
    %193 = vector.broadcast %192 : vector<4x8x1xf32> to vector<4x8x8xf32>
    %194 = arith.subf %190, %193 : vector<4x8x8xf32>
    %195 = math.exp %194 : vector<4x8x8xf32>
    %cst_86 = arith.constant dense<0.000000e+00> : vector<4x8xf32>
    %196 = vector.multi_reduction <add>, %195, %cst_86 [2] : vector<4x8x8xf32> to vector<4x8xf32>
    %197 = vector.shape_cast %196 : vector<4x8xf32> to vector<4x8x1xf32>
    %198 = vector.broadcast %197 : vector<4x8x1xf32> to vector<4x8x8xf32>
    %199 = arith.divf %195, %198 : vector<4x8x8xf32>
    %c0_87 = arith.constant 0 : index
    %c0_88 = arith.constant 0 : index
    %c0_89 = arith.constant 0 : index
    %200 = vector.load %arg23[%c0_87, %c0_88, %c0_89] : memref<4x8x8xf32, #tpu.memory_space<vmem>>, vector<4x8x8xf32>
    tpu.vector_store %arg23[%c0_87, %c0_88, %c0_89], %199 {strides = array<i32>} : memref<4x8x8xf32, #tpu.memory_space<vmem>>, vector<4x8x8xf32>,
    %cst_90 = arith.constant dense<0.000000e+00> : vector<4x8x8xf32>
    %201 = tpu.matmul %199, %187, %cst_90 {dimension_numbers = #tpu.dot_dimension_numbers<[2], [1], [1], [2], [0, 0, 0, 1, 1, 2], [0], [0]>} : vector<4x8x8xf32>, vector<4x8x8xf32>, vector<4x8x8xf32> -> vector<4x8x8xf32>
    %c1_91 = arith.constant 1 : index
    %c0_92 = arith.constant 0 : index
    %c0_93 = arith.constant 0 : index
    %c0_94 = arith.constant 0 : index
    %202 = vector.load %arg9[%c1_91, %c0_92, %c0_93, %c0_94] : memref<2x4x8x32xf32, #tpu.memory_space<vmem>>, vector<1x4x8x32xf32>
    %203 = vector.shape_cast %202 : vector<1x4x8x32xf32> to vector<4x8x32xf32>
    %cst_95 = arith.constant dense<0.000000e+00> : vector<4x8x32xf32>
    %204 = tpu.matmul %201, %203, %cst_95 {dimension_numbers = #tpu.dot_dimension_numbers<[2], [1], [1], [2], [0, 0, 0, 1, 1, 2], [0], [0]>} : vector<4x8x8xf32>, vector<4x8x32xf32>, vector<4x8x32xf32> -> vector<4x8x32xf32>
    %cst_96 = arith.constant dense<0.000000e+00> : vector<8x32xf32>
    %205 = vector.multi_reduction <add>, %204, %cst_96 [0] : vector<4x8x32xf32> to vector<8x32xf32>
    %c1_97 = arith.constant 1 : index
    %c0_98 = arith.constant 0 : index
    %c0_99 = arith.constant 0 : index
    %206 = vector.load %arg10[%c1_97, %c0_98, %c0_99] : memref<2x1x32xf32, #tpu.memory_space<vmem>>, vector<1x1x32xf32>
    %207 = vector.shape_cast %206 : vector<1x1x32xf32> to vector<1x32xf32>
    %208 = vector.broadcast %207 : vector<1x32xf32> to vector<8x32xf32>
    %209 = arith.addf %205, %208 : vector<8x32xf32>
    %210 = arith.addf %209, %153 : vector<8x32xf32>
    %c1_100 = arith.constant 1 : index
    %c0_101 = arith.constant 0 : index
    %c0_102 = arith.constant 0 : index
    %211 = vector.load %arg11[%c1_100, %c0_101, %c0_102] : memref<2x1x32xf32, #tpu.memory_space<vmem>>, vector<1x1x32xf32>
    %212 = vector.shape_cast %211 : vector<1x1x32xf32> to vector<1x32xf32>
    %c1_103 = arith.constant 1 : index
    %c0_104 = arith.constant 0 : index
    %c0_105 = arith.constant 0 : index
    %213 = vector.load %arg12[%c1_103, %c0_104, %c0_105] : memref<2x1x32xf32, #tpu.memory_space<vmem>>, vector<1x1x32xf32>
    %214 = vector.shape_cast %213 : vector<1x1x32xf32> to vector<1x32xf32>
    %cst_106 = arith.constant dense<0.000000e+00> : vector<8xf32>
    %215 = vector.multi_reduction <add>, %210, %cst_106 [1] : vector<8x32xf32> to vector<8xf32>
    %216 = vector.shape_cast %215 : vector<8xf32> to vector<8x1xf32>
    %cst_107 = arith.constant 3.200000e+01 : f32
    %217 = vector.broadcast %cst_107 : f32 to vector<8x1xf32>
    %218 = arith.divf %216, %217 : vector<8x1xf32>
    %219 = vector.broadcast %218 : vector<8x1xf32> to vector<8x32xf32>
    %220 = arith.subf %210, %219 : vector<8x32xf32>
    %221 = arith.mulf %220, %220 : vector<8x32xf32>
    %cst_108 = arith.constant dense<0.000000e+00> : vector<8xf32>
    %222 = vector.multi_reduction <add>, %221, %cst_108 [1] : vector<8x32xf32> to vector<8xf32>
    %223 = vector.shape_cast %222 : vector<8xf32> to vector<8x1xf32>
    %cst_109 = arith.constant 3.200000e+01 : f32
    %224 = vector.broadcast %cst_109 : f32 to vector<8x1xf32>
    %225 = arith.divf %223, %224 : vector<8x1xf32>
    %cst_110 = arith.constant 9.99999997E-7 : f32
    %226 = vector.broadcast %cst_110 : f32 to vector<8x1xf32>
    %227 = arith.addf %225, %226 : vector<8x1xf32>
    %228 = math.rsqrt %227 : vector<8x1xf32>
    %229 = vector.broadcast %228 : vector<8x1xf32> to vector<8x32xf32>
    %230 = arith.mulf %220, %229 : vector<8x32xf32>
    %231 = vector.broadcast %212 : vector<1x32xf32> to vector<8x32xf32>
    %232 = arith.mulf %230, %231 : vector<8x32xf32>
    %233 = vector.broadcast %214 : vector<1x32xf32> to vector<8x32xf32>
    %234 = arith.addf %232, %233 : vector<8x32xf32>
    %c1_111 = arith.constant 1 : index
    %c0_112 = arith.constant 0 : index
    %c0_113 = arith.constant 0 : index
    %235 = vector.load %arg13[%c1_111, %c0_112, %c0_113] : memref<2x32x64xf32, #tpu.memory_space<vmem>>, vector<1x32x64xf32>
    %236 = vector.shape_cast %235 : vector<1x32x64xf32> to vector<32x64xf32>
    %cst_114 = arith.constant dense<0.000000e+00> : vector<8x64xf32>
    %237 = tpu.matmul %234, %236, %cst_114 {dimension_numbers = #tpu.dot_dimension_numbers<[1], [0], [0], [1], [0, 0, 1, 1], [], []>} : vector<8x32xf32>, vector<32x64xf32>, vector<8x64xf32> -> vector<8x64xf32>
    %c1_115 = arith.constant 1 : index
    %c0_116 = arith.constant 0 : index
    %c0_117 = arith.constant 0 : index
    %238 = vector.load %arg14[%c1_115, %c0_116, %c0_117] : memref<2x1x64xf32, #tpu.memory_space<vmem>>, vector<1x1x64xf32>
    %239 = vector.shape_cast %238 : vector<1x1x64xf32> to vector<1x64xf32>
    %240 = vector.broadcast %239 : vector<1x64xf32> to vector<8x64xf32>
    %241 = arith.addf %237, %240 : vector<8x64xf32>
    %cst_118 = arith.constant 0.000000e+00 : f32
    %242 = vector.broadcast %cst_118 : f32 to vector<8x64xf32>
    %243 = arith.maximumf %241, %242 : vector<8x64xf32>
    %c1_119 = arith.constant 1 : index
    %c0_120 = arith.constant 0 : index
    %c0_121 = arith.constant 0 : index
    %244 = vector.load %arg15[%c1_119, %c0_120, %c0_121] : memref<2x64x32xf32, #tpu.memory_space<vmem>>, vector<1x64x32xf32>
    %245 = vector.shape_cast %244 : vector<1x64x32xf32> to vector<64x32xf32>
    %cst_122 = arith.constant dense<0.000000e+00> : vector<8x32xf32>
    %246 = tpu.matmul %243, %245, %cst_122 {dimension_numbers = #tpu.dot_dimension_numbers<[1], [0], [0], [1], [0, 0, 1, 1], [], []>} : vector<8x64xf32>, vector<64x32xf32>, vector<8x32xf32> -> vector<8x32xf32>
    %c1_123 = arith.constant 1 : index
    %c0_124 = arith.constant 0 : index
    %c0_125 = arith.constant 0 : index
    %247 = vector.load %arg16[%c1_123, %c0_124, %c0_125] : memref<2x1x32xf32, #tpu.memory_space<vmem>>, vector<1x1x32xf32>
    %248 = vector.shape_cast %247 : vector<1x1x32xf32> to vector<1x32xf32>
    %249 = vector.broadcast %248 : vector<1x32xf32> to vector<8x32xf32>
    %250 = arith.addf %246, %249 : vector<8x32xf32>
    %251 = arith.addf %250, %234 : vector<8x32xf32>
    %c1_126 = arith.constant 1 : index
    %c0_127 = arith.constant 0 : index
    %c0_128 = arith.constant 0 : index
    %252 = vector.load %arg17[%c1_126, %c0_127, %c0_128] : memref<2x1x32xf32, #tpu.memory_space<vmem>>, vector<1x1x32xf32>
    %253 = vector.shape_cast %252 : vector<1x1x32xf32> to vector<1x32xf32>
    %c1_129 = arith.constant 1 : index
    %c0_130 = arith.constant 0 : index
    %c0_131 = arith.constant 0 : index
    %254 = vector.load %arg18[%c1_129, %c0_130, %c0_131] : memref<2x1x32xf32, #tpu.memory_space<vmem>>, vector<1x1x32xf32>
    %255 = vector.shape_cast %254 : vector<1x1x32xf32> to vector<1x32xf32>
    %cst_132 = arith.constant dense<0.000000e+00> : vector<8xf32>
    %256 = vector.multi_reduction <add>, %251, %cst_132 [1] : vector<8x32xf32> to vector<8xf32>
    %257 = vector.shape_cast %256 : vector<8xf32> to vector<8x1xf32>
    %cst_133 = arith.constant 3.200000e+01 : f32
    %258 = vector.broadcast %cst_133 : f32 to vector<8x1xf32>
    %259 = arith.divf %257, %258 : vector<8x1xf32>
    %260 = vector.broadcast %259 : vector<8x1xf32> to vector<8x32xf32>
    %261 = arith.subf %251, %260 : vector<8x32xf32>
    %262 = arith.mulf %261, %261 : vector<8x32xf32>
    %cst_134 = arith.constant dense<0.000000e+00> : vector<8xf32>
    %263 = vector.multi_reduction <add>, %262, %cst_134 [1] : vector<8x32xf32> to vector<8xf32>
    %264 = vector.shape_cast %263 : vector<8xf32> to vector<8x1xf32>
    %cst_135 = arith.constant 3.200000e+01 : f32
    %265 = vector.broadcast %cst_135 : f32 to vector<8x1xf32>
    %266 = arith.divf %264, %265 : vector<8x1xf32>
    %cst_136 = arith.constant 9.99999997E-7 : f32
    %267 = vector.broadcast %cst_136 : f32 to vector<8x1xf32>
    %268 = arith.addf %266, %267 : vector<8x1xf32>
    %269 = math.rsqrt %268 : vector<8x1xf32>
    %270 = vector.broadcast %269 : vector<8x1xf32> to vector<8x32xf32>
    %271 = arith.mulf %261, %270 : vector<8x32xf32>
    %272 = vector.broadcast %253 : vector<1x32xf32> to vector<8x32xf32>
    %273 = arith.mulf %271, %272 : vector<8x32xf32>
    %274 = vector.broadcast %255 : vector<1x32xf32> to vector<8x32xf32>
    %275 = arith.addf %273, %274 : vector<8x32xf32>
    %c0_137 = arith.constant 0 : index
    %c0_138 = arith.constant 0 : index
    %276 = vector.load %arg19[%c0_137, %c0_138] : memref<32x6xf32, #tpu.memory_space<vmem>>, vector<32x6xf32>
    %cst_139 = arith.constant dense<0.000000e+00> : vector<8x6xf32>
    %277 = tpu.matmul %275, %276, %cst_139 {dimension_numbers = #tpu.dot_dimension_numbers<[1], [0], [0], [1], [0, 0, 1, 1], [], []>} : vector<8x32xf32>, vector<32x6xf32>, vector<8x6xf32> -> vector<8x6xf32>
    %c0_140 = arith.constant 0 : index
    %c0_141 = arith.constant 0 : index
    %278 = vector.load %arg20[%c0_140, %c0_141] : memref<1x6xf32, #tpu.memory_space<vmem>>, vector<1x6xf32>
    %279 = vector.broadcast %278 : vector<1x6xf32> to vector<8x6xf32>
    %280 = arith.addf %277, %279 : vector<8x6xf32>
    %c0_142 = arith.constant 0 : index
    %c0_143 = arith.constant 0 : index
    %281 = vector.load %arg21[%c0_142, %c0_143] : memref<8x6xf32, #tpu.memory_space<vmem>>, vector<8x6xf32>
    %cst_144 = arith.constant 1.000000e+00 : f32
    %282 = vector.broadcast %cst_144 : f32 to vector<8x6xf32>
    %283 = arith.mulf %282, %280 : vector<8x6xf32>
    %284 = arith.addf %281, %283 : vector<8x6xf32>
    %c0_145 = arith.constant 0 : index
    %c0_146 = arith.constant 0 : index
    %285 = vector.load %arg22[%c0_145, %c0_146] : memref<8x6xf32, #tpu.memory_space<vmem>>, vector<8x6xf32>
    tpu.vector_store %arg22[%c0_145, %c0_146], %284 {strides = array<i32>} : memref<8x6xf32, #tpu.memory_space<vmem>>, vector<8x6xf32>,
    return
  }
  func.func @transform_0(%arg0: i32) -> (i32, i32, i32) {
    %c0_i32 = arith.constant 0 : i32
    %c0_i32_0 = arith.constant 0 : i32
    %c0_i32_1 = arith.constant 0 : i32
    %c0_i32_2 = arith.constant 0 : i32
    return %c0_i32, %c0_i32_0, %c0_i32_1 : i32, i32, i32
  }
  func.func @transform_1(%arg0: i32) -> (i32, i32) {
    %c0_i32 = arith.constant 0 : i32
    %c0_i32_0 = arith.constant 0 : i32
    %c0_i32_1 = arith.constant 0 : i32
    return %c0_i32, %c0_i32_0 : i32, i32
  }
  func.func @transform_2(%arg0: i32) -> (i32, i32) {
    %c0_i32 = arith.constant 0 : i32
    %c0_i32_0 = arith.constant 0 : i32
    %c0_i32_1 = arith.constant 0 : i32
    return %c0_i32, %c0_i32_0 : i32, i32
  }
  func.func @transform_3(%arg0: i32) -> (i32, i32) {
    %c0_i32 = arith.constant 0 : i32
    %c0_i32_0 = arith.constant 0 : i32
    %c0_i32_1 = arith.constant 0 : i32
    return %c0_i32, %c0_i32_0 : i32, i32
  }
  func.func @transform_4(%arg0: i32) -> (i32, i32) {
    %c0_i32 = arith.constant 0 : i32
    %c0_i32_0 = arith.constant 0 : i32
    %c0_i32_1 = arith.constant 0 : i32
    return %c0_i32, %c0_i32_0 : i32, i32
  }
  func.func @transform_5(%arg0: i32) -> (i32, i32) {
    %c0_i32 = arith.constant 0 : i32
    %c0_i32_0 = arith.constant 0 : i32
    %c0_i32_1 = arith.constant 0 : i32
    return %c0_i32, %c0_i32_0 : i32, i32
  }
  func.func @transform_6(%arg0: i32) -> (i32, i32, i32) {
    %c0_i32 = arith.constant 0 : i32
    %c0_i32_0 = arith.constant 0 : i32
    %c0_i32_1 = arith.constant 0 : i32
    %c0_i32_2 = arith.constant 0 : i32
    return %c0_i32, %c0_i32_0, %c0_i32_1 : i32, i32, i32
  }
  func.func @transform_7(%arg0: i32) -> (i32, i32, i32) {
    %c0_i32 = arith.constant 0 : i32
    %c0_i32_0 = arith.constant 0 : i32
    %c0_i32_1 = arith.constant 0 : i32
    %c0_i32_2 = arith.constant 0 : i32
    return %c0_i32, %c0_i32_0, %c0_i32_1 : i32, i32, i32
  }
  func.func @transform_8(%arg0: i32) -> (i32, i32, i32, i32) {
    %c0_i32 = arith.constant 0 : i32
    %c0_i32_0 = arith.constant 0 : i32
    %c0_i32_1 = arith.constant 0 : i32
    %c0_i32_2 = arith.constant 0 : i32
    %c0_i32_3 = arith.constant 0 : i32
    return %c0_i32, %c0_i32_0, %c0_i32_1, %c0_i32_2 : i32, i32, i32, i32
  }
  func.func @transform_9(%arg0: i32) -> (i32, i32, i32) {
    %c0_i32 = arith.constant 0 : i32
    %c0_i32_0 = arith.constant 0 : i32
    %c0_i32_1 = arith.constant 0 : i32
    %c0_i32_2 = arith.constant 0 : i32
    return %c0_i32, %c0_i32_0, %c0_i32_1 : i32, i32, i32
  }
  func.func @transform_10(%arg0: i32) -> (i32, i32, i32) {
    %c0_i32 = arith.constant 0 : i32
    %c0_i32_0 = arith.constant 0 : i32
    %c0_i32_1 = arith.constant 0 : i32
    %c0_i32_2 = arith.constant 0 : i32
    return %c0_i32, %c0_i32_0, %c0_i32_1 : i32, i32, i32
  }
  func.func @transform_11(%arg0: i32) -> (i32, i32, i32) {
    %c0_i32 = arith.constant 0 : i32
    %c0_i32_0 = arith.constant 0 : i32
    %c0_i32_1 = arith.constant 0 : i32
    %c0_i32_2 = arith.constant 0 : i32
    return %c0_i32, %c0_i32_0, %c0_i32_1 : i32, i32, i32
  }
  func.func @transform_12(%arg0: i32) -> (i32, i32, i32) {
    %c0_i32 = arith.constant 0 : i32
    %c0_i32_0 = arith.constant 0 : i32
    %c0_i32_1 = arith.constant 0 : i32
    %c0_i32_2 = arith.constant 0 : i32
    return %c0_i32, %c0_i32_0, %c0_i32_1 : i32, i32, i32
  }
  func.func @transform_13(%arg0: i32) -> (i32, i32, i32) {
    %c0_i32 = arith.constant 0 : i32
    %c0_i32_0 = arith.constant 0 : i32
    %c0_i32_1 = arith.constant 0 : i32
    %c0_i32_2 = arith.constant 0 : i32
    return %c0_i32, %c0_i32_0, %c0_i32_1 : i32, i32, i32
  }
  func.func @transform_14(%arg0: i32) -> (i32, i32, i32) {
    %c0_i32 = arith.constant 0 : i32
    %c0_i32_0 = arith.constant 0 : i32
    %c0_i32_1 = arith.constant 0 : i32
    %c0_i32_2 = arith.constant 0 : i32
    return %c0_i32, %c0_i32_0, %c0_i32_1 : i32, i32, i32
  }
  func.func @transform_15(%arg0: i32) -> (i32, i32, i32) {
    %c0_i32 = arith.constant 0 : i32
    %c0_i32_0 = arith.constant 0 : i32
    %c0_i32_1 = arith.constant 0 : i32
    %c0_i32_2 = arith.constant 0 : i32
    return %c0_i32, %c0_i32_0, %c0_i32_1 : i32, i32, i32
  }
  func.func @transform_16(%arg0: i32) -> (i32, i32, i32) {
    %c0_i32 = arith.constant 0 : i32
    %c0_i32_0 = arith.constant 0 : i32
    %c0_i32_1 = arith.constant 0 : i32
    %c0_i32_2 = arith.constant 0 : i32
    return %c0_i32, %c0_i32_0, %c0_i32_1 : i32, i32, i32
  }
  func.func @transform_17(%arg0: i32) -> (i32, i32, i32) {
    %c0_i32 = arith.constant 0 : i32
    %c0_i32_0 = arith.constant 0 : i32
    %c0_i32_1 = arith.constant 0 : i32
    %c0_i32_2 = arith.constant 0 : i32
    return %c0_i32, %c0_i32_0, %c0_i32_1 : i32, i32, i32
  }
  func.func @transform_18(%arg0: i32) -> (i32, i32) {
    %c0_i32 = arith.constant 0 : i32
    %c0_i32_0 = arith.constant 0 : i32
    %c0_i32_1 = arith.constant 0 : i32
    return %c0_i32, %c0_i32_0 : i32, i32
  }
  func.func @transform_19(%arg0: i32) -> (i32, i32) {
    %c0_i32 = arith.constant 0 : i32
    %c0_i32_0 = arith.constant 0 : i32
    %c0_i32_1 = arith.constant 0 : i32
    return %c0_i32, %c0_i32_0 : i32, i32
  }
  func.func @transform_20(%arg0: i32) -> (i32, i32) {
    %c0_i32 = arith.constant 0 : i32
    %c0_i32_0 = arith.constant 0 : i32
    %c0_i32_1 = arith.constant 0 : i32
    return %c0_i32, %c0_i32_0 : i32, i32
  }
  func.func @transform_21(%arg0: i32) -> (i32, i32) {
    %c0_i32 = arith.constant 0 : i32
    %c0_i32_0 = arith.constant 0 : i32
    %c0_i32_1 = arith.constant 0 : i32
    return %c0_i32, %c0_i32_0 : i32, i32
  }
  func.func @transform_22(%arg0: i32) -> (i32, i32, i32) {
    %c0_i32 = arith.constant 0 : i32
    %c0_i32_0 = arith.constant 0 : i32
    %c0_i32_1 = arith.constant 0 : i32
    %c0_i32_2 = arith.constant 0 : i32
    return %c0_i32, %c0_i32_0, %c0_i32_1 : i32, i32, i32
  }
}

</mosaic_0001>

<bundles_post_ra>
// kernel: _lambda_.6
= control target key start
LH: loop header
LB: loop body
LE: loop exit
PB: predicated region body
PF: predicated region fallthrough
CT: control target
= control target key end

     0   :  { %s633_s12 = smov 0   ;;  %s635_s13 = smov 0   ;;  %s835_s0 = inlined_call_operand.vmem [shape: f32[16,147], index: 0, kind: input, shape index: {}]   ;;  %s836_s1 = inlined_call_operand.vmem [shape: f32[147,512], index: 1, kind: input, shape index: {}]   ;;  %s837_s2 = inlined_call_operand.vmem [shape: f32[16,1], index: 2, kind: input, shape index: {}]   ;;  %s838_s3 = inlined_call_operand.vmem [shape: f32[16,512], index: 3, kind: output, shape index: {}]  }
   0x1   :  { %s637_s14 = smov 0  }
   0x2 LB: > { %s503_s15 = sadd.s32 4294967295, %s610_s14   ;;  %s650_s16 = sadd.s32 1, %s610_s14   ;;  %s610_s14 = sphi %s637_s14, %s842_s14   ;;  %s606_s13 = sphi %s635_s13, %s841_s13   ;;  %s602_s12 = sphi %s633_s12, %s840_s12  }
   0x3   : > { %s38_s17 = ssub.s32 %s610_s14, %s650_s16  ;;  %s41_s18 = sadd.s32 1, %s606_s13 }
   0x4   : > { %p39_p0 = scmp.eq.s32.totalorder %s38_s17, 0  ;;  %p48_p1 = scmp.ne.s32.totalorder %s606_s13, %s602_s12 }
   0x5   : > { %p49_p2 = scmp.eq.s32.totalorder %s610_s14, 0  ;;  %p99_p3 = scmp.eq.s32.totalorder %s503_s15, 1 }
   0x6   : > { %s661_s19 = scalar_select %p39_p0, %s606_s13, %s41_s18  }
   0x7   : > { %p50_p4 = por %p49_p2, %p48_p1  ;;  %p663_p5 = por %p99_p3, %p48_p1 }
   0x8   : > { %p506_p6 = scmp.ge.s32.totalorder %s610_s14, 2 }
   0xa   : > { %127 = sbr.rel (%p506_p6) target bundleno = 38 (0x26), region = 24 }
   0xf   : > { %130 = sbr.rel (!%p50_p4) target bundleno = 38 (0x26), region = 28  ;;  %s132_s21 = sand.u32 (%p50_p4), 1, %s606_s13  }
  0x10   : > { %s520_s22 = sshll.u32 (%p50_p4), %s610_s14, 4  ;;  %s560_s23 = smul.u32 (%p50_p4), 304, %s132_s21 }
  0x11   : > { %s673_s26 = scalar_lea.vmem (%p50_p4), %s836_s1, %s520_s22 }
  0x12   : > { %v150_v0 = vld [vmem:[%s673_s26] sm:$0xff] (%p50_p4)  ;;  %v152_v1 = vld [vmem:[%s673_s26 + $0x8] sm:$0xff] (%p50_p4)  ;;  %s681_s27 = scalar_lea.vmem (%p50_p4), [#allocation2], %s560_s23 }
  0x13   : > { %v154_v2 = vld [vmem:[%s673_s26 + $0x20] sm:$0xff] (%p50_p4)  ;;  %v156_v3 = vld [vmem:[%s673_s26 + $0x28] sm:$0xff] (%p50_p4)  ;;  %151 = vst [vmem:[%s681_s27] sm:$0xff] (%p50_p4), %v150_v0  ;;  %153 = vst [vmem:[%s681_s27 + $0x8] sm:$0xff] (%p50_p4), %v152_v1 }
  0x14   : > { %v158_v4 = vld [vmem:[%s673_s26 + $0x40] sm:$0xff]  ;;  %v160_v5 = vld [vmem:[%s673_s26 + $0x48] sm:$0xff]  ;;  %155 = vst [vmem:[%s681_s27 + $0x10] sm:$0xff] %v154_v2  ;;  %157 = vst [vmem:[%s681_s27 + $0x18] sm:$0xff] %v156_v3 }
  0x15   : > { %159 = vst [vmem:[%s681_s27 + $0x20] sm:$0xff] %v158_v4  ;;  %161 = vst [vmem:[%s681_s27 + $0x28] sm:$0xff] %v160_v5  ;;  %v162_v6 = vld [vmem:[%s673_s26 + $0x60] sm:$0xff]  ;;  %v164_v7 = vld [vmem:[%s673_s26 + $0x68] sm:$0xff] }
  0x16   : > { %v166_v8 = vld [vmem:[%s673_s26 + $0x80] sm:$0xff]  ;;  %163 = vst [vmem:[%s681_s27 + $0x30] sm:$0xff] %v162_v6  ;;  %165 = vst [vmem:[%s681_s27 + $0x38] sm:$0xff] %v164_v7  ;;  %v168_v9 = vld [vmem:[%s673_s26 + $0x88] sm:$0xff] }
  0x17   : > { %167 = vst [vmem:[%s681_s27 + $0x40] sm:$0xff] %v166_v8  ;;  %v170_v10 = vld [vmem:[%s673_s26 + $0xa0] sm:$0xff]  ;;  %v172_v11 = vld [vmem:[%s673_s26 + $0xa8] sm:$0xff]  ;;  %169 = vst [vmem:[%s681_s27 + $0x48] sm:$0xff] %v168_v9 }
  0x18   : > { %171 = vst [vmem:[%s681_s27 + $0x50] sm:$0xff] %v170_v10  ;;  %173 = vst [vmem:[%s681_s27 + $0x58] sm:$0xff] %v172_v11  ;;  %v174_v12 = vld [vmem:[%s673_s26 + $0xc0] sm:$0xff]  ;;  %v176_v13 = vld [vmem:[%s673_s26 + $0xc8] sm:$0xff] }
  0x19   : > { %v178_v14 = vld [vmem:[%s673_s26 + $0xe0] sm:$0xff]  ;;  %175 = vst [vmem:[%s681_s27 + $0x60] sm:$0xff] %v174_v12  ;;  %177 = vst [vmem:[%s681_s27 + $0x68] sm:$0xff] %v176_v13  ;;  %v180_v15 = vld [vmem:[%s673_s26 + $0xe8] sm:$0xff] }
  0x1a   : > { %179 = vst [vmem:[%s681_s27 + $0x70] sm:$0xff] %v178_v14  ;;  %v182_v16 = vld [vmem:[%s673_s26 + $0x100] sm:$0xff]  ;;  %v184_v17 = vld [vmem:[%s673_s26 + $0x108] sm:$0xff]  ;;  %181 = vst [vmem:[%s681_s27 + $0x78] sm:$0xff] %v180_v15 }
  0x1b   : > { %183 = vst [vmem:[%s681_s27 + $0x80] sm:$0xff] %v182_v16  ;;  %185 = vst [vmem:[%s681_s27 + $0x88] sm:$0xff] %v184_v17  ;;  %v186_v18 = vld [vmem:[%s673_s26 + $0x120] sm:$0xff]  ;;  %v188_v19 = vld [vmem:[%s673_s26 + $0x128] sm:$0xff] }
  0x1c   : > { %v190_v20 = vld [vmem:[%s673_s26 + $0x140] sm:$0xff]  ;;  %187 = vst [vmem:[%s681_s27 + $0x90] sm:$0xff] %v186_v18  ;;  %189 = vst [vmem:[%s681_s27 + $0x98] sm:$0xff] %v188_v19  ;;  %v192_v21 = vld [vmem:[%s673_s26 + $0x148] sm:$0xff] }
  0x1d   : > { %191 = vst [vmem:[%s681_s27 + $0xa0] sm:$0xff] %v190_v20  ;;  %v194_v22 = vld [vmem:[%s673_s26 + $0x160] sm:$0xff]  ;;  %v196_v23 = vld [vmem:[%s673_s26 + $0x168] sm:$0xff]  ;;  %193 = vst [vmem:[%s681_s27 + $0xa8] sm:$0xff] %v192_v21 }
  0x1e   : > { %195 = vst [vmem:[%s681_s27 + $0xb0] sm:$0xff] %v194_v22  ;;  %197 = vst [vmem:[%s681_s27 + $0xb8] sm:$0xff] %v196_v23  ;;  %v198_v24 = vld [vmem:[%s673_s26 + $0x180] sm:$0xff]  ;;  %v200_v25 = vld [vmem:[%s673_s26 + $0x188] sm:$0xff] }
  0x1f   : > { %v202_v26 = vld [vmem:[%s673_s26 + $0x1a0] sm:$0xff]  ;;  %199 = vst [vmem:[%s681_s27 + $0xc0] sm:$0xff] %v198_v24  ;;  %201 = vst [vmem:[%s681_s27 + $0xc8] sm:$0xff] %v200_v25  ;;  %v204_v27 = vld [vmem:[%s673_s26 + $0x1a8] sm:$0xff] }
  0x20   : > { %203 = vst [vmem:[%s681_s27 + $0xd0] sm:$0xff] %v202_v26  ;;  %v206_v28 = vld [vmem:[%s673_s26 + $0x1c0] sm:$0xff]  ;;  %v208_v29 = vld [vmem:[%s673_s26 + $0x1c8] sm:$0xff]  ;;  %205 = vst [vmem:[%s681_s27 + $0xd8] sm:$0xff] %v204_v27 }
  0x21   : > { %207 = vst [vmem:[%s681_s27 + $0xe0] sm:$0xff] %v206_v28  ;;  %209 = vst [vmem:[%s681_s27 + $0xe8] sm:$0xff] %v208_v29  ;;  %v210_v30 = vld [vmem:[%s673_s26 + $0x1e0] sm:$0xff]  ;;  %v212_v31 = vld [vmem:[%s673_s26 + $0x1e8] sm:$0xff] }
  0x22   : > { %v214_v32 = vld [vmem:[%s673_s26 + $0x200] sm:$0xff]  ;;  %211 = vst [vmem:[%s681_s27 + $0xf0] sm:$0xff] %v210_v30  ;;  %213 = vst [vmem:[%s681_s27 + $0xf8] sm:$0xff] %v212_v31  ;;  %v216_v33 = vld [vmem:[%s673_s26 + $0x208] sm:$0xff] }
  0x23   : > { %215 = vst [vmem:[%s681_s27 + $0x100] sm:$0xff] %v214_v32  ;;  %v218_v34 = vld [vmem:[%s673_s26 + $0x220] sm:$0xff]  ;;  %v220_v35 = vld [vmem:[%s673_s26 + $0x228] sm:$0xff]  ;;  %217 = vst [vmem:[%s681_s27 + $0x108] sm:$0xff] %v216_v33 }
  0x24   : > { %219 = vst [vmem:[%s681_s27 + $0x110] sm:$0xff] %v218_v34  ;;  %221 = vst [vmem:[%s681_s27 + $0x118] sm:$0xff] %v220_v35  ;;  %v222_v36 = vld [vmem:[%s673_s26 + $0x240] sm:$0xff]  ;;  %v224_v37 = vld [vmem:[%s673_s26 + $0x248] sm:$0xff] }
  0x25   : > { %223 = vst [vmem:[%s681_s27 + $0x120] sm:$0xff] %v222_v36  ;;  %225 = vst [vmem:[%s681_s27 + $0x128] sm:$0xff] %v224_v37 }
  0x26 PF: > { %p509_p7 = scmp.ge.s32.totalorder %s610_s14, 1  ;;  %p230_p8 = scmp.lt.s32.totalorder %s610_s14, 3 }
  0x28   : > { %p231_p9 = pnand %p509_p7, %p230_p8 }
  0x29   : > { %s237_s28 = sand.u32 (!%p231_p9), 1, %s602_s12  }
  0x2a   : > { %234 = sbr.rel (%p231_p9) target bundleno = 296 (0x128), region = 51  ;;  %s510_s23 = sshll.u32 (!%p231_p9), %s237_s28, 5 }
  0x2b   : > { %s561_s6 = smul.u32 (!%p231_p9), 304, %s237_s28  ;;  %s258_s24 = scalar_lea.vmem (!%p231_p9), [#allocation3], %s510_s23 }
  0x2d   : > { %s767_s9 = scalar_lea.vmem (!%p231_p9), [#allocation2], %s561_s6 }
  0x2f   : > { %v262_v38 = vld [vmem:[%s835_s0 + $0x8] sm:$0xff]  ;;  %vm315_vm0 = vcmask 154624   ;;  %v264_v39 = vld [vmem:[%s835_s0 + $0x18] sm:$0xff]  ;;  %v303_v40 = vld [vmem:[%s837_s2] sm:$0xff]  ;;  %v612_v41 = vmov 0   ;;  %vm322_vm1 = vcmask 1042432  }
  0x30   : > { %513 = vmatprep.mubr.msk.f32.mxu0 %vm315_vm0, %v262_v38  ;;  %514 = vmatprep.mubr.msk.f32.mxu1 %vm315_vm0, %v264_v39  ;;  %v296_v42 = vld [vmem:[%s767_s9 + $0xf8] sm:$0xff]  ;;  %v295_v43 = vld [vmem:[%s767_s9 + $0xf0] sm:$0xff]  ;;  %v294_v44 = vld [vmem:[%s767_s9 + $0xe8] sm:$0xff]  ;;  %s521_s12 = sshll.u32 (%p663_p5), %s503_s15, 4 }
  0x31   : > { %587 = vset.pattern.permute.xlu0 %v612_v41  ;;  %329 = vmatprep.subr.mxu0 %v296_v42  ;;  %v293_v45 = vld [vmem:[%s767_s9 + $0xe0] sm:$0xff]  ;;  %v292_v46 = vld [vmem:[%s767_s9 + $0xd8] sm:$0xff]  ;;  %v291_v47 = vld [vmem:[%s767_s9 + $0xd0] sm:$0xff]  ;;  %s423_s27 = scalar_lea.vmem (%p663_p5), %s838_s3, %s521_s12 }
  0x32   : > { %307 = vperm.xlu0 %587, %v303_v40   ;;  %522 = vmatprep.subr.mxu1 %v296_v42  ;;  %v290_v48 = vld [vmem:[%s767_s9 + $0xc8] sm:$0xff]  ;;  %v289_v49 = vld [vmem:[%s767_s9 + $0xc0] sm:$0xff]  ;;  %v288_v50 = vld [vmem:[%s767_s9 + $0xb8] sm:$0xff] }
  0x33   : > { %330 = vmatpush1.msra.mxu0 %v295_v43  ;;  %541 = vmatpush1.msra.mxu1 %v295_v43  ;;  %v287_v51 = vld [vmem:[%s767_s9 + $0xb0] sm:$0xff]  ;;  %v286_v52 = vld [vmem:[%s767_s9 + $0xa8] sm:$0xff]  ;;  %v285_v53 = vld [vmem:[%s767_s9 + $0xa0] sm:$0xff] }
  0x34   : > { %331 = vmatprep.subr.mxu0 %v294_v44  ;;  %523 = vmatprep.subr.mxu1 %v294_v44  ;;  %v284_v54 = vld [vmem:[%s767_s9 + $0x98] sm:$0xff]  ;;  %v283_v55 = vld [vmem:[%s767_s9 + $0x90] sm:$0xff]  ;;  %v282_v56 = vld [vmem:[%s767_s9 + $0x88] sm:$0xff] }
  0x35   : > { %332 = vmatpush1.msra.mxu0 %v293_v45  ;;  %542 = vmatpush1.msra.mxu1 %v293_v45  ;;  %v281_v57 = vld [vmem:[%s767_s9 + $0x80] sm:$0xff]  ;;  %v280_v58 = vld [vmem:[%s767_s9 + $0x78] sm:$0xff]  ;;  %v279_v59 = vld [vmem:[%s767_s9 + $0x70] sm:$0xff] }
  0x36   : > { %333 = vmatprep.subr.mxu0 %v292_v46  ;;  %524 = vmatprep.subr.mxu1 %v292_v46  ;;  %v278_v60 = vld [vmem:[%s767_s9 + $0x68] sm:$0xff]  ;;  %v277_v61 = vld [vmem:[%s767_s9 + $0x60] sm:$0xff]  ;;  %v276_v62 = vld [vmem:[%s767_s9 + $0x58] sm:$0xff] }
  0x37   : > { %334 = vmatpush1.msra.mxu0 %v291_v47  ;;  %543 = vmatpush1.msra.mxu1 %v291_v47  ;;  %v275_v63 = vld [vmem:[%s767_s9 + $0x50] sm:$0xff]  ;;  %v274_v0 = vld [vmem:[%s767_s9 + $0x48] sm:$0xff]  ;;  %v273_v1 = vld [vmem:[%s767_s9 + $0x40] sm:$0xff] }
  0x38   : > { %335 = vmatprep.subr.mxu0 %v290_v48  ;;  %525 = vmatprep.subr.mxu1 %v290_v48  ;;  %v272_v2 = vld [vmem:[%s767_s9 + $0x38] sm:$0xff]  ;;  %v271_v3 = vld [vmem:[%s767_s9 + $0x30] sm:$0xff]  ;;  %v270_v4 = vld [vmem:[%s767_s9 + $0x28] sm:$0xff] }
  0x39   : > { %336 = vmatpush1.msra.mxu0 %v289_v49  ;;  %544 = vmatpush1.msra.mxu1 %v289_v49  ;;  %v269_v5 = vld [vmem:[%s767_s9 + $0x20] sm:$0xff]  ;;  %v268_v6 = vld [vmem:[%s767_s9 + $0x18] sm:$0xff]  ;;  %v267_v7 = vld [vmem:[%s767_s9 + $0x10] sm:$0xff] }
  0x3a   : > { %337 = vmatprep.subr.mxu0 %v288_v50  ;;  %526 = vmatprep.subr.mxu1 %v288_v50  ;;  %v266_v8 = vld [vmem:[%s767_s9 + $0x8] sm:$0xff]  ;;  %v265_v9 = vld [vmem:[%s767_s9] sm:$0xff]  ;;  %v300_v12 = vld [vmem:[%s767_s9 + $0x118] sm:$0xff] }
  0x3b   : > { %338 = vmatpush1.msra.mxu0 %v287_v51  ;;  %545 = vmatpush1.msra.mxu1 %v287_v51  ;;  %v302_v10 = vld [vmem:[%s767_s9 + $0x128] sm:$0x7]  ;;  %v301_v11 = vld [vmem:[%s767_s9 + $0x120] sm:$0x7]  ;;  %v299_v13 = vld [vmem:[%s767_s9 + $0x110] sm:$0xff] }
  0x3c   : > { %339 = vmatprep.subr.mxu0 %v286_v52  ;;  %527 = vmatprep.subr.mxu1 %v286_v52  ;;  %v298_v14 = vld [vmem:[%s767_s9 + $0x108] sm:$0xff]  ;;  %v297_v15 = vld [vmem:[%s767_s9 + $0x100] sm:$0xff] }
  0x3d   : > { %340 = vmatpush1.msra.mxu0 %v285_v53  ;;  %546 = vmatpush1.msra.mxu1 %v285_v53  ;;  %v261_v16 = vld [vmem:[%s835_s0] sm:$0xff]  ;;  %v263_v17 = vld [vmem:[%s835_s0 + $0x10] sm:$0xff]  ;;  %v304_v18 = vld [vmem:[%s837_s2 + $0x8] sm:$0xff] }
  0x3e   : > { %341 = vmatprep.subr.mxu0 %v284_v54  ;;  %528 = vmatprep.subr.mxu1 %v284_v54 }
  0x3f   : > { %342 = vmatpush1.msra.mxu0 %v283_v55  ;;  %547 = vmatpush1.msra.mxu1 %v283_v55 }
  0x40   : > { %343 = vmatprep.subr.mxu0 %v282_v56  ;;  %529 = vmatprep.subr.mxu1 %v282_v56 }
  0x41   : > { %344 = vmatpush1.msra.mxu0 %v281_v57  ;;  %548 = vmatpush1.msra.mxu1 %v281_v57 }
  0x42   : > { %345 = vmatprep.subr.mxu0 %v280_v58  ;;  %530 = vmatprep.subr.mxu1 %v280_v58 }
  0x43   : > { %346 = vmatpush1.msra.mxu0 %v279_v59  ;;  %549 = vmatpush1.msra.mxu1 %v279_v59 }
  0x44   : > { %347 = vmatprep.subr.mxu0 %v278_v60  ;;  %531 = vmatprep.subr.mxu1 %v278_v60 }
  0x45   : > { %348 = vmatpush1.msra.mxu0 %v277_v61  ;;  %550 = vmatpush1.msra.mxu1 %v277_v61 }
  0x46   : > { %349 = vmatprep.subr.mxu0 %v276_v62  ;;  %532 = vmatprep.subr.mxu1 %v276_v62 }
  0x47   : > { %350 = vmatpush1.msra.mxu0 %v275_v63  ;;  %551 = vmatpush1.msra.mxu1 %v275_v63 }
  0x48   : > { %351 = vmatprep.subr.mxu0 %v274_v0  ;;  %533 = vmatprep.subr.mxu1 %v274_v0 }
  0x49   : > { %352 = vmatpush1.msra.mxu0 %v273_v1  ;;  %552 = vmatpush1.msra.mxu1 %v273_v1 }
  0x4a   : > { %353 = vmatprep.subr.mxu0 %v272_v2  ;;  %534 = vmatprep.subr.mxu1 %v272_v2 }
  0x4b   : > { %354 = vmatpush1.msra.mxu0 %v271_v3  ;;  %553 = vmatpush1.msra.mxu1 %v271_v3 }
  0x4c   : > { %355 = vmatprep.subr.mxu0 %v270_v4  ;;  %535 = vmatprep.subr.mxu1 %v270_v4 }
  0x4d   : > { %356 = vmatpush1.msra.mxu0 %v269_v5  ;;  %554 = vmatpush1.msra.mxu1 %v269_v5 }
  0x4e   : > { %357 = vmatprep.subr.mxu0 %v268_v6  ;;  %536 = vmatprep.subr.mxu1 %v268_v6 }
  0x4f   : > { %358 = vmatpush1.msra.mxu0 %v267_v7  ;;  %555 = vmatpush1.msra.mxu1 %v267_v7 }
  0x50   : > { %359 = vmatprep.subr.mxu0 %v266_v8  ;;  %537 = vmatprep.subr.mxu1 %v266_v8 }
  0x51   : > { %360 = vmatpush1.msra.mxu0 %v265_v9  ;;  %556 = vmatpush1.msra.mxu1 %v265_v9 }
  0x52   : > { %511 = vmatprep.subr.msk.mxu0 %vm322_vm1, %v302_v10  ;;  %538 = vmatprep.subr.msk.mxu1 %vm322_vm1, %v302_v10 }
  0x53   : > { %512 = vmatpush2.msk.msra.mxu0 %vm322_vm1, %v301_v11  ;;  %557 = vmatpush2.msk.msra.mxu1 %vm322_vm1, %v301_v11 }
  0x54   : > { %389 = vmatprep.subr.mxu0 %v300_v12  ;;  %539 = vmatprep.subr.mxu1 %v300_v12 }
  0x55   : > { %390 = vmatpush2.msra.mxu0 %v299_v13  ;;  %558 = vmatpush2.msra.mxu1 %v299_v13 }
  0x56   : > { %391 = vmatprep.subr.mxu0 %v298_v14  ;;  %540 = vmatprep.subr.mxu1 %v298_v14 }
  0x57   : > { %392 = vmatpush2.msra.mxu0 %v297_v15  ;;  %559 = vmatpush2.msra.mxu1 %v297_v15 }
  0x58   : > { %394 = vmatmul.mubr.f32.vlgmr.msra.gmra.mxu0 %v261_v16  ;;  %400 = vmatmul.mubr.f32.vlgmr.msra.gmra.mxu1 %v263_v17 }
  0x59   : > { %312 = vperm.xlu0 %587, %v304_v18  }
  0xad   : > { %v308_v19 = vpop.permute.xlu0 %307 }
  0xd4   : > { %v313_v20 = vpop.permute.xlu0 %312 }
 0x118   : > { %v395_v21 = vpop.f32.mrf.mxu0  ;;  %v401_v22 = vpop.f32.mrf.mxu1 }
 0x119   : > { %v396_v23 = vadd.f32 %v395_v21, %v308_v19  ;;  %v402_v24 = vadd.f32 %v401_v22, %v313_v20 }
 0x11a   : > { %v397_v25 = vpop.f32.mrf.mxu0  ;;  %v403_v26 = vpop.f32.mrf.mxu1 }
 0x11b   : > { %v406_v27 = vmax.f32 %v396_v23, 0.0  ;;  %v408_v28 = vmax.f32 %v402_v24, 0.0  ;;  %v398_v29 = vadd.f32 %v397_v25, %v308_v19  ;;  %v404_v30 = vadd.f32 %v403_v26, %v313_v20  ;;  %420 = sbr.rel (!%p663_p5) target bundleno = 296 (0x128), region = 59 }
 0x11d   : > { %410 = vst [vmem:[%s258_s24] sm:$0xff] %v406_v27  ;;  %412 = vst [vmem:[%s258_s24 + $0x10] sm:$0xff] %v408_v28  ;;  %v407_v31 = vmax.f32 %v398_v29, 0.0  ;;  %v409_v32 = vmax.f32 %v404_v30, 0.0 }
 0x11f   : > { %411 = vst [vmem:[%s258_s24 + $0x8] sm:$0xff] %v407_v31  ;;  %413 = vst [vmem:[%s258_s24 + $0x18] sm:$0xff] %v409_v32 }
 0x124   : > { %v436_v33 = vld [vmem:[%s258_s24] sm:$0xff]  ;;  %v440_v35 = vld [vmem:[%s258_s24 + $0x10] sm:$0xff] }
 0x125   : > { %437 = vst [vmem:[%s423_s27] sm:$0xff] %v436_v33  ;;  %441 = vst [vmem:[%s423_s27 + $0x20] sm:$0xff] %v440_v35 }
 0x126   : > { %v438_v34 = vld [vmem:[%s258_s24 + $0x8] sm:$0xff]  ;;  %v442_v36 = vld [vmem:[%s258_s24 + $0x18] sm:$0xff] }
 0x127   : > { %439 = vst [vmem:[%s423_s27 + $0x8] sm:$0xff] %v438_v34  ;;  %443 = vst [vmem:[%s423_s27 + $0x28] sm:$0xff] %v442_v36 }
 0x128 PF: > { %p10_p10 = scmp.ge.s32.totalorder %s650_s16, 4   ;;  %s840_s12 = smov %s606_s13 }
 0x129   : > { %s841_s13 = smov %s661_s19  ;;  %s842_s14 = smov %s650_s16 }
 0x12a   :  { %12 = sbr.rel (!%p10_p10) target bundleno = 2 (0x2), region = 113 }

// kernel: _lambda_.7
= control target key start
LH: loop header
LB: loop body
LE: loop exit
PB: predicated region body
PF: predicated region fallthrough
CT: control target
= control target key end

     0   :  { %v179_v0 = vmov 0.0   ;;  %vm48_vm0 = vcmask 130048   ;;  %v180_v24 = vmov 0   ;;  %s315_s1 = inlined_call_operand.vmem [shape: f32[144,128], index: 1, kind: input, shape index: {}]   ;;  %s316_s0 = inlined_call_operand.vmem [shape: f32[16,144], index: 0, kind: input, shape index: {}]   ;;  %s317_s2 = inlined_call_operand.vmem [shape: f32[16,1], index: 2, kind: input, shape index: {}]   ;;  %s318_s3 = inlined_call_operand.vmem [shape: f32[16,128], index: 3, kind: output, shape index: {}]  }
   0x1   :  { %55 = vmatprep.subr.mxu0 %v179_v0  ;;  %140 = vmatprep.subr.mxu1 %v179_v0  ;;  %v33_v1 = vld [vmem:[%s315_s1 + $0x78] sm:$0xff]  ;;  %v32_v2 = vld [vmem:[%s315_s1 + $0x70] sm:$0xff]  ;;  %v31_v3 = vld [vmem:[%s315_s1 + $0x68] sm:$0xff] }
   0x2   :  { %56 = vmatpush1.msra.mxu0 %v33_v1  ;;  %158 = vmatpush1.msra.mxu1 %v33_v1  ;;  %v30_v4 = vld [vmem:[%s315_s1 + $0x60] sm:$0xff]  ;;  %v29_v5 = vld [vmem:[%s315_s1 + $0x58] sm:$0xff]  ;;  %v28_v6 = vld [vmem:[%s315_s1 + $0x50] sm:$0xff] }
   0x3   :  { %57 = vmatprep.subr.mxu0 %v179_v0  ;;  %141 = vmatprep.subr.mxu1 %v179_v0  ;;  %v27_v7 = vld [vmem:[%s315_s1 + $0x48] sm:$0xff]  ;;  %v26_v8 = vld [vmem:[%s315_s1 + $0x40] sm:$0xff]  ;;  %v25_v9 = vld [vmem:[%s315_s1 + $0x38] sm:$0xff] }
   0x4   :  { %58 = vmatpush1.msra.mxu0 %v32_v2  ;;  %159 = vmatpush1.msra.mxu1 %v32_v2  ;;  %v24_v10 = vld [vmem:[%s315_s1 + $0x30] sm:$0xff]  ;;  %v23_v11 = vld [vmem:[%s315_s1 + $0x28] sm:$0xff]  ;;  %v22_v12 = vld [vmem:[%s315_s1 + $0x20] sm:$0xff] }
   0x5   :  { %59 = vmatprep.subr.mxu0 %v179_v0  ;;  %142 = vmatprep.subr.mxu1 %v179_v0  ;;  %v21_v13 = vld [vmem:[%s315_s1 + $0x18] sm:$0xff]  ;;  %v20_v14 = vld [vmem:[%s315_s1 + $0x10] sm:$0xff]  ;;  %v19_v15 = vld [vmem:[%s315_s1 + $0x8] sm:$0xff] }
   0x6   :  { %60 = vmatpush1.msra.mxu0 %v31_v3  ;;  %160 = vmatpush1.msra.mxu1 %v31_v3  ;;  %v18_v16 = vld [vmem:[%s315_s1] sm:$0xff]  ;;  %v35_v17 = vld [vmem:[%s315_s1 + $0x88] sm:$0xff]  ;;  %v17_v20 = vld [vmem:[%s316_s0 + $0x18] sm:$0xff] }
   0x7   :  { %61 = vmatprep.subr.mxu0 %v179_v0  ;;  %143 = vmatprep.subr.mxu1 %v179_v0  ;;  %v34_v18 = vld [vmem:[%s315_s1 + $0x80] sm:$0xff]  ;;  %v15_v19 = vld [vmem:[%s316_s0 + $0x8] sm:$0xff]  ;;  %v16_v22 = vld [vmem:[%s316_s0 + $0x10] sm:$0xff] }
   0x8   :  { %62 = vmatpush1.msra.mxu0 %v30_v4  ;;  %161 = vmatpush1.msra.mxu1 %v30_v4  ;;  %v14_v21 = vld [vmem:[%s316_s0] sm:$0xff]  ;;  %v37_v25 = vld [vmem:[%s317_s2 + $0x8] sm:$0xff] }
   0x9   :  { %63 = vmatprep.subr.mxu0 %v179_v0  ;;  %144 = vmatprep.subr.mxu1 %v179_v0  ;;  %v36_v23 = vld [vmem:[%s317_s2] sm:$0xff] }
   0xa   :  { %64 = vmatpush1.msra.mxu0 %v29_v5  ;;  %162 = vmatpush1.msra.mxu1 %v29_v5 }
   0xb   :  { %65 = vmatprep.subr.mxu0 %v179_v0  ;;  %145 = vmatprep.subr.mxu1 %v179_v0 }
   0xc   :  { %66 = vmatpush1.msra.mxu0 %v28_v6  ;;  %163 = vmatpush1.msra.mxu1 %v28_v6 }
   0xd   :  { %67 = vmatprep.subr.mxu0 %v179_v0  ;;  %146 = vmatprep.subr.mxu1 %v179_v0 }
   0xe   :  { %68 = vmatpush1.msra.mxu0 %v27_v7  ;;  %164 = vmatpush1.msra.mxu1 %v27_v7 }
   0xf   :  { %69 = vmatprep.subr.mxu0 %v179_v0  ;;  %147 = vmatprep.subr.mxu1 %v179_v0 }
  0x10   :  { %70 = vmatpush1.msra.mxu0 %v26_v8  ;;  %165 = vmatpush1.msra.mxu1 %v26_v8 }
  0x11   :  { %71 = vmatprep.subr.mxu0 %v179_v0  ;;  %148 = vmatprep.subr.mxu1 %v179_v0 }
  0x12   :  { %72 = vmatpush1.msra.mxu0 %v25_v9  ;;  %166 = vmatpush1.msra.mxu1 %v25_v9 }
  0x13   :  { %73 = vmatprep.subr.mxu0 %v179_v0  ;;  %149 = vmatprep.subr.mxu1 %v179_v0 }
  0x14   :  { %74 = vmatpush1.msra.mxu0 %v24_v10  ;;  %167 = vmatpush1.msra.mxu1 %v24_v10 }
  0x15   :  { %75 = vmatprep.subr.mxu0 %v179_v0  ;;  %150 = vmatprep.subr.mxu1 %v179_v0 }
  0x16   :  { %76 = vmatpush1.msra.mxu0 %v23_v11  ;;  %168 = vmatpush1.msra.mxu1 %v23_v11 }
  0x17   :  { %77 = vmatprep.subr.mxu0 %v179_v0  ;;  %151 = vmatprep.subr.mxu1 %v179_v0 }
  0x18   :  { %78 = vmatpush1.msra.mxu0 %v22_v12  ;;  %169 = vmatpush1.msra.mxu1 %v22_v12 }
  0x19   :  { %79 = vmatprep.subr.mxu0 %v179_v0  ;;  %152 = vmatprep.subr.mxu1 %v179_v0 }
  0x1a   :  { %80 = vmatpush1.msra.mxu0 %v21_v13  ;;  %170 = vmatpush1.msra.mxu1 %v21_v13 }
  0x1b   :  { %81 = vmatprep.subr.mxu0 %v179_v0  ;;  %153 = vmatprep.subr.mxu1 %v179_v0 }
  0x1c   :  { %82 = vmatpush1.msra.mxu0 %v20_v14  ;;  %171 = vmatpush1.msra.mxu1 %v20_v14 }
  0x1d   :  { %83 = vmatprep.subr.mxu0 %v179_v0  ;;  %154 = vmatprep.subr.mxu1 %v179_v0 }
  0x1e   :  { %84 = vmatpush1.msra.mxu0 %v19_v15  ;;  %172 = vmatpush1.msra.mxu1 %v19_v15 }
  0x1f   :  { %85 = vmatprep.subr.mxu0 %v179_v0  ;;  %155 = vmatprep.subr.mxu1 %v179_v0 }
  0x20   :  { %86 = vmatpush1.msra.mxu0 %v18_v16  ;;  %173 = vmatpush1.msra.mxu1 %v18_v16 }
  0x21   :  { %115 = vmatprep.subr.mxu0 %v179_v0  ;;  %156 = vmatprep.subr.mxu1 %v179_v0 }
  0x22   :  { %116 = vmatpush2.msra.mxu0 %v35_v17  ;;  %174 = vmatpush2.msra.mxu1 %v35_v17 }
  0x23   :  { %117 = vmatprep.subr.mxu0 %v179_v0  ;;  %157 = vmatprep.subr.mxu1 %v179_v0 }
  0x24   :  { %118 = vmatpush2.msra.mxu0 %v34_v18  ;;  %175 = vmatpush2.msra.mxu1 %v34_v18 }
  0x25   :  { %138 = vmatprep.mubr.msk.f32.mxu0 %vm48_vm0, %v15_v19  ;;  %139 = vmatprep.mubr.msk.f32.mxu1 %vm48_vm0, %v17_v20 }
  0x26   :  { %120 = vmatmul.mubr.f32.vlgmr.msra.gmra.mxu0 %v14_v21  ;;  %125 = vmatmul.mubr.f32.vlgmr.msra.gmra.mxu1 %v16_v22 }
  0x27   :  { %178 = vset.pattern.permute.xlu0 %v180_v24 }
  0x28   :  { %40 = vperm.xlu0 %178, %v36_v23  }
  0x2c   :  { %45 = vperm.xlu0 %178, %v37_v25  }
  0xa3   :  { %v41_v26 = vpop.permute.xlu0 %40 }
  0xa7   :  { %v46_v27 = vpop.permute.xlu0 %45 }
  0xe6   :  { %v121_v28 = vpop.f32.mrf.mxu0  ;;  %v126_v29 = vpop.f32.mrf.mxu1 }
  0xe7   :  { %v122_v30 = vadd.f32 %v121_v28, %v41_v26  ;;  %v127_v31 = vadd.f32 %v126_v29, %v46_v27 }
  0xe8   :  { %v123_v32 = vpop.f32.mrf.mxu0  ;;  %v128_v33 = vpop.f32.mrf.mxu1 }
  0xe9   :  { %v130_v34 = vmax.f32 %v122_v30, 0.0  ;;  %v131_v35 = vmax.f32 %v127_v31, 0.0 }
  0xeb   :  { %132 = vst [vmem:[%s318_s3] sm:$0xff] %v130_v34  ;;  %133 = vst [vmem:[%s318_s3 + $0x8] sm:$0xff] %v131_v35 }

// kernel: _lambda_.8
= control target key start
LH: loop header
LB: loop body
LE: loop exit
PB: predicated region body
PF: predicated region fallthrough
CT: control target
= control target key end

     0   :  { %v186_v0 = vmov 0.0   ;;  %vm51_vm0 = vcmask 130048   ;;  %v187_v24 = vmov 0   ;;  %s333_s1 = inlined_call_operand.vmem [shape: f32[144,128], index: 1, kind: input, shape index: {}]   ;;  %s334_s0 = inlined_call_operand.vmem [shape: f32[16,144], index: 0, kind: input, shape index: {}]   ;;  %s335_s2 = inlined_call_operand.vmem [shape: f32[16,1], index: 2, kind: input, shape index: {}]   ;;  %s336_s3 = inlined_call_operand.vmem [shape: f32[16,128], index: 3, kind: input, shape index: {}]   ;;  %s337_s4 = inlined_call_operand.vmem [shape: f32[16,128], index: 4, kind: output, shape index: {}]  }
   0x1   :  { %58 = vmatprep.subr.mxu0 %v186_v0  ;;  %147 = vmatprep.subr.mxu1 %v186_v0  ;;  %v36_v1 = vld [vmem:[%s333_s1 + $0x78] sm:$0xff]  ;;  %v35_v2 = vld [vmem:[%s333_s1 + $0x70] sm:$0xff]  ;;  %v34_v3 = vld [vmem:[%s333_s1 + $0x68] sm:$0xff] }
   0x2   :  { %59 = vmatpush1.msra.mxu0 %v36_v1  ;;  %165 = vmatpush1.msra.mxu1 %v36_v1  ;;  %v33_v4 = vld [vmem:[%s333_s1 + $0x60] sm:$0xff]  ;;  %v32_v5 = vld [vmem:[%s333_s1 + $0x58] sm:$0xff]  ;;  %v31_v6 = vld [vmem:[%s333_s1 + $0x50] sm:$0xff] }
   0x3   :  { %60 = vmatprep.subr.mxu0 %v186_v0  ;;  %148 = vmatprep.subr.mxu1 %v186_v0  ;;  %v30_v7 = vld [vmem:[%s333_s1 + $0x48] sm:$0xff]  ;;  %v29_v8 = vld [vmem:[%s333_s1 + $0x40] sm:$0xff]  ;;  %v28_v9 = vld [vmem:[%s333_s1 + $0x38] sm:$0xff] }
   0x4   :  { %61 = vmatpush1.msra.mxu0 %v35_v2  ;;  %166 = vmatpush1.msra.mxu1 %v35_v2  ;;  %v27_v10 = vld [vmem:[%s333_s1 + $0x30] sm:$0xff]  ;;  %v26_v11 = vld [vmem:[%s333_s1 + $0x28] sm:$0xff]  ;;  %v25_v12 = vld [vmem:[%s333_s1 + $0x20] sm:$0xff] }
   0x5   :  { %62 = vmatprep.subr.mxu0 %v186_v0  ;;  %149 = vmatprep.subr.mxu1 %v186_v0  ;;  %v24_v13 = vld [vmem:[%s333_s1 + $0x18] sm:$0xff]  ;;  %v23_v14 = vld [vmem:[%s333_s1 + $0x10] sm:$0xff]  ;;  %v22_v15 = vld [vmem:[%s333_s1 + $0x8] sm:$0xff] }
   0x6   :  { %63 = vmatpush1.msra.mxu0 %v34_v3  ;;  %167 = vmatpush1.msra.mxu1 %v34_v3  ;;  %v21_v16 = vld [vmem:[%s333_s1] sm:$0xff]  ;;  %v38_v17 = vld [vmem:[%s333_s1 + $0x88] sm:$0xff]  ;;  %v20_v20 = vld [vmem:[%s334_s0 + $0x18] sm:$0xff] }
   0x7   :  { %64 = vmatprep.subr.mxu0 %v186_v0  ;;  %150 = vmatprep.subr.mxu1 %v186_v0  ;;  %v37_v18 = vld [vmem:[%s333_s1 + $0x80] sm:$0xff]  ;;  %v18_v19 = vld [vmem:[%s334_s0 + $0x8] sm:$0xff]  ;;  %v19_v22 = vld [vmem:[%s334_s0 + $0x10] sm:$0xff] }
   0x8   :  { %65 = vmatpush1.msra.mxu0 %v33_v4  ;;  %168 = vmatpush1.msra.mxu1 %v33_v4  ;;  %v17_v21 = vld [vmem:[%s334_s0] sm:$0xff]  ;;  %v40_v25 = vld [vmem:[%s335_s2 + $0x8] sm:$0xff] }
   0x9   :  { %66 = vmatprep.subr.mxu0 %v186_v0  ;;  %151 = vmatprep.subr.mxu1 %v186_v0  ;;  %v39_v23 = vld [vmem:[%s335_s2] sm:$0xff]  ;;  %v134_v31 = vld [vmem:[%s336_s3 + $0x8] sm:$0xff] }
   0xa   :  { %67 = vmatpush1.msra.mxu0 %v32_v5  ;;  %169 = vmatpush1.msra.mxu1 %v32_v5  ;;  %v133_v29 = vld [vmem:[%s336_s3] sm:$0xff] }
   0xb   :  { %68 = vmatprep.subr.mxu0 %v186_v0  ;;  %152 = vmatprep.subr.mxu1 %v186_v0 }
   0xc   :  { %69 = vmatpush1.msra.mxu0 %v31_v6  ;;  %170 = vmatpush1.msra.mxu1 %v31_v6 }
   0xd   :  { %70 = vmatprep.subr.mxu0 %v186_v0  ;;  %153 = vmatprep.subr.mxu1 %v186_v0 }
   0xe   :  { %71 = vmatpush1.msra.mxu0 %v30_v7  ;;  %171 = vmatpush1.msra.mxu1 %v30_v7 }
   0xf   :  { %72 = vmatprep.subr.mxu0 %v186_v0  ;;  %154 = vmatprep.subr.mxu1 %v186_v0 }
  0x10   :  { %73 = vmatpush1.msra.mxu0 %v29_v8  ;;  %172 = vmatpush1.msra.mxu1 %v29_v8 }
  0x11   :  { %74 = vmatprep.subr.mxu0 %v186_v0  ;;  %155 = vmatprep.subr.mxu1 %v186_v0 }
  0x12   :  { %75 = vmatpush1.msra.mxu0 %v28_v9  ;;  %173 = vmatpush1.msra.mxu1 %v28_v9 }
  0x13   :  { %76 = vmatprep.subr.mxu0 %v186_v0  ;;  %156 = vmatprep.subr.mxu1 %v186_v0 }
  0x14   :  { %77 = vmatpush1.msra.mxu0 %v27_v10  ;;  %174 = vmatpush1.msra.mxu1 %v27_v10 }
  0x15   :  { %78 = vmatprep.subr.mxu0 %v186_v0  ;;  %157 = vmatprep.subr.mxu1 %v186_v0 }
  0x16   :  { %79 = vmatpush1.msra.mxu0 %v26_v11  ;;  %175 = vmatpush1.msra.mxu1 %v26_v11 }
  0x17   :  { %80 = vmatprep.subr.mxu0 %v186_v0  ;;  %158 = vmatprep.subr.mxu1 %v186_v0 }
  0x18   :  { %81 = vmatpush1.msra.mxu0 %v25_v12  ;;  %176 = vmatpush1.msra.mxu1 %v25_v12 }
  0x19   :  { %82 = vmatprep.subr.mxu0 %v186_v0  ;;  %159 = vmatprep.subr.mxu1 %v186_v0 }
  0x1a   :  { %83 = vmatpush1.msra.mxu0 %v24_v13  ;;  %177 = vmatpush1.msra.mxu1 %v24_v13 }
  0x1b   :  { %84 = vmatprep.subr.mxu0 %v186_v0  ;;  %160 = vmatprep.subr.mxu1 %v186_v0 }
  0x1c   :  { %85 = vmatpush1.msra.mxu0 %v23_v14  ;;  %178 = vmatpush1.msra.mxu1 %v23_v14 }
  0x1d   :  { %86 = vmatprep.subr.mxu0 %v186_v0  ;;  %161 = vmatprep.subr.mxu1 %v186_v0 }
  0x1e   :  { %87 = vmatpush1.msra.mxu0 %v22_v15  ;;  %179 = vmatpush1.msra.mxu1 %v22_v15 }
  0x1f   :  { %88 = vmatprep.subr.mxu0 %v186_v0  ;;  %162 = vmatprep.subr.mxu1 %v186_v0 }
  0x20   :  { %89 = vmatpush1.msra.mxu0 %v21_v16  ;;  %180 = vmatpush1.msra.mxu1 %v21_v16 }
  0x21   :  { %118 = vmatprep.subr.mxu0 %v186_v0  ;;  %163 = vmatprep.subr.mxu1 %v186_v0 }
  0x22   :  { %119 = vmatpush2.msra.mxu0 %v38_v17  ;;  %181 = vmatpush2.msra.mxu1 %v38_v17 }
  0x23   :  { %120 = vmatprep.subr.mxu0 %v186_v0  ;;  %164 = vmatprep.subr.mxu1 %v186_v0 }
  0x24   :  { %121 = vmatpush2.msra.mxu0 %v37_v18  ;;  %182 = vmatpush2.msra.mxu1 %v37_v18 }
  0x25   :  { %145 = vmatprep.mubr.msk.f32.mxu0 %vm51_vm0, %v18_v19  ;;  %146 = vmatprep.mubr.msk.f32.mxu1 %vm51_vm0, %v20_v20 }
  0x26   :  { %123 = vmatmul.mubr.f32.vlgmr.msra.gmra.mxu0 %v17_v21  ;;  %128 = vmatmul.mubr.f32.vlgmr.msra.gmra.mxu1 %v19_v22 }
  0x27   :  { %185 = vset.pattern.permute.xlu0 %v187_v24 }
  0x28   :  { %43 = vperm.xlu0 %185, %v39_v23  }
  0x2c   :  { %48 = vperm.xlu0 %185, %v40_v25  }
  0xa3   :  { %v44_v26 = vpop.permute.xlu0 %43 }
  0xa7   :  { %v49_v27 = vpop.permute.xlu0 %48 }
  0xe6   :  { %v124_v28 = vpop.f32.mrf.mxu0  ;;  %v129_v30 = vpop.f32.mrf.mxu1 }
  0xe7   :  { %v125_v32 = vadd.f32 %v124_v28, %v44_v26  ;;  %v130_v33 = vadd.f32 %v129_v30, %v49_v27 }
  0xe8   :  { %v126_v34 = vpop.f32.mrf.mxu0  ;;  %v131_v35 = vpop.f32.mrf.mxu1 }
  0xe9   :  { %v135_v36 = vadd.f32 %v133_v29, %v125_v32  ;;  %v136_v37 = vadd.f32 %v134_v31, %v130_v33 }
  0xeb   :  { %v137_v38 = vmax.f32 %v135_v36, 0.0  ;;  %v138_v39 = vmax.f32 %v136_v37, 0.0 }
  0xed   :  { %139 = vst [vmem:[%s337_s4] sm:$0xff] %v137_v38  ;;  %140 = vst [vmem:[%s337_s4 + $0x8] sm:$0xff] %v138_v39 }

// kernel: _lambda_.9
= control target key start
LH: loop header
LB: loop body
LE: loop exit
PB: predicated region body
PF: predicated region fallthrough
CT: control target
= control target key end

     0   :  { %v219_v0 = vmov 0.0   ;;  %vm64_vm0 = vcmask 130048   ;;  %v220_v29 = vmov 0   ;;  %vm166_vm1 = vcmask 261120   ;;  %s387_s1 = inlined_call_operand.vmem [shape: f32[144,32], index: 1, kind: input, shape index: {}]   ;;  %s388_s0 = inlined_call_operand.vmem [shape: f32[32,144], index: 0, kind: input, shape index: {}]   ;;  %s389_s2 = inlined_call_operand.vmem [shape: f32[32,1], index: 2, kind: input, shape index: {}]   ;;  %s390_s3 = inlined_call_operand.vmem [shape: f32[32,32], index: 3, kind: output, shape index: {}]  }
   0x1   :  { %77 = vmatprep.subr.mxu0 %v219_v0  ;;  %179 = vmatprep.subr.mxu1 %v219_v0  ;;  %v37_v1 = vld [vmem:[%s387_s1 + $0x78] sm:$0xff]  ;;  %v36_v2 = vld [vmem:[%s387_s1 + $0x70] sm:$0xff]  ;;  %v35_v3 = vld [vmem:[%s387_s1 + $0x68] sm:$0xff] }
   0x2   :  { %78 = vmatpush1.msra.mxu0 %v37_v1  ;;  %197 = vmatpush1.msra.mxu1 %v37_v1  ;;  %v34_v4 = vld [vmem:[%s387_s1 + $0x60] sm:$0xff]  ;;  %v33_v5 = vld [vmem:[%s387_s1 + $0x58] sm:$0xff]  ;;  %v32_v6 = vld [vmem:[%s387_s1 + $0x50] sm:$0xff] }
   0x3   :  { %79 = vmatprep.subr.mxu0 %v219_v0  ;;  %180 = vmatprep.subr.mxu1 %v219_v0  ;;  %v31_v7 = vld [vmem:[%s387_s1 + $0x48] sm:$0xff]  ;;  %v30_v8 = vld [vmem:[%s387_s1 + $0x40] sm:$0xff]  ;;  %v29_v9 = vld [vmem:[%s387_s1 + $0x38] sm:$0xff] }
   0x4   :  { %80 = vmatpush1.msra.mxu0 %v36_v2  ;;  %198 = vmatpush1.msra.mxu1 %v36_v2  ;;  %v28_v10 = vld [vmem:[%s387_s1 + $0x30] sm:$0xff]  ;;  %v27_v11 = vld [vmem:[%s387_s1 + $0x28] sm:$0xff]  ;;  %v26_v12 = vld [vmem:[%s387_s1 + $0x20] sm:$0xff] }
   0x5   :  { %81 = vmatprep.subr.mxu0 %v219_v0  ;;  %181 = vmatprep.subr.mxu1 %v219_v0  ;;  %v25_v13 = vld [vmem:[%s387_s1 + $0x18] sm:$0xff]  ;;  %v24_v14 = vld [vmem:[%s387_s1 + $0x10] sm:$0xff]  ;;  %v23_v15 = vld [vmem:[%s387_s1 + $0x8] sm:$0xff] }
   0x6   :  { %82 = vmatpush1.msra.mxu0 %v35_v3  ;;  %199 = vmatpush1.msra.mxu1 %v35_v3  ;;  %v22_v16 = vld [vmem:[%s387_s1] sm:$0xff]  ;;  %v39_v17 = vld [vmem:[%s387_s1 + $0x88] sm:$0xff]  ;;  %v17_v23 = vld [vmem:[%s388_s0 + $0x18] sm:$0xff] }
   0x7   :  { %83 = vmatprep.subr.mxu0 %v219_v0  ;;  %182 = vmatprep.subr.mxu1 %v219_v0  ;;  %v38_v18 = vld [vmem:[%s387_s1 + $0x80] sm:$0xff]  ;;  %v15_v19 = vld [vmem:[%s388_s0 + $0x8] sm:$0xff]  ;;  %v21_v24 = vld [vmem:[%s388_s0 + $0x38] sm:$0xff] }
   0x8   :  { %84 = vmatpush1.msra.mxu0 %v34_v4  ;;  %200 = vmatpush1.msra.mxu1 %v34_v4  ;;  %v19_v20 = vld [vmem:[%s388_s0 + $0x28] sm:$0xff]  ;;  %v14_v21 = vld [vmem:[%s388_s0] sm:$0xff]  ;;  %v42_v25 = vld [vmem:[%s389_s2 + $0x10] sm:$0xff] }
   0x9   :  { %85 = vmatprep.subr.mxu0 %v219_v0  ;;  %183 = vmatprep.subr.mxu1 %v219_v0  ;;  %v18_v22 = vld [vmem:[%s388_s0 + $0x20] sm:$0xff]  ;;  %v16_v27 = vld [vmem:[%s388_s0 + $0x10] sm:$0xff]  ;;  %v43_v30 = vld [vmem:[%s389_s2 + $0x18] sm:$0xff] }
   0xa   :  { %86 = vmatpush1.msra.mxu0 %v33_v5  ;;  %201 = vmatpush1.msra.mxu1 %v33_v5  ;;  %v40_v26 = vld [vmem:[%s389_s2] sm:$0xff]  ;;  %v20_v28 = vld [vmem:[%s388_s0 + $0x30] sm:$0xff]  ;;  %v41_v31 = vld [vmem:[%s389_s2 + $0x8] sm:$0xff] }
   0xb   :  { %87 = vmatprep.subr.mxu0 %v219_v0  ;;  %184 = vmatprep.subr.mxu1 %v219_v0 }
   0xc   :  { %88 = vmatpush1.msra.mxu0 %v32_v6  ;;  %202 = vmatpush1.msra.mxu1 %v32_v6 }
   0xd   :  { %89 = vmatprep.subr.mxu0 %v219_v0  ;;  %185 = vmatprep.subr.mxu1 %v219_v0 }
   0xe   :  { %90 = vmatpush1.msra.mxu0 %v31_v7  ;;  %203 = vmatpush1.msra.mxu1 %v31_v7 }
   0xf   :  { %91 = vmatprep.subr.mxu0 %v219_v0  ;;  %186 = vmatprep.subr.mxu1 %v219_v0 }
  0x10   :  { %92 = vmatpush1.msra.mxu0 %v30_v8  ;;  %204 = vmatpush1.msra.mxu1 %v30_v8 }
  0x11   :  { %93 = vmatprep.subr.mxu0 %v219_v0  ;;  %187 = vmatprep.subr.mxu1 %v219_v0 }
  0x12   :  { %94 = vmatpush1.msra.mxu0 %v29_v9  ;;  %205 = vmatpush1.msra.mxu1 %v29_v9 }
  0x13   :  { %95 = vmatprep.subr.mxu0 %v219_v0  ;;  %188 = vmatprep.subr.mxu1 %v219_v0 }
  0x14   :  { %96 = vmatpush1.msra.mxu0 %v28_v10  ;;  %206 = vmatpush1.msra.mxu1 %v28_v10 }
  0x15   :  { %97 = vmatprep.subr.mxu0 %v219_v0  ;;  %189 = vmatprep.subr.mxu1 %v219_v0 }
  0x16   :  { %98 = vmatpush1.msra.mxu0 %v27_v11  ;;  %207 = vmatpush1.msra.mxu1 %v27_v11 }
  0x17   :  { %99 = vmatprep.subr.mxu0 %v219_v0  ;;  %190 = vmatprep.subr.mxu1 %v219_v0 }
  0x18   :  { %100 = vmatpush1.msra.mxu0 %v26_v12  ;;  %208 = vmatpush1.msra.mxu1 %v26_v12 }
  0x19   :  { %101 = vmatprep.subr.mxu0 %v219_v0  ;;  %191 = vmatprep.subr.mxu1 %v219_v0 }
  0x1a   :  { %102 = vmatpush1.msra.mxu0 %v25_v13  ;;  %209 = vmatpush1.msra.mxu1 %v25_v13 }
  0x1b   :  { %103 = vmatprep.subr.mxu0 %v219_v0  ;;  %192 = vmatprep.subr.mxu1 %v219_v0 }
  0x1c   :  { %104 = vmatpush1.msra.mxu0 %v24_v14  ;;  %210 = vmatpush1.msra.mxu1 %v24_v14 }
  0x1d   :  { %105 = vmatprep.subr.mxu0 %v219_v0  ;;  %193 = vmatprep.subr.mxu1 %v219_v0 }
  0x1e   :  { %106 = vmatpush1.msra.mxu0 %v23_v15  ;;  %211 = vmatpush1.msra.mxu1 %v23_v15 }
  0x1f   :  { %107 = vmatprep.subr.mxu0 %v219_v0  ;;  %194 = vmatprep.subr.mxu1 %v219_v0 }
  0x20   :  { %108 = vmatpush1.msra.mxu0 %v22_v16  ;;  %212 = vmatpush1.msra.mxu1 %v22_v16 }
  0x21   :  { %137 = vmatprep.subr.mxu0 %v219_v0  ;;  %195 = vmatprep.subr.mxu1 %v219_v0 }
  0x22   :  { %138 = vmatpush2.msra.mxu0 %v39_v17  ;;  %213 = vmatpush2.msra.mxu1 %v39_v17 }
  0x23   :  { %139 = vmatprep.subr.mxu0 %v219_v0  ;;  %196 = vmatprep.subr.mxu1 %v219_v0 }
  0x24   :  { %140 = vmatpush2.msra.mxu0 %v38_v18  ;;  %214 = vmatpush2.msra.mxu1 %v38_v18 }
  0x25   :  { %175 = vmatprep.mubr.msk.f32.mxu0 %vm64_vm0, %v15_v19  ;;  %177 = vmatprep.mubr.msk.f32.mxu1 %vm64_vm0, %v19_v20 }
  0x26   :  { %142 = vmatmul.mubr.f32.vlgmr.msra.gmra.mxu0 %v14_v21  ;;  %152 = vmatmul.mubr.f32.vlgmr.msra.gmra.mxu1 %v18_v22 }
  0x27   :  { %176 = vmatprep.mubr.msk.f32.mxu0 %vm64_vm0, %v17_v23  ;;  %178 = vmatprep.mubr.msk.f32.mxu1 %vm64_vm0, %v21_v24 }
  0x28   :  { %218 = vset.pattern.permute.xlu1 %v220_v29  ;;  %217 = vset.pattern.permute.xlu0 %v220_v29 }
  0x29   :  { %56 = vperm.xlu1 %218, %v42_v25   ;;  %46 = vperm.xlu0 %217, %v40_v26  }
  0x2a   :  { %147 = vmatmul.mubr.f32.gmra.mxu0 %v16_v27  ;;  %157 = vmatmul.mubr.f32.gmra.mxu1 %v20_v28 }
  0x2d   :  { %61 = vperm.xlu1 %218, %v43_v30   ;;  %51 = vperm.xlu0 %217, %v41_v31  }
  0xa4   :  { %v57_v32 = vpop.permute.xlu1 %56  ;;  %v47_v33 = vpop.permute.xlu0 %46 }
  0xa8   :  { %v62_v40 = vpop.permute.xlu1 %61  ;;  %v52_v41 = vpop.permute.xlu0 %51 }
  0xe6   :  { %v143_v34 = vpop.f32.mrf.mxu0  ;;  %v153_v35 = vpop.f32.mrf.mxu1 }
  0xe7   :  { %v144_v36 = vadd.f32 %v143_v34, %v47_v33  ;;  %v154_v37 = vadd.f32 %v153_v35, %v57_v32 }
  0xe8   :  { %v145_v38 = vpop.f32.mrf.mxu0  ;;  %v155_v39 = vpop.f32.mrf.mxu1 }
  0xe9   :  { %v162_v42 = vmax.f32 %v144_v36, 0.0  ;;  %v164_v43 = vmax.f32 %v154_v37, 0.0 }
  0xea   :  { %v148_v44 = vpop.f32.mrf.mxu0  ;;  %v158_v45 = vpop.f32.mrf.mxu1 }
  0xeb   :  { %167 = vst.msk [vmem:[%s390_s3] sm:$0xff] %vm166_vm1, %v162_v42  ;;  %169 = vst.msk [vmem:[%s390_s3 + $0x10] sm:$0xff] %vm166_vm1, %v164_v43  ;;  %v149_v46 = vadd.f32 %v148_v44, %v52_v41  ;;  %v159_v47 = vadd.f32 %v158_v45, %v62_v40 }
  0xec   :  { %v150_v48 = vpop.f32.mrf.mxu0  ;;  %v160_v49 = vpop.f32.mrf.mxu1 }
  0xed   :  { %v163_v50 = vmax.f32 %v149_v46, 0.0  ;;  %v165_v51 = vmax.f32 %v159_v47, 0.0 }
  0xef   :  { %168 = vst.msk [vmem:[%s390_s3 + $0x8] sm:$0xff] %vm166_vm1, %v163_v50  ;;  %170 = vst.msk [vmem:[%s390_s3 + $0x18] sm:$0xff] %vm166_vm1, %v165_v51 }

// kernel: _lambda_.10
= control target key start
LH: loop header
LB: loop body
LE: loop exit
PB: predicated region body
PF: predicated region fallthrough
CT: control target
= control target key end

     0   :  { %v519_v3 = vmov 0   ;;  %vm95_vm0 = vcmask 261120   ;;  %vm284_vm1 = vcmask 130048   ;;  %s765_s1 = inlined_call_operand.vmem [shape: f32[288,32], index: 1, kind: input, shape index: {}]   ;;  %s766_s0 = inlined_call_operand.vmem [shape: f32[32,288], index: 0, kind: input, shape index: {}]   ;;  %s767_s4 = inlined_call_operand.vmem [shape: f32[16,32], index: 4, kind: input, shape index: {}]   ;;  %s768_s3 = inlined_call_operand.vmem [shape: f32[32,16], index: 3, kind: input, shape index: {}]   ;;  %s769_s2 = inlined_call_operand.vmem [shape: f32[32,1], index: 2, kind: input, shape index: {}]   ;;  %s770_s5 = inlined_call_operand.vmem [shape: f32[32,1], index: 5, kind: input, shape index: {}]   ;;  %s771_s6 = inlined_call_operand.vmem [shape: f32[32,32], index: 6, kind: output, shape index: {}]  }
   0x1   :  { %v66_v0 = vld [vmem:[%s765_s1 + $0xf8] sm:$0xff]  ;;  %v65_v2 = vld [vmem:[%s765_s1 + $0xf0] sm:$0xff]  ;;  %518 = vset.pattern.permute.xlu1 %v519_v3  ;;  %517 = vset.pattern.permute.xlu0 %v519_v3  ;;  %v64_v5 = vld [vmem:[%s765_s1 + $0xe8] sm:$0xff] }
   0x2   :  { %v50_v1 = vld [vmem:[%s765_s1 + $0x78] sm:$0xff]  ;;  %434 = vmatprep.subr.mxu0 %v66_v0  ;;  %v49_v4 = vld [vmem:[%s765_s1 + $0x70] sm:$0xff]  ;;  %v48_v6 = vld [vmem:[%s765_s1 + $0x68] sm:$0xff] }
   0x3   :  { %435 = vmatpush3.msra.mxu0 %v50_v1  ;;  %v63_v7 = vld [vmem:[%s765_s1 + $0xe0] sm:$0xff]  ;;  %v62_v9 = vld [vmem:[%s765_s1 + $0xd8] sm:$0xff]  ;;  %v61_v12 = vld [vmem:[%s765_s1 + $0xd0] sm:$0xff] }
   0x4   :  { %436 = vmatprep.subr.mxu0 %v65_v2  ;;  %v47_v8 = vld [vmem:[%s765_s1 + $0x60] sm:$0xff]  ;;  %v46_v10 = vld [vmem:[%s765_s1 + $0x58] sm:$0xff]  ;;  %v69_v13 = vld [vmem:[%s765_s1 + $0x110] sm:$0xff] }
   0x5   :  { %437 = vmatpush3.msra.mxu0 %v49_v4  ;;  %v70_v11 = vld [vmem:[%s765_s1 + $0x118] sm:$0xff]  ;;  %v45_v14 = vld [vmem:[%s765_s1 + $0x50] sm:$0xff]  ;;  %v68_v15 = vld [vmem:[%s765_s1 + $0x108] sm:$0xff] }
   0x6   :  { %438 = vmatprep.subr.mxu0 %v64_v5  ;;  %492 = vmatprep.subr.mxu1 %v70_v11  ;;  %v60_v16 = vld [vmem:[%s765_s1 + $0xc8] sm:$0xff]  ;;  %v67_v18 = vld [vmem:[%s765_s1 + $0x100] sm:$0xff]  ;;  %v25_v21 = vld [vmem:[%s766_s0 + $0x10] sm:$0xff] }
   0x7   :  { %439 = vmatpush3.msra.mxu0 %v48_v6  ;;  %493 = vmatpush3.msra.mxu1 %v70_v11  ;;  %v44_v17 = vld [vmem:[%s765_s1 + $0x48] sm:$0xff]  ;;  %v59_v19 = vld [vmem:[%s765_s1 + $0xc0] sm:$0xff]  ;;  %v58_v22 = vld [vmem:[%s765_s1 + $0xb8] sm:$0xff] }
   0x8   :  { %440 = vmatprep.subr.mxu0 %v63_v7  ;;  %494 = vmatprep.subr.mxu1 %v69_v13  ;;  %v43_v20 = vld [vmem:[%s765_s1 + $0x40] sm:$0xff]  ;;  %v28_v23 = vld [vmem:[%s766_s0 + $0x28] sm:$0xff]  ;;  %v42_v24 = vld [vmem:[%s765_s1 + $0x38] sm:$0xff] }
   0x9   :  { %441 = vmatpush3.msra.mxu0 %v47_v8  ;;  %495 = vmatpush3.msra.mxu1 %v69_v13  ;;  %v24_v25 = vld [vmem:[%s766_s0 + $0x8] sm:$0xff]  ;;  %v57_v26 = vld [vmem:[%s765_s1 + $0xb0] sm:$0xff]  ;;  %v31_v27 = vld [vmem:[%s766_s0 + $0x40] sm:$0xff] }
   0xa   :  { %442 = vmatprep.subr.mxu0 %v62_v9  ;;  %496 = vmatprep.subr.mxu1 %v68_v15  ;;  %v41_v28 = vld [vmem:[%s765_s1 + $0x30] sm:$0xff]  ;;  %v283_v29 = vld [vmem:[%s767_s4 + $0x8] sm:$0xff]  ;;  %v34_v31 = vld [vmem:[%s766_s0 + $0x58] sm:$0xff] }
   0xb   :  { %443 = vmatpush3.msra.mxu0 %v46_v10  ;;  %497 = vmatpush3.msra.mxu1 %v68_v15  ;;  %v56_v30 = vld [vmem:[%s765_s1 + $0xa8] sm:$0xff]  ;;  %v55_v33 = vld [vmem:[%s765_s1 + $0xa0] sm:$0xff]  ;;  %v54_v36 = vld [vmem:[%s765_s1 + $0x98] sm:$0xff] }
   0xc   :  { %444 = vmatprep.subr.mxu0 %v61_v12  ;;  %498 = vmatprep.subr.mxu1 %v67_v18  ;;  %v40_v32 = vld [vmem:[%s765_s1 + $0x28] sm:$0xff]  ;;  %v282_v34 = vld [vmem:[%s767_s4] sm:$0xff]  ;;  %v38_v38 = vld [vmem:[%s765_s1 + $0x18] sm:$0xff] }
   0xd   :  { %445 = vmatpush3.msra.mxu0 %v45_v14  ;;  %499 = vmatpush3.msra.mxu1 %v67_v18  ;;  %v39_v35 = vld [vmem:[%s765_s1 + $0x20] sm:$0xff]  ;;  %v279_v39 = vld [vmem:[%s768_s3 + $0x8] sm:$0xff]  ;;  %v53_v40 = vld [vmem:[%s765_s1 + $0x90] sm:$0xff] }
   0xe   :  { %446 = vmatprep.subr.mxu0 %v60_v16  ;;  %500 = vmatprep.mubr.msk.f32.mxu1 %vm95_vm0, %v25_v21  ;;  %v278_v37 = vld [vmem:[%s768_s3] sm:$0xff]  ;;  %v280_v41 = vld [vmem:[%s768_s3 + $0x10] sm:$0xff]  ;;  %v52_v44 = vld [vmem:[%s765_s1 + $0x88] sm:$0xff] }
   0xf   :  { %447 = vmatpush3.msra.mxu0 %v44_v17  ;;  %501 = vmatmul.mubr.msk.f32.vlgmr.msra.gmra.mxu1 %vm95_vm0, %v28_v23  ;;  %v37_v42 = vld [vmem:[%s765_s1 + $0x10] sm:$0xff]  ;;  %v71_v45 = vld [vmem:[%s769_s2] sm:$0xff]  ;;  %v36_v46 = vld [vmem:[%s765_s1 + $0x8] sm:$0xff] }
  0x10   :  { %448 = vmatprep.subr.mxu0 %v59_v19  ;;  %172 = vmatprep.mubr.f32.mxu0 %v24_v25  ;;  %v73_v43 = vld [vmem:[%s769_s2 + $0x10] sm:$0xff]  ;;  %v281_v47 = vld [vmem:[%s768_s3 + $0x18] sm:$0xff]  ;;  %v51_v48 = vld [vmem:[%s765_s1 + $0x80] sm:$0xff] }
  0x11   :  { %449 = vmatpush3.msra.mxu0 %v43_v20  ;;  %503 = vmatprep.mubr.msk.f32.mxu1 %vm95_vm0, %v31_v27  ;;  %v35_v49 = vld [vmem:[%s765_s1] sm:$0xff]  ;;  %v74_v50 = vld [vmem:[%s769_s2 + $0x18] sm:$0xff]  ;;  %v72_v52 = vld [vmem:[%s769_s2 + $0x8] sm:$0xff] }
  0x12   :  { %450 = vmatprep.subr.mxu0 %v58_v22  ;;  %506 = vmatprep.subr.mxu1 %v283_v29  ;;  %v23_v51 = vld [vmem:[%s766_s0] sm:$0xff]  ;;  %v387_v54 = vld [vmem:[%s770_s5 + $0x8] sm:$0xff]  ;;  %v26_v55 = vld [vmem:[%s766_s0 + $0x18] sm:$0xff] }
  0x13   :  { %451 = vmatpush3.msra.mxu0 %v42_v24  ;;  %504 = vmatmul.mubr.msk.f32.gmra.mxu1 %vm95_vm0, %v34_v31  ;;  %v27_v53 = vld [vmem:[%s766_s0 + $0x20] sm:$0xff]  ;;  %v30_v57 = vld [vmem:[%s766_s0 + $0x38] sm:$0xff]  ;;  %v29_v59 = vld [vmem:[%s766_s0 + $0x30] sm:$0xff] }
  0x14   :  { %452 = vmatprep.subr.mxu0 %v57_v26  ;;  %507 = vmatpush3.msra.mxu1 %v283_v29  ;;  %v386_v56 = vld [vmem:[%s770_s5] sm:$0xff]  ;;  %v389_v58 = vld [vmem:[%s770_s5 + $0x18] sm:$0xff]  ;;  %v388_v60 = vld [vmem:[%s770_s5 + $0x10] sm:$0xff] }
  0x15   :  { %453 = vmatpush3.msra.mxu0 %v41_v28  ;;  %508 = vmatprep.subr.mxu1 %v282_v34  ;;  %v33_v61 = vld [vmem:[%s766_s0 + $0x50] sm:$0xff]  ;;  %v32_v62 = vld [vmem:[%s766_s0 + $0x48] sm:$0xff] }
  0x16   :  { %454 = vmatprep.subr.mxu0 %v56_v30  ;;  %509 = vmatpush3.msra.mxu1 %v282_v34 }
  0x17   :  { %455 = vmatpush3.msra.mxu0 %v40_v32  ;;  %510 = vmatprep.mubr.msk.f32.mxu1 %vm284_vm1, %v278_v37 }
  0x18   :  { %456 = vmatprep.subr.mxu0 %v55_v33  ;;  %511 = vmatmul.mubr.msk.f32.vlgmr.msra.gmra.mxu1 %vm284_vm1, %v279_v39 }
  0x19   :  { %457 = vmatpush3.msra.mxu0 %v39_v35  ;;  %513 = vmatprep.mubr.msk.f32.mxu1 %vm284_vm1, %v280_v41 }
  0x1a   :  { %458 = vmatprep.subr.mxu0 %v54_v36  ;;  %87 = vperm.xlu1 %518, %v73_v43  }
  0x1b   :  { %459 = vmatpush3.msra.mxu0 %v38_v38  ;;  %77 = vperm.xlu0 %517, %v71_v45  }
  0x1c   :  { %460 = vmatprep.subr.mxu0 %v53_v40  ;;  %514 = vmatmul.mubr.msk.f32.gmra.mxu1 %vm284_vm1, %v281_v47 }
  0x1d   :  { %461 = vmatpush3.msra.mxu0 %v37_v42 }
  0x1e   :  { %462 = vmatprep.subr.mxu0 %v52_v44  ;;  %92 = vperm.xlu1 %518, %v74_v50  }
  0x1f   :  { %463 = vmatpush3.msra.mxu0 %v36_v46  ;;  %82 = vperm.xlu0 %517, %v72_v52  }
  0x20   :  { %464 = vmatprep.subr.mxu0 %v51_v48 }
  0x21   :  { %465 = vmatpush3.msra.mxu0 %v35_v49 }
  0x22   :  { %173 = vmatmul.mubr.f32.vlgmr.msra.gmra.mxu0 %v23_v51  ;;  %397 = vperm.xlu1 %518, %v387_v54  }
  0x23   :  { %177 = vmatprep.mubr.f32.mxu0 %v27_v53  ;;  %392 = vperm.xlu0 %517, %v386_v56  }
  0x26   :  { %178 = vmatmul.mubr.f32.gmra.mxu0 %v26_v55  ;;  %407 = vperm.xlu1 %518, %v389_v58  }
  0x27   :  { %182 = vmatprep.mubr.f32.mxu0 %v30_v57  ;;  %402 = vperm.xlu0 %517, %v388_v60  }
  0x2a   :  { %183 = vmatmul.mubr.f32.gmra.mxu0 %v29_v59 }
  0x2b   :  { %187 = vmatprep.mubr.f32.mxu0 %v33_v61 }
  0x2e   :  { %188 = vmatmul.mubr.f32.gmra.mxu0 %v32_v62 }
  0x95   :  { %v88_v5 = vpop.permute.xlu1 %87 }
  0x96   :  { %v78_v2 = vpop.permute.xlu0 %77 }
  0x99   :  { %v93_v14 = vpop.permute.xlu1 %92 }
  0x9a   :  { %v83_v8 = vpop.permute.xlu0 %82 }
  0x9d   :  { %v398_v27 = vpop.permute.xlu1 %397 }
  0x9e   :  { %v393_v18 = vpop.permute.xlu0 %392 }
  0xa1   :  { %v408_v44 = vpop.permute.xlu1 %407 }
  0xa2   :  { %v403_v39 = vpop.permute.xlu0 %402 }
  0xcf   :  { %v502_v63 = vpop.f32.mrf.mxu1 }
  0xd1   :  { %v259_v0 = vpop.f32.mrf.mxu1 }
  0xd3   :  { %v505_v1 = vpop.f32.mrf.mxu1 }
  0xd5   :  { %v269_v3 = vpop.f32.mrf.mxu1 }
  0xd8   :  { %v512_v7 = vpop.f32.mrf.mxu1 }
  0xda   :  { %v363_v13 = vpop.f32.mrf.mxu1 }
  0xdc   :  { %v515_v22 = vpop.f32.mrf.mxu1 }
  0xde   :  { %v373_v32 = vpop.f32.mrf.mxu1 }
  0xe2   :  { %v466_v4 = vpop.f32.mrf.mxu0 }
  0xe4   :  { %v467_v6 = vpop.f32.mrf.mxu0 }
  0xe5   :  { %v468_v9 = vadd.f32 %v467_v6, %v466_v4 }
  0xe6   :  { %v469_v10 = vpop.f32.mrf.mxu0 }
  0xe7   :  { %v175_v11 = vadd.f32 %v468_v9, %v78_v2 }
  0xe8   :  { %v470_v12 = vpop.f32.mrf.mxu0 }
  0xe9   :  { %v471_v15 = vadd.f32 %v470_v12, %v469_v10  ;;  %v260_v16 = vadd.f32 %v259_v0, %v175_v11 }
  0xea   :  { %v472_v17 = vpop.f32.mrf.mxu0 }
  0xeb   :  { %v180_v19 = vadd.f32 %v471_v15, %v83_v8  ;;  %v382_v20 = vadd.f32 %v363_v13, %v260_v16 }
  0xec   :  { %v473_v21 = vpop.f32.mrf.mxu0 }
  0xed   :  { %v265_v23 = vadd.f32 %v502_v63, %v180_v19  ;;  %v410_v24 = vadd.f32 %v393_v18, %v382_v20  ;;  %v474_v25 = vadd.f32 %v473_v21, %v472_v17 }
  0xee   :  { %v475_v26 = vpop.f32.mrf.mxu0 }
  0xef   :  { %v383_v28 = vadd.f32 %v512_v7, %v265_v23  ;;  %v414_v29 = vmax.f32 %v410_v24, 0.0  ;;  %v185_v30 = vadd.f32 %v474_v25, %v88_v5 }
  0xf0   :  { %v476_v31 = vpop.f32.mrf.mxu0 }
  0xf1   :  { %v411_v33 = vadd.f32 %v398_v27, %v383_v28  ;;  %418 = vst.msk [vmem:[%s771_s6] sm:$0xff] %vm95_vm0, %v414_v29  ;;  %v477_v34 = vadd.f32 %v476_v31, %v475_v26  ;;  %v270_v35 = vadd.f32 %v269_v3, %v185_v30 }
  0xf3   :  { %v415_v36 = vmax.f32 %v411_v33, 0.0  ;;  %v190_v37 = vadd.f32 %v477_v34, %v93_v14  ;;  %v384_v38 = vadd.f32 %v373_v32, %v270_v35 }
  0xf5   :  { %419 = vst.msk [vmem:[%s771_s6 + $0x8] sm:$0xff] %vm95_vm0, %v415_v36  ;;  %v275_v40 = vadd.f32 %v505_v1, %v190_v37  ;;  %v412_v41 = vadd.f32 %v403_v39, %v384_v38 }
  0xf7   :  { %v385_v42 = vadd.f32 %v515_v22, %v275_v40  ;;  %v416_v43 = vmax.f32 %v412_v41, 0.0 }
  0xf9   :  { %v413_v45 = vadd.f32 %v408_v44, %v385_v42  ;;  %420 = vst.msk [vmem:[%s771_s6 + $0x10] sm:$0xff] %vm95_vm0, %v416_v43 }
  0xfb   :  { %v417_v46 = vmax.f32 %v413_v45, 0.0 }
  0xfd   :  { %421 = vst.msk [vmem:[%s771_s6 + $0x18] sm:$0xff] %vm95_vm0, %v417_v46 }

// kernel: _lambda_.11
= control target key start
LH: loop header
LB: loop body
LE: loop exit
PB: predicated region body
PF: predicated region fallthrough
CT: control target
= control target key end

     0   :  { %s4600_s0 = inlined_call_operand.vmem [shape: f32[32,8,4], index: 0, kind: input, shape index: {}]   ;;  %s4601_s1 = inlined_call_operand.vmem [shape: f32[32,32], index: 1, kind: input, shape index: {}]   ;;  %s4602_s2 = inlined_call_operand.vmem [shape: f32[1,32], index: 2, kind: input, shape index: {}]   ;;  %s4603_s3 = inlined_call_operand.vmem [shape: f32[8,32], index: 3, kind: input, shape index: {}]   ;;  %s4604_s4 = inlined_call_operand.vmem [shape: f32[1,32], index: 4, kind: input, shape index: {}]   ;;  %s4605_s5 = inlined_call_operand.vmem [shape: f32[1,32], index: 5, kind: input, shape index: {}]   ;;  %s4606_s6 = inlined_call_operand.vmem [shape: f32[2,32,96], index: 6, kind: input, shape index: {}]   ;;  %s4607_s7 = inlined_call_operand.vmem [shape: f32[2,1,96], index: 7, kind: input, shape index: {}]   ;;  %s4608_s8 = inlined_call_operand.vmem [shape: f32[2,4,8,32], index: 8, kind: input, shape index: {}]   ;;  %s4609_s9 = inlined_call_operand.vmem [shape: f32[2,1,32], index: 9, kind: input, shape index: {}]   ;;  %s4610_s10 = inlined_call_operand.vmem [shape: f32[2,1,32], index: 10, kind: input, shape index: {}]   ;;  %s4611_s11 = inlined_call_operand.vmem [shape: f32[2,1,32], index: 11, kind: input, shape index: {}]   ;;  %s4612_s12 = inlined_call_operand.vmem [shape: f32[2,32,64], index: 12, kind: input, shape index: {}]   ;;  %s4613_s13 = inlined_call_operand.vmem [shape: f32[2,1,64], index: 13, kind: input, shape index: {}]   ;;  %s4614_s14 = inlined_call_operand.vmem [shape: f32[2,64,32], index: 14, kind: input, shape index: {}]   ;;  %s4615_s15 = inlined_call_operand.vmem [shape: f32[2,1,32], index: 15, kind: input, shape index: {}]   ;;  %s4616_s16 = inlined_call_operand.vmem [shape: f32[2,1,32], index: 16, kind: input, shape index: {}]   ;;  %s4617_s17 = inlined_call_operand.vmem [shape: f32[2,1,32], index: 17, kind: input, shape index: {}]   ;;  %s4618_s18 = inlined_call_operand.vmem [shape: f32[32,6], index: 18, kind: input, shape index: {}]   ;;  %s4619_s19 = inlined_call_operand.vmem [shape: f32[1,6], index: 19, kind: input, shape index: {}]   ;;  %s4620_s20 = inlined_call_operand.vmem [shape: f32[8,6], index: 20, kind: input, shape index: {}]   ;;  %s4621_s21 = inlined_call_operand.hbm [shape: f32[8,6], index: 21, kind: output, shape index: {0}]   ;;  %s4622_s22 = inlined_call_operand.hbm [shape: f32[4,8,8], index: 22, kind: output, shape index: {1}]  }
   0x1   :  { %4626 = sst [smem:[#allocation8_spill]] %s4600_s0 }
   0x2   :  { %4627 = sst [smem:[#allocation9_spill]] %s4601_s1 }
   0x3   :  { %4628 = sst [smem:[#allocation10_spill]] %s4602_s2 }
   0x4   :  { %4629 = sst [smem:[#allocation11_spill]] %s4603_s3 }
   0x5   :  { %4630 = sst [smem:[#allocation12_spill]] %s4604_s4 }
   0x6   :  { %4631 = sst [smem:[#allocation13_spill]] %s4605_s5 }
   0x7   :  { %4632 = sst [smem:[#allocation14_spill]] %s4606_s6 }
   0x8   :  { %28 = vsyncpa [#allocation3], 0  ;;  %s4633_s29 = sld [smem:[#allocation8_spill]]  ;;  %vm104_vm0 = vcmask 31744  }
   0xe   :  { %v74_v0 = vld [vmem:[%s4633_s29 + $0x10] sm:$0xff]  ;;  %v72_v1 = vld [vmem:[%s4633_s29] sm:$0xff]  ;;  %v75_v2 = vld [vmem:[%s4633_s29 + $0x18] sm:$0xff] }
   0xf   :  { %v111_v3 = vsel %vm104_vm0, %v74_v0, 0.0  ;;  %v105_v4 = vsel %vm104_vm0, %v72_v1, 0.0  ;;  %v73_v5 = vld [vmem:[%s4633_s29 + $0x8] sm:$0xff]  ;;  %v114_v6 = vsel %vm104_vm0, %v75_v2, 0.0  ;;  %v80_v9 = vld [vmem:[%s4633_s29 + $0x40] sm:$0xff]  ;;  %v82_v12 = vld [vmem:[%s4633_s29 + $0x50] sm:$0xff] }
  0x10   :  { %112 = vadd.xlane.f32.xlu1 %v111_v3  ;;  %106 = vadd.xlane.f32.xlu0 %v105_v4  ;;  %v108_v7 = vsel %vm104_vm0, %v73_v5, 0.0  ;;  %v81_v8 = vld [vmem:[%s4633_s29 + $0x48] sm:$0xff]  ;;  %v129_v11 = vsel %vm104_vm0, %v80_v9, 0.0  ;;  %v76_v13 = vld [vmem:[%s4633_s29 + $0x20] sm:$0xff]  ;;  %v135_v14 = vsel %vm104_vm0, %v82_v12, 0.0 }
  0x11   :  { %v132_v10 = vsel %vm104_vm0, %v81_v8, 0.0  ;;  %v117_v15 = vsel %vm104_vm0, %v76_v13, 0.0 }
  0x14   :  { %115 = vadd.xlane.f32.xlu1 %v114_v6  ;;  %109 = vadd.xlane.f32.xlu0 %v108_v7 }
  0x18   :  { %133 = vadd.xlane.f32.xlu1 %v132_v10  ;;  %130 = vadd.xlane.f32.xlu0 %v129_v11 }
  0x19   :  { %29 = vsyncpa [#allocation5], 0  ;;  %v83_v16 = vld [vmem:[%s4633_s29 + $0x58] sm:$0xff]  ;;  %v77_v17 = vld [vmem:[%s4633_s29 + $0x28] sm:$0xff]  ;;  %s4634_s25 = sld [smem:[#allocation9_spill]]  ;;  %v3807_v1 = vmov 0.0   ;;  %v277_v11 = vlaneseq }
  0x1a   :  { %v138_v18 = vsel %vm104_vm0, %v83_v16, 0.0  ;;  %v120_v19 = vsel %vm104_vm0, %v77_v17, 0.0  ;;  %v89_v20 = vld [vmem:[%s4633_s29 + $0x88] sm:$0xff]  ;;  %v88_v21 = vld [vmem:[%s4633_s29 + $0x80] sm:$0xff]  ;;  %v78_v25 = vld [vmem:[%s4633_s29 + $0x30] sm:$0xff]  ;;  %3486 = vmatprep.subr.mxu0 %v3807_v1  ;;  %vm3808_vm1 = vmmov 0   ;;  %3497 = vmatprep.subr.mxu1 %v3807_v1 }
  0x1b   :  { %v156_v22 = vsel %vm104_vm0, %v89_v20, 0.0  ;;  %v153_v23 = vsel %vm104_vm0, %v88_v21, 0.0  ;;  %v84_v24 = vld [vmem:[%s4633_s29 + $0x60] sm:$0xff]  ;;  %v123_v27 = vsel %vm104_vm0, %v78_v25, 0.0  ;;  %v79_v28 = vld [vmem:[%s4633_s29 + $0x38] sm:$0xff]  ;;  %v90_v29 = vld [vmem:[%s4633_s29 + $0x90] sm:$0xff]  ;;  %3494 = vmatprep.mubr.msk.f32.mxu0 %vm3808_vm1, %v3807_v1  ;;  %3505 = vmatprep.mubr.msk.f32.mxu1 %vm3808_vm1, %v3807_v1 }
  0x1c   :  { %136 = vadd.xlane.f32.xlu1 %v135_v14  ;;  %118 = vadd.xlane.f32.xlu0 %v117_v15  ;;  %v141_v26 = vsel %vm104_vm0, %v84_v24, 0.0  ;;  %v126_v30 = vsel %vm104_vm0, %v79_v28, 0.0  ;;  %v159_v31 = vsel %vm104_vm0, %v90_v29, 0.0  ;;  %v91_v32 = vld [vmem:[%s4633_s29 + $0x98] sm:$0xff]  ;;  %v85_v33 = vld [vmem:[%s4633_s29 + $0x68] sm:$0xff]  ;;  %v96_v37 = vld [vmem:[%s4633_s29 + $0xc0] sm:$0xff] }
  0x1d   :  { %v162_v34 = vsel %vm104_vm0, %v91_v32, 0.0  ;;  %v144_v35 = vsel %vm104_vm0, %v85_v33, 0.0  ;;  %v97_v36 = vld [vmem:[%s4633_s29 + $0xc8] sm:$0xff]  ;;  %v177_v39 = vsel %vm104_vm0, %v96_v37, 0.0  ;;  %v92_v40 = vld [vmem:[%s4633_s29 + $0xa0] sm:$0xff]  ;;  %v86_v41 = vld [vmem:[%s4633_s29 + $0x70] sm:$0xff] }
  0x1e   :  { %v180_v38 = vsel %vm104_vm0, %v97_v36, 0.0  ;;  %v165_v42 = vsel %vm104_vm0, %v92_v40, 0.0  ;;  %v147_v43 = vsel %vm104_vm0, %v86_v41, 0.0  ;;  %v87_v44 = vld [vmem:[%s4633_s29 + $0x78] sm:$0xff]  ;;  %v98_v45 = vld [vmem:[%s4633_s29 + $0xd0] sm:$0xff]  ;;  %v93_v49 = vld [vmem:[%s4633_s29 + $0xa8] sm:$0xff] }
  0x1f   :  { %v150_v46 = vsel %vm104_vm0, %v87_v44, 0.0  ;;  %v183_v47 = vsel %vm104_vm0, %v98_v45, 0.0  ;;  %v99_v48 = vld [vmem:[%s4633_s29 + $0xd8] sm:$0xff]  ;;  %v168_v51 = vsel %vm104_vm0, %v93_v49, 0.0  ;;  %v100_v52 = vld [vmem:[%s4633_s29 + $0xe0] sm:$0xff]  ;;  %v94_v53 = vld [vmem:[%s4633_s29 + $0xb0] sm:$0xff] }
  0x20   :  { %139 = vadd.xlane.f32.xlu1 %v138_v18  ;;  %121 = vadd.xlane.f32.xlu0 %v120_v19  ;;  %v186_v50 = vsel %vm104_vm0, %v99_v48, 0.0  ;;  %v189_v54 = vsel %vm104_vm0, %v100_v52, 0.0  ;;  %v171_v55 = vsel %vm104_vm0, %v94_v53, 0.0  ;;  %v101_v56 = vld [vmem:[%s4633_s29 + $0xe8] sm:$0xff]  ;;  %v95_v57 = vld [vmem:[%s4633_s29 + $0xb8] sm:$0xff]  ;;  %v102_v60 = vld [vmem:[%s4633_s29 + $0xf0] sm:$0xff] }
  0x21   :  { %v192_v58 = vsel %vm104_vm0, %v101_v56, 0.0  ;;  %v174_v59 = vsel %vm104_vm0, %v95_v57, 0.0  ;;  %v103_v61 = vld [vmem:[%s4633_s29 + $0xf8] sm:$0xff]  ;;  %v195_v62 = vsel %vm104_vm0, %v102_v60, 0.0  ;;  %v236_v2 = vld [vmem:[%s4634_s25 + $0x10] sm:$0xff]  ;;  %v235_v3 = vld [vmem:[%s4634_s25 + $0x8] sm:$0xff] }
  0x22   :  { %v198_v63 = vsel %vm104_vm0, %v103_v61, 0.0  ;;  %v237_v0 = vld [vmem:[%s4634_s25 + $0x18] sm:$0xff]  ;;  %v234_v4 = vld [vmem:[%s4634_s25] sm:$0xff]  ;;  %v278_v14 = vand.u32 127, %v277_v11  ;;  %v280_v15 = vshrl.u32 %v277_v11, 7  ;;  %vm407_vm2 = vcmask 1041409  }
  0x23   :  { %3487 = vmatpush3.msra.mxu0 %v237_v0  ;;  %vm409_vm3 = vcmask 1042434   ;;  %vm411_vm4 = vcmask 1043459   ;;  %vm413_vm5 = vcmask 1044484   ;;  %vm415_vm6 = vcmask 1045509   ;;  %s4635_s0 = sld [smem:[#allocation10_spill]]  ;;  %s3809_s26 = smov 120  }
  0x24   :  { %157 = vadd.xlane.f32.xlu1 %v156_v22  ;;  %154 = vadd.xlane.f32.xlu0 %v153_v23  ;;  %v4083_v19 = vsub.s32 %v278_v14, %v280_v15  ;;  %vm417_vm7 = vcmask 1046534   ;;  %vm419_vm8 = vcmask 1047559   ;;  %vm478_vm9 = vcmask 261120   ;;  %s4636_s5 = sld [smem:[#allocation11_spill]]  ;;  %s3810_s2 = smov 112  }
  0x25   :  { %3488 = vmatprep.subr.mxu0 %v3807_v1  ;;  %s4637_s25 = sld [smem:[#allocation14_spill]]  ;;  %s3811_s29 = smov 104   ;;  %vm677_vm10 = vcmask 64512   ;;  %vm1773_vm11 = vcmask 523264  }
  0x26   :  { %3489 = vmatpush3.msra.mxu0 %v236_v2  ;;  %s3812_s27 = smov 96   ;;  %s3813_s3 = smov 64  }
  0x27   :  { %3490 = vmatprep.subr.mxu0 %v3807_v1 }
  0x28   :  { %142 = vadd.xlane.f32.xlu1 %v141_v26  ;;  %124 = vadd.xlane.f32.xlu0 %v123_v27 }
  0x29   :  { %3491 = vmatpush3.msra.mxu0 %v235_v3 }
  0x2a   :  { %3492 = vmatprep.subr.mxu0 %v3807_v1 }
  0x2b   :  { %3493 = vmatpush3.msra.mxu0 %v234_v4 }
  0x2c   :  { %127 = vadd.xlane.f32.xlu1 %v126_v30  ;;  %160 = vadd.xlane.f32.xlu0 %v159_v31 }
  0x2d   :  { %3508 = vmatprep.subr.mxu0 %v3807_v1 }
  0x30   :  { %163 = vadd.xlane.f32.xlu1 %v162_v34  ;;  %145 = vadd.xlane.f32.xlu0 %v144_v35 }
  0x34   :  { %181 = vadd.xlane.f32.xlu1 %v180_v38  ;;  %178 = vadd.xlane.f32.xlu0 %v177_v39 }
  0x38   :  { %166 = vadd.xlane.f32.xlu1 %v165_v42  ;;  %148 = vadd.xlane.f32.xlu0 %v147_v43 }
  0x3c   :  { %151 = vadd.xlane.f32.xlu1 %v150_v46  ;;  %184 = vadd.xlane.f32.xlu0 %v183_v47 }
  0x40   :  { %187 = vadd.xlane.f32.xlu1 %v186_v50  ;;  %169 = vadd.xlane.f32.xlu0 %v168_v51 }
  0x44   :  { %190 = vadd.xlane.f32.xlu1 %v189_v54  ;;  %172 = vadd.xlane.f32.xlu0 %v171_v55 }
  0x48   :  { %193 = vadd.xlane.f32.xlu1 %v192_v58  ;;  %175 = vadd.xlane.f32.xlu0 %v174_v59 }
  0x4c   :  { %196 = vadd.xlane.f32.xlu0 %v195_v62  ;;  %199 = vadd.xlane.f32.xlu1 %v198_v63 }
  0x99   :  { %v113_v5 = vpop.xlane.xlu1 %112  ;;  %v107_v6 = vpop.xlane.xlu0 %106 }
  0x9a   :  { %v202_v20 = vmul.f32 0.25, %v107_v6  ;;  %v204_v22 = vmul.f32 0.25, %v113_v5 }
  0x9c   :  { %v282_v25 = vrot.slane %v202_v20, %v4083_v19  ;;  %v290_v30 = vrot.slane %v204_v22, %v4083_v19 }
  0x9d   :  { %v116_v7 = vpop.xlane.xlu1 %115  ;;  %v110_v8 = vpop.xlane.xlu0 %109 }
  0x9e   :  { %v203_v16 = vmul.f32 0.25, %v110_v8  ;;  %v205_v26 = vmul.f32 0.25, %v116_v7 }
  0xa0   :  { %v286_v21 = vrot.slane %v203_v16, %v4083_v19  ;;  %v294_v33 = vrot.slane %v205_v26, %v4083_v19 }
  0xa1   :  { %v134_v9 = vpop.xlane.xlu1 %133  ;;  %v131_v10 = vpop.xlane.xlu0 %130 }
  0xa2   :  { %v408_v28 = vsel %vm407_vm2, %v286_v21, %v282_v25  ;;  %v211_v50 = vmul.f32 0.25, %v134_v9  ;;  %v210_v51 = vmul.f32 0.25, %v131_v10 }
  0xa3   :  { %v410_v35 = vsel %vm409_vm3, %v290_v30, %v408_v28 }
  0xa4   :  { %v412_v41 = vsel %vm411_vm4, %v294_v33, %v410_v35  ;;  %v318_v57 = vrot.slane %v211_v50, %v4083_v19  ;;  %v314_v58 = vrot.slane %v210_v51, %v4083_v19 }
  0xa5   :  { %v137_v12 = vpop.xlane.xlu1 %136  ;;  %v119_v13 = vpop.xlane.xlu0 %118 }
  0xa6   :  { %v206_v27 = vmul.f32 0.25, %v119_v13  ;;  %v212_v52 = vmul.f32 0.25, %v137_v12  ;;  %v421_v3 = vsel %vm407_vm2, %v318_v57, %v314_v58 }
  0xa8   :  { %v298_v36 = vrot.slane %v206_v27, %v4083_v19  ;;  %v322_v60 = vrot.slane %v212_v52, %v4083_v19 }
  0xa9   :  { %v140_v17 = vpop.xlane.xlu1 %139  ;;  %v122_v18 = vpop.xlane.xlu0 %121 }
  0xaa   :  { %v207_v29 = vmul.f32 0.25, %v122_v18  ;;  %v414_v43 = vsel %vm413_vm5, %v298_v36, %v412_v41  ;;  %v213_v55 = vmul.f32 0.25, %v140_v17  ;;  %v422_v5 = vsel %vm409_vm3, %v322_v60, %v421_v3 }
  0xac   :  { %v302_v37 = vrot.slane %v207_v29, %v4083_v19  ;;  %v326_v63 = vrot.slane %v213_v55, %v4083_v19 }
  0xad   :  { %v158_v23 = vpop.xlane.xlu1 %157  ;;  %v155_v24 = vpop.xlane.xlu0 %154 }
  0xae   :  { %v416_v45 = vsel %vm415_vm6, %v302_v37, %v414_v43  ;;  %v423_v9 = vsel %vm411_vm4, %v326_v63, %v422_v5  ;;  %v219_v12 = vmul.f32 0.25, %v158_v23  ;;  %v218_v13 = vmul.f32 0.25, %v155_v24 }
  0xb0   :  { %v350_v26 = vrot.slane %v219_v12, %v4083_v19  ;;  %v346_v27 = vrot.slane %v218_v13, %v4083_v19 }
  0xb1   :  { %v143_v31 = vpop.xlane.xlu1 %142  ;;  %v125_v32 = vpop.xlane.xlu0 %124 }
  0xb2   :  { %v208_v34 = vmul.f32 0.25, %v125_v32  ;;  %v214_v56 = vmul.f32 0.25, %v143_v31  ;;  %v428_v37 = vsel %vm407_vm2, %v350_v26, %v346_v27  ;;  %v584_v26 = vld [vmem:[%s4637_s25] sm:$0xff] }
  0xb4   :  { %v306_v38 = vrot.slane %v208_v34, %v4083_v19  ;;  %v330_v2 = vrot.slane %v214_v56, %v4083_v19 }
  0xb5   :  { %v128_v39 = vpop.xlane.xlu1 %127  ;;  %v161_v40 = vpop.xlane.xlu0 %160 }
  0xb6   :  { %v209_v42 = vmul.f32 0.25, %v128_v39  ;;  %v418_v48 = vsel %vm417_vm7, %v306_v38, %v416_v45  ;;  %v424_v11 = vsel %vm413_vm5, %v330_v2, %v423_v9  ;;  %v220_v16 = vmul.f32 0.25, %v161_v40  ;;  %v3302_v9 = vld [vmem:[%s4635_s0] ss:$0 sm:$0xff]  ;;  %s4638_s0 = sld [smem:[#allocation12_spill]] }
  0xb8   :  { %v310_v44 = vrot.slane %v209_v42, %v4083_v19  ;;  %v354_v24 = vrot.slane %v220_v16, %v4083_v19 }
  0xb9   :  { %v164_v46 = vpop.xlane.xlu1 %163  ;;  %v146_v47 = vpop.xlane.xlu0 %145 }
  0xba   :  { %v420_v49 = vsel %vm419_vm8, %v310_v44, %v418_v48  ;;  %v215_v59 = vmul.f32 0.25, %v146_v47  ;;  %v221_v21 = vmul.f32 0.25, %v164_v46  ;;  %v429_v40 = vsel %vm409_vm3, %v354_v24, %v428_v37 }
  0xbb   :  { %446 = vxpose.xlu0.b32.start [1/4] (short) (narrow) %v420_v49, 8 }
  0xbc   :  { %v334_v4 = vrot.slane %v215_v59, %v4083_v19  ;;  %v358_v32 = vrot.slane %v221_v21, %v4083_v19  ;;  %v587_v21 = vld [vmem:[%s4637_s25 + $0x18] sm:$0xff] }
  0xbd   :  { %v182_v53 = vpop.xlane.xlu1 %181  ;;  %v179_v54 = vpop.xlane.xlu0 %178  ;;  %3498 = vmatpush3.msra.mxu1 %v587_v21 }
  0xbe   :  { %v425_v15 = vsel %vm415_vm6, %v334_v4, %v424_v11  ;;  %v227_v28 = vmul.f32 0.25, %v182_v53  ;;  %v226_v29 = vmul.f32 0.25, %v179_v54  ;;  %v430_v46 = vsel %vm411_vm4, %v358_v32, %v429_v40  ;;  %3499 = vmatprep.subr.mxu1 %v3807_v1 }
  0xc0   :  { %v382_v41 = vrot.slane %v227_v28, %v4083_v19  ;;  %v378_v42 = vrot.slane %v226_v29, %v4083_v19  ;;  %v3304_v29 = vld [vmem:[%s4638_s0] ss:$0 sm:$0xff] }
  0xc1   :  { %v167_v61 = vpop.xlane.xlu1 %166  ;;  %v149_v62 = vpop.xlane.xlu0 %148 }
  0xc2   :  { %v216_v0 = vmul.f32 0.25, %v149_v62  ;;  %v222_v25 = vmul.f32 0.25, %v167_v61  ;;  %v435_v55 = vsel %vm407_vm2, %v382_v41, %v378_v42 }
  0xc4   :  { %v338_v6 = vrot.slane %v216_v0, %v4083_v19  ;;  %v362_v35 = vrot.slane %v222_v25, %v4083_v19  ;;  %v585_v25 = vld [vmem:[%s4637_s25 + $0x8] sm:$0xff] }
  0xc5   :  { %v152_v7 = vpop.xlane.xlu1 %151  ;;  %v185_v8 = vpop.xlane.xlu0 %184 }
  0xc6   :  { %v217_v10 = vmul.f32 0.25, %v152_v7  ;;  %v426_v20 = vsel %vm417_vm7, %v338_v6, %v425_v15  ;;  %v228_v33 = vmul.f32 0.25, %v185_v8  ;;  %v431_v50 = vsel %vm413_vm5, %v362_v35, %v430_v46 }
  0xc8   :  { %v342_v14 = vrot.slane %v217_v10, %v4083_v19  ;;  %v386_v47 = vrot.slane %v228_v33, %v4083_v19 }
  0xc9   :  { %v188_v17 = vpop.xlane.xlu1 %187  ;;  %v170_v18 = vpop.xlane.xlu0 %169 }
  0xca   :  { %v427_v22 = vsel %vm419_vm8, %v342_v14, %v426_v20  ;;  %v223_v23 = vmul.f32 0.25, %v170_v18  ;;  %v229_v36 = vmul.f32 0.25, %v188_v17  ;;  %v436_v60 = vsel %vm409_vm3, %v386_v47, %v435_v55 }
  0xcb   :  { %447 = vxpose.xlu0.b32.cont [2/4] (short) (narrow) %v427_v22, 8  ;;  %v586_v22 = vld [vmem:[%s4637_s25 + $0x10] sm:$0xff] }
  0xcc   :  { %v366_v38 = vrot.slane %v223_v23, %v4083_v19  ;;  %v390_v51 = vrot.slane %v229_v36, %v4083_v19  ;;  %3500 = vmatpush3.msra.mxu1 %v586_v22 }
  0xcd   :  { %v191_v30 = vpop.xlane.xlu1 %190  ;;  %v173_v31 = vpop.xlane.xlu0 %172  ;;  %3501 = vmatprep.subr.mxu1 %v3807_v1 }
  0xce   :  { %v224_v34 = vmul.f32 0.25, %v173_v31  ;;  %v230_v39 = vmul.f32 0.25, %v191_v30  ;;  %v432_v54 = vsel %vm415_vm6, %v366_v38, %v431_v50  ;;  %v437_v0 = vsel %vm411_vm4, %v390_v51, %v436_v60  ;;  %3502 = vmatpush3.msra.mxu1 %v585_v25 }
  0xcf   :  { %3503 = vmatprep.subr.mxu1 %v3807_v1 }
  0xd0   :  { %v370_v43 = vrot.slane %v224_v34, %v4083_v19  ;;  %v394_v52 = vrot.slane %v230_v39, %v4083_v19  ;;  %3504 = vmatpush3.msra.mxu1 %v584_v26  ;;  %v3306_v34 = vld [vmem:[%s4607_s7] ss:$0 sm:$0xff] }
  0xd1   :  { %v194_v44 = vpop.xlane.xlu1 %193  ;;  %v176_v45 = vpop.xlane.xlu0 %175  ;;  %3513 = vmatprep.subr.mxu1 %v3807_v1 }
  0xd2   :  { %v231_v48 = vmul.f32 0.25, %v194_v44  ;;  %v225_v49 = vmul.f32 0.25, %v176_v45  ;;  %v433_v59 = vsel %vm417_vm7, %v370_v43, %v432_v54  ;;  %v438_v2 = vsel %vm413_vm5, %v394_v52, %v437_v0 }
  0xd4   :  { %v374_v53 = vrot.slane %v225_v49, %v4083_v19  ;;  %v398_v56 = vrot.slane %v231_v48, %v4083_v19 }
  0xd5   :  { %v197_v57 = vpop.xlane.xlu0 %196  ;;  %v200_v58 = vpop.xlane.xlu1 %199 }
  0xd6   :  { %v232_v61 = vmul.f32 0.25, %v197_v57  ;;  %v233_v62 = vmul.f32 0.25, %v200_v58  ;;  %v434_v63 = vsel %vm419_vm8, %v374_v53, %v433_v59  ;;  %v439_v5 = vsel %vm415_vm6, %v398_v56, %v438_v2 }
  0xd7   :  { %448 = vxpose.xlu0.b32.cont [3/4] (short) (narrow) %v434_v63, 8 }
  0xd8   :  { %v402_v3 = vrot.slane %v232_v61, %v4083_v19  ;;  %v406_v4 = vrot.slane %v233_v62, %v4083_v19  ;;  %v552_v19 = vld [vmem:[%s4636_s5] sm:$0xff]  ;;  %s4639_s5 = sld [smem:[#allocation13_spill]] }
  0xda   :  { %v440_v6 = vsel %vm417_vm7, %v402_v3, %v439_v5 }
  0xdb   :  { %v441_v7 = vsel %vm419_vm8, %v406_v4, %v440_v6 }
  0xdc   :  { %449 = vxpose.xlu0.b32.end [4/4] (short) (narrow) %v441_v7, 8 }
  0xde   :  { %v3305_v31 = vld [vmem:[%s4639_s5] ss:$0 sm:$0xff] }
 0x14c   :  { %v462_v8 = vpop.trf.xlu0 }
 0x14d   :  { %3495 = vmatmul.mubr.msk.f32.vlgmr.msra.gmra.mxu0 %vm478_vm9, %v462_v8 }
 0x14e   :  { %3510 = vmatprep.mubr.msk.f32.mxu0 %vm3808_vm1, %v3807_v1 }
 0x20d   :  { %v548_v10 = vpop.f32.mrf.mxu0 }
 0x20e   :  { %v549_v11 = vadd.f32 %v3302_v9, %v548_v10 }
 0x20f   :  { %v3496_v12 = vpop.f32.mrf.mxu0 }
 0x210   :  { %v553_v13 = vadd.f32 %v552_v19, %v549_v11 }
 0x212   :  { %v556_v14 = vsel %vm478_vm9, %v553_v13, 0.0 }
 0x213   :  { %557 = vadd.xlane.f32.xlu1 %v556_v14 }
 0x29c   :  { %v558_v15 = vpop.xlane.xlu1 %557 }
 0x29d   :  { %v560_v16 = vmul.f32 0.03125, %v558_v15 }
 0x29f   :  { %v561_v17 = vsub.f32 %v553_v13, %v560_v16 }
 0x2a1   :  { %v562_v18 = vmul.f32 %v561_v17, %v561_v17 }
 0x2a3   :  { %v563_v20 = vsel %vm478_vm9, %v562_v18, 0.0 }
 0x2a4   :  { %564 = vadd.xlane.f32.xlu1 %v563_v20 }
 0x32d   :  { %v565_v27 = vpop.xlane.xlu1 %564 }
 0x32e   :  { %v566_v23 = vmul.f32 0.03125, %v565_v27 }
 0x330   :  { %v567_v24 = vadd.f32 1e-06, %v566_v23 }
 0x332   :  { %3721 = vrsqrt.f32 %v567_v24 }
 0x33f   :  { %v3722_v28 = vpop.eup %3721 }
 0x340   :  { %v569_v30 = vmul.f32 %v3722_v28, %v561_v17 }
 0x342   :  { %v576_v32 = vmul.f32 %v3304_v29, %v569_v30 }
 0x344   :  { %v4178_v33 = vadd.f32 %v3305_v31, %v576_v32  ;;  %v1332_v32 = vld [vmem:[%s4608_s8] sm:$0xff] }
 0x346   :  { %3506 = vmatmul.mubr.msk.f32.vlgmr.msra.gmra.mxu1 %vm478_vm9, %v4178_v33 }
 0x347   :  { %3515 = vmatprep.mubr.msk.f32.mxu1 %vm3808_vm1, %v3807_v1 }
 0x406   :  { %v664_v35 = vpop.f32.mrf.mxu1 }
 0x407   :  { %v665_v36 = vadd.f32 %v3306_v34, %v664_v35 }
 0x408   :  { %v3507_v37 = vpop.f32.mrf.mxu1 }
 0x409   :  { %669 = vrot.lane.b32.xlu1 %v665_v36, %s3809_s26  ;;  %v1334_v37 = vld [vmem:[%s4608_s8 + $0x10] sm:$0xff] }
 0x40d   :  { %671 = vrot.lane.b32.xlu1 %v665_v36, %s3810_s2 }
 0x411   :  { %673 = vrot.lane.b32.xlu1 %v665_v36, %s3811_s29 }
 0x415   :  { %675 = vrot.lane.b32.xlu1 %v665_v36, %s3812_s27 }
 0x47b   :  { %v4191_v38 = vpop.permute.xlu1 %669 }
 0x47c   :  { %752 = vrot.lane.b32.xlu1 %v4191_v38, %s3812_s27 }
 0x47f   :  { %v4195_v39 = vpop.permute.xlu1 %671 }
 0x480   :  { %828 = vrot.lane.b32.xlu1 %v4195_v39, %s3812_s27 }
 0x483   :  { %v4199_v40 = vpop.permute.xlu1 %673 }
 0x484   :  { %904 = vrot.lane.b32.xlu1 %v4199_v40, %s3812_s27 }
 0x487   :  { %v676_v41 = vpop.permute.xlu1 %675 }
 0x488   :  { %3509 = vmatpush3.xpose.msk.msra.mxu0 %vm677_vm10, %v676_v41 }
 0x489   :  { %3518 = vmatprep.subr.mxu0 %v3807_v1 }
 0x48b   :  { %3511 = vmatmul.mubr.msk.f32.vlgmr.msra.gmra.mxu0 %vm677_vm10, %v665_v36 }
 0x48c   :  { %3520 = vmatprep.mubr.msk.f32.mxu0 %vm3808_vm1, %v3807_v1 }
 0x4ee   :  { %v753_v42 = vpop.permute.xlu1 %752 }
 0x4ef   :  { %3514 = vmatpush3.xpose.msk.msra.mxu1 %vm677_vm10, %v753_v42 }
 0x4f0   :  { %3523 = vmatprep.subr.mxu1 %v3807_v1 }
 0x4f2   :  { %3516 = vmatmul.mubr.msk.f32.vlgmr.msra.gmra.mxu1 %vm677_vm10, %v4191_v38  ;;  %v829_v43 = vpop.permute.xlu1 %828 }
 0x4f3   :  { %3519 = vmatpush3.xpose.msk.msra.mxu0 %vm677_vm10, %v829_v43  ;;  %3525 = vmatprep.mubr.msk.f32.mxu1 %vm3808_vm1, %v3807_v1 }
 0x4f4   :  { %3528 = vmatprep.subr.mxu0 %v3807_v1 }
 0x4f6   :  { %3521 = vmatmul.mubr.msk.f32.vlgmr.msra.gmra.mxu0 %vm677_vm10, %v4195_v39  ;;  %v905_v44 = vpop.permute.xlu1 %904 }
 0x4f7   :  { %3524 = vmatpush3.xpose.msk.msra.mxu1 %vm677_vm10, %v905_v44  ;;  %3530 = vmatprep.mubr.msk.f32.mxu0 %vm3808_vm1, %v3807_v1 }
 0x4f8   :  { %3533 = vmatprep.subr.mxu1 %v3807_v1 }
 0x4fa   :  { %3526 = vmatmul.mubr.msk.f32.vlgmr.msra.gmra.mxu1 %vm677_vm10, %v4199_v40 }
 0x4fb   :  { %3535 = vmatprep.mubr.msk.f32.mxu1 %vm3808_vm1, %v3807_v1 }
 0x54b   :  { %v748_v45 = vpop.f32.mrf.mxu0 }
 0x54c   :  { %v980_v46 = vmul.f32 0.35355338, %v748_v45 }
 0x54d   :  { %v3512_v47 = vpop.f32.mrf.mxu0 }
 0x54e   :  { %v984_v48 = vsel %vm677_vm10, %v980_v46, -inf }
 0x54f   :  { %985 = vmax.xlane.f32.xlu1 %v984_v48 }
 0x5b2   :  { %v824_v49 = vpop.f32.mrf.mxu1 }
 0x5b3   :  { %v981_v50 = vmul.f32 0.35355338, %v824_v49 }
 0x5b4   :  { %v3517_v51 = vpop.f32.mrf.mxu1 }
 0x5b5   :  { %v987_v52 = vsel %vm677_vm10, %v981_v50, -inf }
 0x5b6   :  { %988 = vmax.xlane.f32.xlu0 %v987_v52  ;;  %v900_v53 = vpop.f32.mrf.mxu0 }
 0x5b7   :  { %v982_v54 = vmul.f32 0.35355338, %v900_v53 }
 0x5b8   :  { %v3522_v55 = vpop.f32.mrf.mxu0 }
 0x5b9   :  { %v990_v56 = vsel %vm677_vm10, %v982_v54, -inf }
 0x5ba   :  { %v976_v57 = vpop.f32.mrf.mxu1  ;;  %991 = vmax.xlane.f32.xlu1 %v990_v56 }
 0x5bb   :  { %v983_v58 = vmul.f32 0.35355338, %v976_v57 }
 0x5bc   :  { %v3527_v59 = vpop.f32.mrf.mxu1 }
 0x5bd   :  { %v993_v60 = vsel %vm677_vm10, %v983_v58, -inf }
 0x5be   :  { %994 = vmax.xlane.f32.xlu1 %v993_v60  ;;  %v3324_v60 = vld [vmem:[%s4609_s9] ss:$0 sm:$0xff] }
 0x5cf   :  { %1028 = vrot.lane.b32.xlu1 %v665_v36, %s3813_s3  ;;  %v1333_v36 = vld [vmem:[%s4608_s8 + $0x8] sm:$0xff] }
 0x5d8   :  { %v986_v61 = vpop.xlane.xlu1 %985 }
 0x5d9   :  { %v996_v62 = vsub.f32 %v980_v46, %v986_v61 }
 0x5db   :  { %v1000_v63 = vmul.f32 1.442695, %v996_v62 }
 0x5dd   :  { %3723 = vpow2.f32 %v1000_v63 }
 0x5ea   :  { %v3724_v0 = vpop.eup %3723 }
 0x5eb   :  { %v1008_v2 = vsel %vm677_vm10, %v3724_v0, 0.0 }
 0x5f3   :  { %1009 = vadd.xlane.f32.xlu1 %v1008_v2 }
 0x63f   :  { %v989_v3 = vpop.xlane.xlu0 %988 }
 0x640   :  { %v997_v4 = vsub.f32 %v981_v50, %v989_v3 }
 0x642   :  { %v1002_v5 = vmul.f32 1.442695, %v997_v4 }
 0x643   :  { %v992_v6 = vpop.xlane.xlu1 %991 }
 0x644   :  { %3725 = vpow2.f32 %v1002_v5  ;;  %v998_v7 = vsub.f32 %v982_v54, %v992_v6 }
 0x646   :  { %v1004_v8 = vmul.f32 1.442695, %v998_v7 }
 0x647   :  { %v995_v9 = vpop.xlane.xlu1 %994 }
 0x648   :  { %3727 = vpow2.f32 %v1004_v8  ;;  %v999_v10 = vsub.f32 %v983_v58, %v995_v9  ;;  %v1676_v8 = vld [vmem:[%s4612_s12 + $0x18] sm:$0xff]  ;;  %v1675_v9 = vld [vmem:[%s4612_s12 + $0x10] sm:$0xff] }
 0x64a   :  { %v1006_v19 = vmul.f32 1.442695, %v999_v10  ;;  %v1673_v10 = vld [vmem:[%s4612_s12] sm:$0xff] }
 0x64b   :  { %v1029_v11 = vpop.permute.xlu1 %1028 }
 0x64c   :  { %3729 = vpow2.f32 %v1006_v19  ;;  %3529 = vmatpush3.msra.mxu0 %v1029_v11  ;;  %v1765_v19 = vld [vmem:[%s4614_s14 + $0x38] sm:$0xff]  ;;  %v1764_v11 = vld [vmem:[%s4614_s14 + $0x30] sm:$0xff] }
 0x64d   :  { %3538 = vmatprep.subr.mxu0 %v3807_v1 }
 0x651   :  { %v3726_v12 = vpop.eup %3725 }
 0x652   :  { %v1011_v13 = vsel %vm677_vm10, %v3726_v12, 0.0 }
 0x653   :  { %1012 = vadd.xlane.f32.xlu1 %v1011_v13  ;;  %v1762_v13 = vld [vmem:[%s4614_s14 + $0x20] sm:$0xff] }
 0x655   :  { %v3728_v14 = vpop.eup %3727 }
 0x656   :  { %v1014_v15 = vsel %vm677_vm10, %v3728_v14, 0.0 }
 0x657   :  { %1015 = vadd.xlane.f32.xlu1 %v1014_v15 }
 0x659   :  { %v3730_v16 = vpop.eup %3729 }
 0x65a   :  { %v1017_v17 = vsel %vm677_vm10, %v3730_v16, 0.0 }
 0x65b   :  { %1018 = vadd.xlane.f32.xlu0 %v1017_v17 }
 0x668   :  { %1180 = vrot.lane.b32.xlu1 %v4195_v39, %s3813_s3 }
 0x66c   :  { %1256 = vrot.lane.b32.xlu1 %v4199_v40, %s3813_s3  ;;  %v1335_v40 = vld [vmem:[%s4608_s8 + $0x18] sm:$0xff] }
 0x671   :  { %1104 = vrot.lane.b32.xlu0 %v4191_v38, %s3813_s3 }
 0x67c   :  { %v1010_v18 = vpop.xlane.xlu1 %1009 }
 0x67d   :  { %3731 = vrcp.f32 %v1010_v18 }
 0x68a   :  { %v3732_v20 = vpop.eup %3731 }
 0x68b   :  { %v1021_v21 = vmul.f32 %v3732_v20, %v3724_v0  ;;  %v3325_v20 = vld [vmem:[%s4610_s10] ss:$0 sm:$0xff] }
 0x68d   :  { %3531 = vmatmul.mubr.msk.f32.vlgmr.msra.gmra.mxu0 %vm677_vm10, %v1021_v21 }
 0x68e   :  { %3540 = vmatprep.mubr.msk.f32.mxu0 %vm3808_vm1, %v3807_v1 }
 0x6dc   :  { %v1013_v22 = vpop.xlane.xlu1 %1012 }
 0x6dd   :  { %3733 = vrcp.f32 %v1013_v22  ;;  %v3326_v22 = vld [vmem:[%s4611_s11] ss:$0 sm:$0xff] }
 0x6e0   :  { %v1016_v25 = vpop.xlane.xlu1 %1015 }
 0x6e1   :  { %3735 = vrcp.f32 %v1016_v25 }
 0x6e4   :  { %v1019_v26 = vpop.xlane.xlu0 %1018  ;;  %v1181_v27 = vpop.permute.xlu1 %1180 }
 0x6e5   :  { %3737 = vrcp.f32 %v1019_v26  ;;  %3539 = vmatpush3.msra.mxu0 %v1181_v27  ;;  %v1760_v27 = vld [vmem:[%s4614_s14 + $0x10] sm:$0xff] }
 0x6e6   :  { %3548 = vmatprep.subr.mxu0 %v3807_v1 }
 0x6e8   :  { %v1105_v23 = vpop.permute.xlu0 %1104  ;;  %v1257_v29 = vpop.permute.xlu1 %1256 }
 0x6e9   :  { %3534 = vmatpush3.msra.mxu1 %v1105_v23  ;;  %v1759_v23 = vld [vmem:[%s4614_s14 + $0x8] sm:$0xff] }
 0x6ea   :  { %v3734_v24 = vpop.eup %3733  ;;  %3543 = vmatprep.subr.mxu1 %v3807_v1 }
 0x6eb   :  { %v1023_v28 = vmul.f32 %v3734_v24, %v3726_v12  ;;  %v1763_v12 = vld [vmem:[%s4614_s14 + $0x28] sm:$0xff]  ;;  %v1758_v24 = vld [vmem:[%s4614_s14] sm:$0xff] }
 0x6ed   :  { %3536 = vmatmul.mubr.msk.f32.vlgmr.msra.gmra.mxu1 %vm677_vm10, %v1023_v28  ;;  %v3327_v28 = vld [vmem:[%s4613_s13] ss:$0 sm:$0xff] }
 0x6ee   :  { %v3736_v30 = vpop.eup %3735  ;;  %3544 = vmatpush3.msra.mxu1 %v1257_v29  ;;  %3545 = vmatprep.mubr.msk.f32.mxu1 %vm3808_vm1, %v3807_v1 }
 0x6ef   :  { %v1025_v31 = vmul.f32 %v3736_v30, %v3728_v14  ;;  %3553 = vmatprep.subr.mxu1 %v3807_v1  ;;  %v1761_v14 = vld [vmem:[%s4614_s14 + $0x18] sm:$0xff] }
 0x6f1   :  { %3541 = vmatmul.mubr.msk.f32.vlgmr.msra.gmra.mxu0 %vm677_vm10, %v1025_v31 }
 0x6f2   :  { %v3738_v34 = vpop.eup %3737  ;;  %3549 = vmatpush3.msra.mxu0 %v1332_v32  ;;  %3550 = vmatprep.mubr.msk.f32.mxu0 %vm3808_vm1, %v3807_v1 }
 0x6f3   :  { %v1027_v35 = vmul.f32 %v3738_v34, %v3730_v16  ;;  %3558 = vmatprep.subr.mxu0 %v3807_v1  ;;  %v3329_v34 = vld [vmem:[%s4615_s15] ss:$0 sm:$0xff] }
 0x6f5   :  { %3546 = vmatmul.mubr.msk.f32.vlgmr.msra.gmra.mxu1 %vm677_vm10, %v1027_v35 }
 0x6f6   :  { %3555 = vmatprep.mubr.msk.f32.mxu1 %vm3808_vm1, %v3807_v1  ;;  %3554 = vmatpush3.msra.mxu1 %v1333_v36 }
 0x6f7   :  { %3563 = vmatprep.subr.mxu1 %v3807_v1 }
 0x74d   :  { %v1100_v38 = vpop.f32.mrf.mxu0 }
 0x74e   :  { %3551 = vmatmul.mubr.msk.f32.vlgmr.msra.gmra.mxu0 %vm677_vm10, %v1100_v38 }
 0x74f   :  { %v3532_v39 = vpop.f32.mrf.mxu0  ;;  %3559 = vmatpush3.msra.mxu0 %v1334_v37  ;;  %3560 = vmatprep.mubr.msk.f32.mxu0 %vm3808_vm1, %v3807_v1 }
 0x750   :  { %3568 = vmatprep.subr.mxu0 %v3807_v1 }
 0x7ad   :  { %v1176_v41 = vpop.f32.mrf.mxu1 }
 0x7ae   :  { %3556 = vmatmul.mubr.msk.f32.vlgmr.msra.gmra.mxu1 %vm677_vm10, %v1176_v41 }
 0x7af   :  { %v3537_v42 = vpop.f32.mrf.mxu1  ;;  %3564 = vmatpush3.msra.mxu1 %v1335_v40  ;;  %3565 = vmatprep.mubr.msk.f32.mxu1 %vm3808_vm1, %v3807_v1 }
 0x7b0   :  { %3579 = vmatprep.subr.mxu1 %v3807_v1 }
 0x7b1   :  { %v1252_v43 = vpop.f32.mrf.mxu0 }
 0x7b2   :  { %3561 = vmatmul.mubr.msk.f32.vlgmr.msra.gmra.mxu0 %vm677_vm10, %v1252_v43 }
 0x7b3   :  { %v3542_v44 = vpop.f32.mrf.mxu0  ;;  %3576 = vmatprep.mubr.msk.f32.mxu0 %vm3808_vm1, %v3807_v1  ;;  %3569 = vmatpush3.msra.mxu0 %v1676_v8 }
 0x7b4   :  { %3570 = vmatprep.subr.mxu0 %v3807_v1 }
 0x7b5   :  { %v1328_v45 = vpop.f32.mrf.mxu1  ;;  %3571 = vmatpush3.msra.mxu0 %v1675_v9 }
 0x7b6   :  { %3566 = vmatmul.mubr.msk.f32.vlgmr.msra.gmra.mxu1 %vm677_vm10, %v1328_v45  ;;  %3572 = vmatprep.subr.mxu0 %v3807_v1  ;;  %v3336_v45 = vld [vmem:[%s4637_s25 + $0x38] sm:$0xff] }
 0x7b7   :  { %v3547_v46 = vpop.f32.mrf.mxu1  ;;  %3595 = vmatprep.mubr.msk.f32.mxu1 %vm3808_vm1, %v3807_v1  ;;  %3580 = vmatpush3.msra.mxu1 %v1765_v19 }
 0x7b8   :  { %3581 = vmatprep.subr.mxu1 %v3807_v1  ;;  %v3335_v46 = vld [vmem:[%s4637_s25 + $0x30] sm:$0xff] }
 0x7b9   :  { %3582 = vmatpush3.msra.mxu1 %v1764_v11 }
 0x7ba   :  { %3583 = vmatprep.subr.mxu1 %v3807_v1 }
 0x7bb   :  { %3584 = vmatpush3.msra.mxu1 %v1763_v12 }
 0x7bc   :  { %3585 = vmatprep.subr.mxu1 %v3807_v1 }
 0x7bd   :  { %3586 = vmatpush3.msra.mxu1 %v1762_v13 }
 0x7be   :  { %3587 = vmatprep.subr.mxu1 %v3807_v1 }
 0x7bf   :  { %3588 = vmatpush3.msra.mxu1 %v1761_v14 }
 0x7c0   :  { %3589 = vmatprep.subr.mxu1 %v3807_v1 }
 0x7c1   :  { %3590 = vmatpush3.msra.mxu1 %v1760_v27 }
 0x7c2   :  { %3591 = vmatprep.subr.mxu1 %v3807_v1 }
 0x7c3   :  { %3592 = vmatpush3.msra.mxu1 %v1759_v23 }
 0x7c4   :  { %3593 = vmatprep.subr.mxu1 %v3807_v1 }
 0x7c5   :  { %3594 = vmatpush3.msra.mxu1 %v1758_v24 }
 0x7c6   :  { %3614 = vmatprep.subr.mxu1 %v3807_v1 }
 0x80e   :  { %v1405_v47 = vpop.f32.mrf.mxu0 }
 0x80f   :  { %v1628_v53 = vsel %vm478_vm9, %v1405_v47, 0.0  ;;  %v3334_v47 = vld [vmem:[%s4637_s25 + $0x28] sm:$0xff] }
 0x810   :  { %v3552_v48 = vpop.f32.mrf.mxu0 }
 0x811   :  { %v3333_v48 = vld [vmem:[%s4637_s25 + $0x20] sm:$0xff] }
 0x86e   :  { %v1478_v49 = vpop.f32.mrf.mxu1 }
 0x86f   :  { %v1629_v51 = vsel %vm478_vm9, %v1478_v49, 0.0 }
 0x870   :  { %v3557_v50 = vpop.f32.mrf.mxu1  ;;  %v1630_v55 = vadd.f32 %v1629_v51, %v1628_v53  ;;  %v3331_v53 = vld [vmem:[%s4616_s16] ss:$0 sm:$0xff] }
 0x872   :  { %v1551_v52 = vpop.f32.mrf.mxu0 }
 0x873   :  { %v1631_v54 = vsel %vm478_vm9, %v1551_v52, 0.0 }
 0x874   :  { %v3562_v56 = vpop.f32.mrf.mxu0  ;;  %v1632_v57 = vadd.f32 %v1631_v54, %v1630_v55  ;;  %v3332_v55 = vld [vmem:[%s4617_s17] ss:$0 sm:$0xff] }
 0x876   :  { %v1624_v58 = vpop.f32.mrf.mxu1 }
 0x877   :  { %v1633_v59 = vsel %vm478_vm9, %v1624_v58, 0.0  ;;  %v3338_v58 = vld [vmem:[%s4607_s7 + $0x1] ss:$0 sm:$0xff] }
 0x878   :  { %v1634_v61 = vadd.f32 %v1633_v59, %v1632_v57  ;;  %v3567_v62 = vpop.f32.mrf.mxu1 }
 0x87a   :  { %v1642_v63 = vadd.f32 %v3324_v60, %v1634_v61 }
 0x87c   :  { %v1643_v0 = vadd.f32 %v1642_v63, %v4178_v33  ;;  %v1674_v33 = vld [vmem:[%s4612_s12 + $0x8] sm:$0xff] }
 0x87d   :  { %3573 = vmatpush3.msra.mxu0 %v1674_v33 }
 0x87e   :  { %v1646_v2 = vsel %vm478_vm9, %v1643_v0, 0.0  ;;  %3574 = vmatprep.subr.mxu0 %v3807_v1 }
 0x87f   :  { %1647 = vadd.xlane.f32.xlu0 %v1646_v2  ;;  %3575 = vmatpush3.msra.mxu0 %v1673_v10 }
 0x880   :  { %3598 = vmatprep.subr.mxu0 %v3807_v1 }
 0x908   :  { %v1648_v3 = vpop.xlane.xlu0 %1647 }
 0x909   :  { %v1649_v4 = vmul.f32 0.03125, %v1648_v3 }
 0x90b   :  { %v1650_v5 = vsub.f32 %v1643_v0, %v1649_v4 }
 0x90d   :  { %v1651_v6 = vmul.f32 %v1650_v5, %v1650_v5 }
 0x90f   :  { %v1652_v7 = vsel %vm478_vm9, %v1651_v6, 0.0 }
 0x910   :  { %1653 = vadd.xlane.f32.xlu1 %v1652_v7 }
 0x999   :  { %v1654_v15 = vpop.xlane.xlu1 %1653 }
 0x99a   :  { %v1655_v16 = vmul.f32 0.03125, %v1654_v15 }
 0x99c   :  { %v1656_v17 = vadd.f32 1e-06, %v1655_v16 }
 0x99e   :  { %3739 = vrsqrt.f32 %v1656_v17 }
 0x9ab   :  { %v3740_v18 = vpop.eup %3739 }
 0x9ac   :  { %v1658_v21 = vmul.f32 %v3740_v18, %v1650_v5 }
 0x9ae   :  { %v1665_v25 = vmul.f32 %v3325_v20, %v1658_v21 }
 0x9b0   :  { %v1672_v26 = vadd.f32 %v3326_v22, %v1665_v25 }
 0x9b2   :  { %3577 = vmatmul.mubr.msk.f32.vlgmr.msra.gmra.mxu0 %vm478_vm9, %v1672_v26 }
 0x9b3   :  { %3606 = vmatprep.mubr.msk.f32.mxu0 %vm3808_vm1, %v3807_v1  ;;  %3599 = vmatpush3.msra.mxu0 %v3336_v45 }
 0x9b4   :  { %3600 = vmatprep.subr.mxu0 %v3807_v1 }
 0x9b5   :  { %3601 = vmatpush3.msra.mxu0 %v3335_v46 }
 0x9b6   :  { %3602 = vmatprep.subr.mxu0 %v3807_v1 }
 0x9b7   :  { %3603 = vmatpush3.msra.mxu0 %v3334_v47 }
 0x9b8   :  { %3604 = vmatprep.subr.mxu0 %v3807_v1 }
 0x9b9   :  { %3605 = vmatpush3.msra.mxu0 %v3333_v48 }
 0x9ba   :  { %3609 = vmatprep.subr.mxu0 %v3807_v1 }
 0xa72   :  { %v1753_v29 = vpop.f32.mrf.mxu0 }
 0xa73   :  { %v1754_v30 = vadd.f32 %v3327_v28, %v1753_v29 }
 0xa74   :  { %v3578_v31 = vpop.f32.mrf.mxu0 }
 0xa75   :  { %v1757_v32 = vmax.f32 %v1754_v30, 0.0 }
 0xa77   :  { %3596 = vmatmul.mubr.msk.f32.vlgmr.msra.gmra.mxu1 %vm1773_vm11, %v1757_v32 }
 0xa78   :  { %3616 = vmatprep.mubr.msk.f32.mxu1 %vm3808_vm1, %v3807_v1 }
 0xb37   :  { %v1843_v35 = vpop.f32.mrf.mxu1 }
 0xb38   :  { %v1844_v36 = vadd.f32 %v3329_v34, %v1843_v35 }
 0xb39   :  { %v3597_v37 = vpop.f32.mrf.mxu1 }
 0xb3a   :  { %v1847_v38 = vadd.f32 %v1844_v36, %v1672_v26 }
 0xb3c   :  { %v1850_v39 = vsel %vm478_vm9, %v1847_v38, 0.0 }
 0xb3d   :  { %1851 = vadd.xlane.f32.xlu0 %v1850_v39 }
 0xbc6   :  { %v1852_v40 = vpop.xlane.xlu0 %1851 }
 0xbc7   :  { %v1853_v41 = vmul.f32 0.03125, %v1852_v40 }
 0xbc9   :  { %v1854_v42 = vsub.f32 %v1847_v38, %v1853_v41 }
 0xbcb   :  { %v1855_v43 = vmul.f32 %v1854_v42, %v1854_v42 }
 0xbcd   :  { %v1856_v44 = vsel %vm478_vm9, %v1855_v43, 0.0 }
 0xbce   :  { %1857 = vadd.xlane.f32.xlu0 %v1856_v44 }
 0xc57   :  { %v1858_v49 = vpop.xlane.xlu0 %1857 }
 0xc58   :  { %v1859_v50 = vmul.f32 0.03125, %v1858_v49 }
 0xc5a   :  { %v1860_v51 = vadd.f32 1e-06, %v1859_v50 }
 0xc5c   :  { %3741 = vrsqrt.f32 %v1860_v51 }
 0xc69   :  { %v3742_v52 = vpop.eup %3741 }
 0xc6a   :  { %v1862_v54 = vmul.f32 %v3742_v52, %v1854_v42 }
 0xc6c   :  { %v1869_v56 = vmul.f32 %v3331_v53, %v1862_v54 }
 0xc6e   :  { %v4385_v57 = vadd.f32 %v3332_v55, %v1869_v56 }
 0xc70   :  { %3607 = vmatmul.mubr.msk.f32.vlgmr.msra.gmra.mxu0 %vm478_vm9, %v4385_v57 }
 0xc71   :  { %3611 = vmatprep.mubr.msk.f32.mxu0 %vm3808_vm1, %v3807_v1 }
 0xd30   :  { %v1959_v59 = vpop.f32.mrf.mxu0 }
 0xd31   :  { %v1960_v60 = vadd.f32 %v3338_v58, %v1959_v59  ;;  %v3352_v59 = vld [vmem:[%s4608_s8 + $0x20] sm:$0xff] }
 0xd32   :  { %v3608_v61 = vpop.f32.mrf.mxu0 }
 0xd33   :  { %1966 = vrot.lane.b32.xlu0 %v1960_v60, %s3810_s2  ;;  %1964 = vrot.lane.b32.xlu1 %v1960_v60, %s3809_s26  ;;  %v3354_v61 = vld [vmem:[%s4608_s8 + $0x30] sm:$0xff] }
 0xd37   :  { %1968 = vrot.lane.b32.xlu1 %v1960_v60, %s3811_s29 }
 0xd3b   :  { %1970 = vrot.lane.b32.xlu1 %v1960_v60, %s3812_s27 }
 0xda5   :  { %v4398_v62 = vpop.permute.xlu0 %1966  ;;  %v1965_v63 = vpop.permute.xlu1 %1964 }
 0xda6   :  { %2122 = vrot.lane.b32.xlu1 %v4398_v62, %s3812_s27  ;;  %2046 = vrot.lane.b32.xlu0 %v1965_v63, %s3812_s27 }
 0xda9   :  { %v4403_v0 = vpop.permute.xlu1 %1968 }
 0xdaa   :  { %2198 = vrot.lane.b32.xlu0 %v4403_v0, %s3812_s27 }
 0xdad   :  { %v1971_v2 = vpop.permute.xlu1 %1970 }
 0xdae   :  { %3610 = vmatpush3.xpose.msk.msra.mxu0 %vm677_vm10, %v1971_v2 }
 0xdaf   :  { %3619 = vmatprep.subr.mxu0 %v3807_v1 }
 0xdb1   :  { %3612 = vmatmul.mubr.msk.f32.vlgmr.msra.gmra.mxu0 %vm677_vm10, %v1960_v60 }
 0xdb2   :  { %3621 = vmatprep.mubr.msk.f32.mxu0 %vm3808_vm1, %v3807_v1 }
 0xe18   :  { %v2047_v3 = vpop.permute.xlu0 %2046  ;;  %v2123_v4 = vpop.permute.xlu1 %2122 }
 0xe19   :  { %3615 = vmatpush3.xpose.msk.msra.mxu1 %vm677_vm10, %v2047_v3  ;;  %3620 = vmatpush3.xpose.msk.msra.mxu0 %vm677_vm10, %v2123_v4 }
 0xe1a   :  { %3624 = vmatprep.subr.mxu1 %v3807_v1  ;;  %3629 = vmatprep.subr.mxu0 %v3807_v1 }
 0xe1c   :  { %3617 = vmatmul.mubr.msk.f32.vlgmr.msra.gmra.mxu1 %vm677_vm10, %v1965_v63  ;;  %v2199_v5 = vpop.permute.xlu0 %2198  ;;  %3622 = vmatmul.mubr.msk.f32.vlgmr.msra.gmra.mxu0 %vm677_vm10, %v4398_v62 }
 0xe1d   :  { %3625 = vmatpush3.xpose.msk.msra.mxu1 %vm677_vm10, %v2199_v5  ;;  %3626 = vmatprep.mubr.msk.f32.mxu1 %vm3808_vm1, %v3807_v1 }
 0xe1e   :  { %3634 = vmatprep.subr.mxu1 %v3807_v1  ;;  %3631 = vmatprep.mubr.msk.f32.mxu0 %vm3808_vm1, %v3807_v1 }
 0xe20   :  { %3627 = vmatmul.mubr.msk.f32.vlgmr.msra.gmra.mxu1 %vm677_vm10, %v4403_v0 }
 0xe21   :  { %3636 = vmatprep.mubr.msk.f32.mxu1 %vm3808_vm1, %v3807_v1 }
 0xe71   :  { %v2042_v6 = vpop.f32.mrf.mxu0 }
 0xe72   :  { %v2274_v7 = vmul.f32 0.35355338, %v2042_v6 }
 0xe73   :  { %v3613_v8 = vpop.f32.mrf.mxu0 }
 0xe74   :  { %v2278_v9 = vsel %vm677_vm10, %v2274_v7, -inf }
 0xe75   :  { %2279 = vmax.xlane.f32.xlu1 %v2278_v9 }
 0xedc   :  { %v2118_v33 = vpop.f32.mrf.mxu1  ;;  %v2194_v10 = vpop.f32.mrf.mxu0 }
 0xedd   :  { %v2275_v19 = vmul.f32 0.35355338, %v2118_v33  ;;  %v2276_v13 = vmul.f32 0.35355338, %v2194_v10 }
 0xede   :  { %v3618_v11 = vpop.f32.mrf.mxu1  ;;  %v3623_v12 = vpop.f32.mrf.mxu0 }
 0xedf   :  { %v2281_v14 = vsel %vm677_vm10, %v2275_v19, -inf  ;;  %v2284_v20 = vsel %vm677_vm10, %v2276_v13, -inf }
 0xee0   :  { %2282 = vmax.xlane.f32.xlu0 %v2281_v14  ;;  %v2270_v15 = vpop.f32.mrf.mxu1 }
 0xee1   :  { %v2277_v16 = vmul.f32 0.35355338, %v2270_v15 }
 0xee2   :  { %v3628_v17 = vpop.f32.mrf.mxu1 }
 0xee3   :  { %v2287_v18 = vsel %vm677_vm10, %v2277_v16, -inf }
 0xee4   :  { %2288 = vmax.xlane.f32.xlu1 %v2287_v18  ;;  %2285 = vmax.xlane.f32.xlu0 %v2284_v20 }
 0xef5   :  { %2402 = vrot.lane.b32.xlu1 %v1965_v63, %s3813_s3 }
 0xefa   :  { %2326 = vrot.lane.b32.xlu0 %v1960_v60, %s3813_s3  ;;  %v3353_v60 = vld [vmem:[%s4608_s8 + $0x28] sm:$0xff] }
 0xefe   :  { %v2280_v21 = vpop.xlane.xlu1 %2279 }
 0xeff   :  { %v2290_v22 = vsub.f32 %v2274_v7, %v2280_v21  ;;  %v3361_v21 = vld [vmem:[%s4609_s9 + $0x1] ss:$0 sm:$0xff] }
 0xf01   :  { %v2294_v25 = vmul.f32 1.442695, %v2290_v22 }
 0xf03   :  { %3743 = vpow2.f32 %v2294_v25 }
 0xf10   :  { %v3744_v26 = vpop.eup %3743 }
 0xf11   :  { %v2302_v27 = vsel %vm677_vm10, %v3744_v26, 0.0 }
 0xf19   :  { %2303 = vadd.xlane.f32.xlu0 %v2302_v27 }
 0xf69   :  { %v2283_v23 = vpop.xlane.xlu0 %2282 }
 0xf6a   :  { %v2291_v24 = vsub.f32 %v2275_v19, %v2283_v23 }
 0xf6c   :  { %v2296_v28 = vmul.f32 1.442695, %v2291_v24 }
 0xf6d   :  { %v2289_v29 = vpop.xlane.xlu1 %2288  ;;  %v2286_v30 = vpop.xlane.xlu0 %2285 }
 0xf6e   :  { %3745 = vpow2.f32 %v2296_v28  ;;  %v2293_v31 = vsub.f32 %v2277_v16, %v2289_v29  ;;  %v2292_v32 = vsub.f32 %v2276_v13, %v2286_v30 }
 0xf70   :  { %v2300_v34 = vmul.f32 1.442695, %v2293_v31  ;;  %v2298_v35 = vmul.f32 1.442695, %v2292_v32  ;;  %v3369_v31 = vld [vmem:[%s4612_s12 + $0x38] sm:$0xff]  ;;  %v3367_v32 = vld [vmem:[%s4612_s12 + $0x28] sm:$0xff] }
 0xf71   :  { %v2403_v36 = vpop.permute.xlu1 %2402  ;;  %v2327_v37 = vpop.permute.xlu0 %2326 }
 0xf72   :  { %3747 = vpow2.f32 %v2300_v34  ;;  %3630 = vmatpush3.msra.mxu0 %v2327_v37  ;;  %3635 = vmatpush3.msra.mxu1 %v2403_v36  ;;  %v3366_v34 = vld [vmem:[%s4612_s12 + $0x20] sm:$0xff]  ;;  %v3379_v36 = vld [vmem:[%s4614_s14 + $0x70] sm:$0xff]  ;;  %v3378_v37 = vld [vmem:[%s4614_s14 + $0x68] sm:$0xff] }
 0xf73   :  { %3749 = vpow2.f32 %v2298_v35  ;;  %3639 = vmatprep.subr.mxu0 %v3807_v1  ;;  %3644 = vmatprep.subr.mxu1 %v3807_v1  ;;  %v3380_v35 = vld [vmem:[%s4614_s14 + $0x78] sm:$0xff] }
 0xf7b   :  { %v3746_v38 = vpop.eup %3745 }
 0xf7c   :  { %v2305_v39 = vsel %vm677_vm10, %v3746_v38, 0.0 }
 0xf7d   :  { %2306 = vadd.xlane.f32.xlu1 %v2305_v39  ;;  %v3376_v39 = vld [vmem:[%s4614_s14 + $0x58] sm:$0xff] }
 0xf7f   :  { %v3748_v40 = vpop.eup %3747 }
 0xf80   :  { %v3750_v41 = vpop.eup %3749  ;;  %v2311_v42 = vsel %vm677_vm10, %v3748_v40, 0.0 }
 0xf81   :  { %2312 = vadd.xlane.f32.xlu1 %v2311_v42  ;;  %v2308_v43 = vsel %vm677_vm10, %v3750_v41, 0.0 }
 0xf82   :  { %2309 = vadd.xlane.f32.xlu0 %v2308_v43 }
 0xf92   :  { %2478 = vrot.lane.b32.xlu1 %v4398_v62, %s3813_s3 }
 0xf98   :  { %2554 = vrot.lane.b32.xlu0 %v4403_v0, %s3813_s3  ;;  %v3355_v0 = vld [vmem:[%s4608_s8 + $0x38] sm:$0xff] }
 0xfa2   :  { %v2304_v44 = vpop.xlane.xlu0 %2303 }
 0xfa3   :  { %3751 = vrcp.f32 %v2304_v44  ;;  %v3364_v44 = vld [vmem:[%s4610_s10 + $0x1] ss:$0 sm:$0xff] }
 0xfb0   :  { %v3752_v45 = vpop.eup %3751 }
 0xfb1   :  { %v2315_v46 = vmul.f32 %v3752_v45, %v3744_v26 }
 0xfb3   :  { %2322 = vst.msk [vmem:[#allocation4] sm:$0xff] %vm677_vm10, %v2315_v46  ;;  %3632 = vmatmul.mubr.msk.f32.vlgmr.msra.gmra.mxu0 %vm677_vm10, %v2315_v46  ;;  %v3365_v46 = vld [vmem:[%s4611_s11 + $0x1] ss:$0 sm:$0xff] }
 0xfb4   :  { %3641 = vmatprep.mubr.msk.f32.mxu0 %vm3808_vm1, %v3807_v1 }
0x1006   :  { %v2307_v47 = vpop.xlane.xlu1 %2306 }
0x1007   :  { %3753 = vrcp.f32 %v2307_v47 }
0x100a   :  { %v2313_v48 = vpop.xlane.xlu1 %2312 }
0x100b   :  { %3755 = vrcp.f32 %v2313_v48  ;;  %v2310_v49 = vpop.xlane.xlu0 %2309 }
0x100c   :  { %3757 = vrcp.f32 %v2310_v49  ;;  %v3375_v49 = vld [vmem:[%s4614_s14 + $0x50] sm:$0xff] }
0x100e   :  { %v2479_v50 = vpop.permute.xlu1 %2478 }
0x100f   :  { %3640 = vmatpush3.msra.mxu0 %v2479_v50  ;;  %v2555_v53 = vpop.permute.xlu0 %2554  ;;  %v3374_v50 = vld [vmem:[%s4614_s14 + $0x48] sm:$0xff] }
0x1010   :  { %3649 = vmatprep.subr.mxu0 %v3807_v1 }
0x1014   :  { %v3754_v51 = vpop.eup %3753 }
0x1015   :  { %v2317_v52 = vmul.f32 %v3754_v51, %v3746_v38  ;;  %v3377_v38 = vld [vmem:[%s4614_s14 + $0x60] sm:$0xff] }
0x1016   :  { %v3373_v51 = vld [vmem:[%s4614_s14 + $0x40] sm:$0xff] }
0x1017   :  { %2323 = vst.msk [vmem:[#allocation4 + $0x8] sm:$0xff] %vm677_vm10, %v2317_v52  ;;  %3637 = vmatmul.mubr.msk.f32.vlgmr.msra.gmra.mxu1 %vm677_vm10, %v2317_v52  ;;  %v3371_v52 = vld [vmem:[%s4613_s13 + $0x1] ss:$0 sm:$0xff] }
0x1018   :  { %v3756_v54 = vpop.eup %3755  ;;  %3645 = vmatpush3.msra.mxu1 %v2555_v53  ;;  %3646 = vmatprep.mubr.msk.f32.mxu1 %vm3808_vm1, %v3807_v1 }
0x1019   :  { %v3758_v55 = vpop.eup %3757  ;;  %v2321_v56 = vmul.f32 %v3756_v54, %v3748_v40  ;;  %3654 = vmatprep.subr.mxu1 %v3807_v1 }
0x101a   :  { %v2319_v58 = vmul.f32 %v3758_v55, %v3750_v41 }
0x101b   :  { %2325 = vst.msk [vmem:[#allocation4 + $0x18] sm:$0xff] %vm677_vm10, %v2321_v56  ;;  %3647 = vmatmul.mubr.msk.f32.vlgmr.msra.gmra.mxu1 %vm677_vm10, %v2321_v56 }
0x101c   :  { %2324 = vst.msk [vmem:[#allocation4 + $0x10] sm:$0xff] %vm677_vm10, %v2319_v58  ;;  %3642 = vmatmul.mubr.msk.f32.vlgmr.msra.gmra.mxu0 %vm677_vm10, %v2319_v58  ;;  %3656 = vmatprep.mubr.msk.f32.mxu1 %vm3808_vm1, %v3807_v1  ;;  %v3382_v58 = vld [vmem:[%s4615_s15 + $0x1] ss:$0 sm:$0xff] }
0x101d   :  { %3650 = vmatpush3.msra.mxu0 %v3352_v59  ;;  %3651 = vmatprep.mubr.msk.f32.mxu0 %vm3808_vm1, %v3807_v1 }
0x101e   :  { %3659 = vmatprep.subr.mxu0 %v3807_v1  ;;  %3655 = vmatpush3.msra.mxu1 %v3353_v60 }
0x101f   :  { %3664 = vmatprep.subr.mxu1 %v3807_v1 }
0x1073   :  { %v2398_v62 = vpop.f32.mrf.mxu0 }
0x1074   :  { %3652 = vmatmul.mubr.msk.f32.vlgmr.msra.gmra.mxu0 %vm677_vm10, %v2398_v62 }
0x1075   :  { %v3633_v63 = vpop.f32.mrf.mxu0  ;;  %3660 = vmatpush3.msra.mxu0 %v3354_v61  ;;  %3661 = vmatprep.mubr.msk.f32.mxu0 %vm3808_vm1, %v3807_v1 }
0x1076   :  { %3669 = vmatprep.subr.mxu0 %v3807_v1 }
0x10d7   :  { %v2474_v2 = vpop.f32.mrf.mxu1 }
0x10d8   :  { %3657 = vmatmul.mubr.msk.f32.vlgmr.msra.gmra.mxu1 %vm677_vm10, %v2474_v2 }
0x10d9   :  { %v3638_v3 = vpop.f32.mrf.mxu1  ;;  %3665 = vmatpush3.msra.mxu1 %v3355_v0  ;;  %3666 = vmatprep.mubr.msk.f32.mxu1 %vm3808_vm1, %v3807_v1 }
0x10da   :  { %3680 = vmatprep.subr.mxu1 %v3807_v1 }
0x10db   :  { %v2626_v4 = vpop.f32.mrf.mxu1 }
0x10dc   :  { %v2550_v5 = vpop.f32.mrf.mxu0  ;;  %3667 = vmatmul.mubr.msk.f32.vlgmr.msra.gmra.mxu1 %vm677_vm10, %v2626_v4 }
0x10dd   :  { %3662 = vmatmul.mubr.msk.f32.vlgmr.msra.gmra.mxu0 %vm677_vm10, %v2550_v5  ;;  %v3648_v6 = vpop.f32.mrf.mxu1  ;;  %3696 = vmatprep.mubr.msk.f32.mxu1 %vm3808_vm1, %v3807_v1 }
0x10de   :  { %v3643_v7 = vpop.f32.mrf.mxu0  ;;  %3677 = vmatprep.mubr.msk.f32.mxu0 %vm3808_vm1, %v3807_v1  ;;  %3670 = vmatpush3.msra.mxu0 %v3369_v31  ;;  %v3187_v6 = vld [vmem:[%s4618_s18 + $0x18] sm:$0xff] }
0x10df   :  { %3671 = vmatprep.subr.mxu0 %v3807_v1  ;;  %3681 = vmatpush3.msra.mxu1 %v3380_v35  ;;  %v3186_v7 = vld [vmem:[%s4618_s18 + $0x10] sm:$0xff] }
0x10e0   :  { %3682 = vmatprep.subr.mxu1 %v3807_v1 }
0x10e1   :  { %3683 = vmatpush3.msra.mxu1 %v3379_v36 }
0x10e2   :  { %3684 = vmatprep.subr.mxu1 %v3807_v1 }
0x10e3   :  { %3685 = vmatpush3.msra.mxu1 %v3378_v37 }
0x10e4   :  { %3686 = vmatprep.subr.mxu1 %v3807_v1 }
0x10e5   :  { %3687 = vmatpush3.msra.mxu1 %v3377_v38 }
0x10e6   :  { %3688 = vmatprep.subr.mxu1 %v3807_v1 }
0x10e7   :  { %3689 = vmatpush3.msra.mxu1 %v3376_v39 }
0x10e8   :  { %3690 = vmatprep.subr.mxu1 %v3807_v1 }
0x10e9   :  { %3691 = vmatpush3.msra.mxu1 %v3375_v49 }
0x10ea   :  { %3692 = vmatprep.subr.mxu1 %v3807_v1 }
0x10eb   :  { %3693 = vmatpush3.msra.mxu1 %v3374_v50 }
0x10ec   :  { %3694 = vmatprep.subr.mxu1 %v3807_v1 }
0x10ed   :  { %3695 = vmatpush3.msra.mxu1 %v3373_v51 }
0x1134   :  { %v2704_v8 = vpop.f32.mrf.mxu0 }
0x1135   :  { %v2927_v11 = vsel %vm478_vm9, %v2704_v8, 0.0  ;;  %v3185_v8 = vld [vmem:[%s4618_s18 + $0x8] sm:$0xff] }
0x1136   :  { %v3653_v9 = vpop.f32.mrf.mxu0 }
0x1137   :  { %v3184_v9 = vld [vmem:[%s4618_s18] sm:$0xff]  ;;  %s3814_s18 = smov [#allocation4]  }
0x1138   :  { %s3287_s1 = sshll.u32 %s3814_s18, 4  ;;  %s3288_s1 = int_to_ptr.vmem [resolvable:$true] %s3287_s1 }
0x1139   :  { %s3763_s9 = scalar_lea.vmem %s3288_s1, 512  ;;  %p3768_p1 = scmp.lt.s32.totalorder %s3288_s1, %s3288_s1 }
0x113a   :  { %p3764_p0 = scmp.ne.s32.totalorder %s3288_s1, %s3763_s9  ;;  %p3769_p2 = scmp.lt.s32.totalorder %s3763_s9, %s3763_s9 }
0x113c   :  { %p3770_p3 = por %p3769_p2, %p3768_p1 }
0x113e   :  { %p3771_p4 = pnand %p3770_p3, %p3764_p0 }
0x1198   :  { %v2777_v33 = vpop.f32.mrf.mxu1 }
0x1199   :  { %v2928_v10 = vsel %vm478_vm9, %v2777_v33, 0.0 }
0x119a   :  { %v3658_v19 = vpop.f32.mrf.mxu1  ;;  %v2929_v13 = vadd.f32 %v2928_v10, %v2927_v11 }
0x119c   :  { %v2923_v12 = vpop.f32.mrf.mxu1 }
0x119d   :  { %v2850_v14 = vpop.f32.mrf.mxu0  ;;  %v2932_v20 = vsel %vm478_vm9, %v2923_v12, 0.0  ;;  %v3386_v12 = vld [vmem:[%s4616_s16 + $0x1] ss:$0 sm:$0xff] }
0x119e   :  { %v2930_v15 = vsel %vm478_vm9, %v2850_v14, 0.0  ;;  %v3668_v16 = vpop.f32.mrf.mxu1  ;;  %v3387_v14 = vld [vmem:[%s4617_s17 + $0x1] ss:$0 sm:$0xff] }
0x119f   :  { %v2931_v17 = vadd.f32 %v2930_v15, %v2929_v13  ;;  %v3663_v18 = vpop.f32.mrf.mxu0 }
0x11a1   :  { %v2933_v22 = vadd.f32 %v2932_v20, %v2931_v17 }
0x11a3   :  { %v2942_v25 = vadd.f32 %v3361_v21, %v2933_v22 }
0x11a5   :  { %v2943_v26 = vadd.f32 %v2942_v25, %v4385_v57  ;;  %v3368_v57 = vld [vmem:[%s4612_s12 + $0x30] sm:$0xff] }
0x11a6   :  { %3672 = vmatpush3.msra.mxu0 %v3368_v57 }
0x11a7   :  { %v2948_v27 = vsel %vm478_vm9, %v2943_v26, 0.0  ;;  %3673 = vmatprep.subr.mxu0 %v3807_v1 }
0x11a8   :  { %2949 = vadd.xlane.f32.xlu1 %v2948_v27  ;;  %3674 = vmatpush3.msra.mxu0 %v3367_v32 }
0x11a9   :  { %3675 = vmatprep.subr.mxu0 %v3807_v1 }
0x11aa   :  { %3676 = vmatpush3.msra.mxu0 %v3366_v34 }
0x11ab   :  { %3699 = vmatprep.subr.mxu0 %v3807_v1 }
0x1231   :  { %v2950_v23 = vpop.xlane.xlu1 %2949 }
0x1232   :  { %v2951_v24 = vmul.f32 0.03125, %v2950_v23 }
0x1234   :  { %v2952_v28 = vsub.f32 %v2943_v26, %v2951_v24 }
0x1236   :  { %v2953_v29 = vmul.f32 %v2952_v28, %v2952_v28 }
0x1238   :  { %v2954_v30 = vsel %vm478_vm9, %v2953_v29, 0.0 }
0x1239   :  { %2955 = vadd.xlane.f32.xlu0 %v2954_v30 }
0x12c2   :  { %v2956_v40 = vpop.xlane.xlu0 %2955 }
0x12c3   :  { %v2957_v41 = vmul.f32 0.03125, %v2956_v40 }
0x12c5   :  { %v2958_v42 = vadd.f32 1e-06, %v2957_v41 }
0x12c7   :  { %3759 = vrsqrt.f32 %v2958_v42 }
0x12d4   :  { %v3760_v43 = vpop.eup %3759 }
0x12d5   :  { %v2960_v45 = vmul.f32 %v3760_v43, %v2952_v28 }
0x12d7   :  { %v2967_v47 = vmul.f32 %v3364_v44, %v2960_v45 }
0x12d9   :  { %v2974_v48 = vadd.f32 %v3365_v46, %v2967_v47 }
0x12db   :  { %3678 = vmatmul.mubr.msk.f32.vlgmr.msra.gmra.mxu0 %vm478_vm9, %v2974_v48 }
0x12dc   :  { %3707 = vmatprep.mubr.msk.f32.mxu0 %vm3808_vm1, %v3807_v1  ;;  %3700 = vmatpush3.msra.mxu0 %v3187_v6 }
0x12dd   :  { %3701 = vmatprep.subr.mxu0 %v3807_v1 }
0x12de   :  { %3702 = vmatpush3.msra.mxu0 %v3186_v7 }
0x12df   :  { %3703 = vmatprep.subr.mxu0 %v3807_v1 }
0x12e0   :  { %3704 = vmatpush3.msra.mxu0 %v3185_v8 }
0x12e1   :  { %3705 = vmatprep.subr.mxu0 %v3807_v1 }
0x12e2   :  { %3706 = vmatpush3.msra.mxu0 %v3184_v9 }
0x139b   :  { %v3057_v53 = vpop.f32.mrf.mxu0 }
0x139c   :  { %v3058_v54 = vadd.f32 %v3371_v52, %v3057_v53 }
0x139d   :  { %v3679_v55 = vpop.f32.mrf.mxu0 }
0x139e   :  { %v3061_v56 = vmax.f32 %v3058_v54, 0.0 }
0x13a0   :  { %3697 = vmatmul.mubr.msk.f32.vlgmr.msra.gmra.mxu1 %vm1773_vm11, %v3061_v56 }
0x1460   :  { %v3148_v59 = vpop.f32.mrf.mxu1 }
0x1461   :  { %v3149_v60 = vadd.f32 %v3382_v58, %v3148_v59 }
0x1462   :  { %v3698_v61 = vpop.f32.mrf.mxu1 }
0x1463   :  { %v3152_v62 = vadd.f32 %v3149_v60, %v2974_v48 }
0x1465   :  { %v3157_v63 = vsel %vm478_vm9, %v3152_v62, 0.0 }
0x1466   :  { %3158 = vadd.xlane.f32.xlu0 %v3157_v63 }
0x14ef   :  { %v3159_v0 = vpop.xlane.xlu0 %3158 }
0x14f0   :  { %v3160_v2 = vmul.f32 0.03125, %v3159_v0 }
0x14f2   :  { %v3161_v3 = vsub.f32 %v3152_v62, %v3160_v2 }
0x14f4   :  { %v3162_v4 = vmul.f32 %v3161_v3, %v3161_v3 }
0x14f6   :  { %v3163_v5 = vsel %vm478_vm9, %v3162_v4, 0.0 }
0x14f7   :  { %3164 = vadd.xlane.f32.xlu1 %v3163_v5 }
0x1580   :  { %v3165_v33 = vpop.xlane.xlu1 %3164 }
0x1581   :  { %v3166_v10 = vmul.f32 0.03125, %v3165_v33 }
0x1583   :  { %v3167_v19 = vadd.f32 1e-06, %v3166_v10 }
0x1585   :  { %3761 = vrsqrt.f32 %v3167_v19 }
0x1592   :  { %v3762_v11 = vpop.eup %3761 }
0x1593   :  { %v3169_v13 = vmul.f32 %v3762_v11, %v3161_v3 }
0x1595   :  { %v3176_v15 = vmul.f32 %v3386_v12, %v3169_v13 }
0x1597   :  { %v3183_v16 = vadd.f32 %v3387_v14, %v3176_v15 }
0x1599   :  { %3708 = vmatmul.mubr.msk.f32.vlgmr.msra.gmra.mxu0 %vm478_vm9, %v3183_v16 }
0x159a   :  { %3774 = shalt.err (!%p3771_p4)
}
0x159b   :  { %s3815_s16 = smov 128   ;;  %s3816_s5 = smov 8   ;;  %v3388_v1 = vld [vmem:[%s4619_s19] ss:$0 sm:$0xff]  ;;  %vm3270_vm12 = vcmask 48128  }
0x159c   :  { %3293 = dma.vmem_to_hbm [thread:$0]  %s3288_s1, 512, %s4622_s22, [#allocation5], %s3815_s16, %s3815_s16, %s3816_s5  }
0x159d   :  { %v3268_v18 = vld [vmem:[%s4620_s20] sm:$0xff]  ;;  %s3817_s28 = smov [#allocation2]  }
0x159e   :  { %s3278_s7 = sshll.u32 %s3817_s28, 4  ;;  %s3279_s7 = int_to_ptr.vmem [resolvable:$true] %s3278_s7 }
0x159f   :  { %s3783_s26 = scalar_lea.vmem %s3279_s7, 128  ;;  %p3788_p6 = scmp.lt.s32.totalorder %s3279_s7, %s3279_s7 }
0x15a0   :  { %p3784_p5 = scmp.ne.s32.totalorder %s3279_s7, %s3783_s26  ;;  %p3789_p7 = scmp.lt.s32.totalorder %s3783_s26, %s3783_s26 }
0x15a2   :  { %p3790_p8 = por %p3789_p7, %p3788_p6 }
0x15a4   :  { %p3791_p9 = pnand %p3790_p8, %p3784_p5 }
0x1659   :  { %v3264_v17 = vpop.f32.mrf.mxu0 }
0x165a   :  { %v3265_v20 = vadd.f32 %v3388_v1, %v3264_v17 }
0x165b   :  { %v3709_v21 = vpop.f32.mrf.mxu0 }
0x165c   :  { %v3269_v22 = vadd.f32 %v3268_v18, %v3265_v20 }
0x165e   :  { %3271 = vst.msk [vmem:[#allocation2] sm:$0xff] %vm3270_vm12, %v3269_v22 }
0x165f   :  { %3794 = shalt.err (!%p3791_p9)
}
0x1660   :  { %3281 = dma.vmem_to_hbm [thread:$0]  %s3279_s7, 128, %s4621_s21, [#allocation3]  }
0x1661   :  { %3803 = dma.done.wait [#allocation3], 128  }
0x1662   :  { %3804 = vsyncadd [#allocation3], 4294967168 }
0x1663   :  { %3805 = dma.done.wait [#allocation5], 512  }
0x1664   :  { %3806 = vsyncadd [#allocation5], 4294966784 }
0x1665   :  { %3300 = vsyncpa [#allocation3], 1 }
0x1666   :  { %3301 = vsyncpa [#allocation5], 1 }

</bundles_post_ra>
